<compile_context>
chip_gen: v7x
topology: tpu7x:2x2x1
jax: 0.10.0
libtpu: 0.0.40
codegen_flags: <defaults>
</compile_context>

<pallas_src>
import math
from functools import partial

import jax
import jax.numpy as jnp
from jax.experimental import pallas as pl
from jax.experimental.pallas import tpu as pltpu


# ----------------------------- kernel helpers -----------------------------

def _layer_norm(x, g, b, eps=1e-5):
    mu = jnp.mean(x, axis=-1, keepdims=True)
    var = jnp.mean((x - mu) ** 2, axis=-1, keepdims=True)
    return (x - mu) * jax.lax.rsqrt(var + eps) * g + b


def _mha(x_q, x_kv, wq3, wk3, wv3, wo, bias, n_heads, head_dim):
    """Multi-head attention on 2-D tiles.

    x_q: (Sq, D), x_kv: (Sk, D) in compute dtype.
    wq3/wk3/wv3: (H, D, hd) head-major projection weights.
    wo: (D, D) un-split output projection.
    bias: additive mask, (Sq, Sk) or (1, Sk), f32; 0 allowed, -1e9 masked.
    Returns (Sq, D) float32.
    """
    cd = x_q.dtype
    H = n_heads
    scale = 1.0 / math.sqrt(head_dim)

    # Head split folded into the projection: batched (over heads) matmuls
    # that emit head-major (H, S, hd) directly -- no lane slices / stack.
    xq_b = jnp.broadcast_to(x_q[None], (H,) + x_q.shape)          # (H, Sq, D)
    xkv_b = xq_b if x_kv is x_q else jnp.broadcast_to(
        x_kv[None], (H,) + x_kv.shape)                            # (H, Sk, D)

    q3 = (jnp.einsum('hsd,hde->hse', xq_b, wq3,
                     preferred_element_type=jnp.float32) * scale).astype(cd)
    k3 = jnp.einsum('hsd,hde->hse', xkv_b, wk3,
                    preferred_element_type=jnp.float32).astype(cd)
    v3 = jnp.einsum('hsd,hde->hse', xkv_b, wv3,
                    preferred_element_type=jnp.float32).astype(cd)

    # Scores: batched contraction with heads as the batch dim; contraction
    # over the last dim of both operands (no explicit k.T materialized).
    s = jnp.einsum('hqe,hke->hqk', q3, k3,
                   preferred_element_type=jnp.float32)            # (H,Sq,Sk)
    s = s + bias[None]                                            # mask once

    # Softmax kept in f32; divide via EUP approximate reciprocal.
    s = s - jnp.max(s, axis=-1, keepdims=True)
    p = jnp.exp(s)
    denom = jnp.sum(p, axis=-1, keepdims=True)
    p = (p * pl.reciprocal(denom, approx=True)).astype(cd)

    # P @ V, batched over heads.
    y3 = jnp.einsum('hqk,hke->hqe', p, v3,
                    preferred_element_type=jnp.float32)           # (H,Sq,hd)

    # Re-merge heads once and do a single deep-K matmul with the un-split
    # W_o: the head reduction happens inside the MXU f32 accumulator instead
    # of an H-way VPU add over an (H, Sq, D) f32 intermediate.
    y = jnp.concatenate([y3[h] for h in range(H)], axis=-1).astype(cd)
    return jnp.dot(y, wo, preferred_element_type=jnp.float32)     # (Sq, D)


# ------------------------------- the kernel --------------------------------

def decoder_layer_kernel(n_heads, head_dim,
                         tgt_ref, src_ref, tkpm_ref, skpm_ref,
                         wq1_ref, wk1_ref, wv1_ref, wo1_ref,
                         wq2_ref, wk2_ref, wv2_ref, wo2_ref,
                         g1_ref, b1_ref, g2_ref, b2_ref, g3_ref, b3_ref,
                         w_ff1_ref, b_ff1_ref, w_ff2_ref, b_ff2_ref,
                         out_ref):
    cd = tgt_ref.dtype
    tgt = tgt_ref[0]            # (S1, D) compute dtype
    src = src_ref[0]            # (S2, D)
    S1 = tgt.shape[0]

    # Additive masks built in-kernel: two iota compares (VPU) plus the O(S)
    # key-padding rows -- nothing O(S^2) is DMA'd from HBM.
    row = jax.lax.broadcasted_iota(jnp.int32, (S1, S1), 0)
    col = jax.lax.broadcasted_iota(jnp.int32, (S1, S1), 1)
    causal_bias = jnp.where(col > row, -1e9, 0.0).astype(jnp.float32)
    self_bias = causal_bias + jnp.where(tkpm_ref[0] > 0.5, -1e9, 0.0)
    cross_bias = jnp.where(skpm_ref[0] > 0.5, -1e9, 0.0)          # (1, S2)

    # masked self-attention + residual + norm1 (residual / LN in f32)
    a1 = _mha(tgt, tgt, wq1_ref[...], wk1_ref[...], wv1_ref[...], wo1_ref[...],
              self_bias, n_heads, head_dim)
    t32 = _layer_norm(tgt.astype(jnp.float32) + a1, g1_ref[...], b1_ref[...])

    # cross-attention + residual + norm2
    a2 = _mha(t32.astype(cd), src, wq2_ref[...], wk2_ref[...], wv2_ref[...],
              wo2_ref[...], cross_bias, n_heads, head_dim)
    t32 = _layer_norm(t32 + a2, g2_ref[...], b2_ref[...])

    # feed-forward + residual + norm3 (f32 accumulation, f32 bias/ReLU)
    h = jnp.maximum(
        jnp.dot(t32.astype(cd), w_ff1_ref[...],
                preferred_element_type=jnp.float32) + b_ff1_ref[...], 0.0)
    f = jnp.dot(h.astype(cd), w_ff2_ref[...],
                preferred_element_type=jnp.float32) + b_ff2_ref[...]
    t32 = _layer_norm(t32 + f, g3_ref[...], b3_ref[...])

    out_ref[0] = t32.astype(out_ref.dtype)


# ------------------------------- wrapper ------------------------------------

def _vmem_limit_bytes():
    """~3/4 of physical VMEM (48 MiB on v7x, 96 MiB on v5e/v6e)."""
    try:
        cap = getattr(pltpu.get_tpu_info(), "vmem_capacity_bytes", None)
        if cap:
            return int(cap) * 3 // 4
    except Exception:
        pass
    return 64 * 1024 * 1024


def transformer_decoder_layer(tgt, src, tgt_mask_attn, src_key_padding_mask,
                              tgt_key_padding_mask, params, n_heads,
                              compute_dtype=jnp.float32, out_dtype=None):
    # tgt_mask_attn is the standard subsequent-token mask (module docstring);
    # it is rebuilt in-kernel from iota rather than DMA'd -- see TODO above.
    del tgt_mask_attn

    B, S1, D = tgt.shape
    _, S2, _ = src.shape
    assert D % n_heads == 0, "d_model must be divisible by n_heads"
    head_dim = D // n_heads
    f32 = jnp.float32
    cd = compute_dtype
    out_dtype = out_dtype if out_dtype is not None else jnp.float32

    # O(S)-sized key-padding vectors (combined / broadcast inside the kernel).
    tkpm = tgt_key_padding_mask.astype(f32).reshape(B, 1, S1)
    skpm = src_key_padding_mask.astype(f32).reshape(B, 1, S2)

    def head_major(w):      # (D, D) -> (H, D, hd), wrapper-side (free)
        return jnp.transpose(w.reshape(D, n_heads, head_dim), (1, 0, 2)).astype(cd)

    weights = [
        head_major(params['wq1']), head_major(params['wk1']),
        head_major(params['wv1']), params['wo1'].astype(cd),
        head_major(params['wq2']), head_major(params['wk2']),
        head_major(params['wv2']), params['wo2'].astype(cd),
        params['g1'].astype(f32), params['b1'].astype(f32),
        params['g2'].astype(f32), params['b2'].astype(f32),
        params['g3'].astype(f32), params['b3'].astype(f32),
        params['w_ff1'].astype(cd), params['b_ff1'].astype(f32),
        params['w_ff2'].astype(cd), params['b_ff2'].astype(f32),
    ]

    def call(single_buffer_weights):
        def w_spec(x):
            nd = x.ndim
            kwargs = {}
            if single_buffer_weights:
                # Grid-invariant block index -> the second pipeline buffer is
                # dead VMEM; request a single buffer.
                kwargs = dict(pipeline_mode=pl.Buffered(1))
            return pl.BlockSpec(x.shape, lambda b, _nd=nd: (0,) * _nd, **kwargs)

        in_specs = [
            pl.BlockSpec((1, S1, D), lambda b: (b, 0, 0)),    # tgt
            pl.BlockSpec((1, S2, D), lambda b: (b, 0, 0)),    # src
            pl.BlockSpec((1, 1, S1), lambda b: (b, 0, 0)),    # tgt key padding
            pl.BlockSpec((1, 1, S2), lambda b: (b, 0, 0)),    # src key padding
        ] + [w_spec(w) for w in weights]

        return pl.pallas_call(
            partial(decoder_layer_kernel, n_heads, head_dim),
            out_shape=jax.ShapeDtypeStruct((B, S1, D), out_dtype),
            grid=(B,),
            in_specs=in_specs,
            out_specs=pl.BlockSpec((1, S1, D), lambda b: (b, 0, 0)),
            compiler_params=pltpu.CompilerParams(
                dimension_semantics=("parallel",),
                vmem_limit_bytes=_vmem_limit_bytes()),
        )(tgt.astype(cd), src.astype(cd), tkpm, skpm, *weights)

    try:
        return call(True)
    except Exception:
        # TODO(synk): pl.Buffered(1) not accepted by this jax/Mosaic version;
        # fall back to default double-buffered weight specs.
        return call(False)


# --------------------------- pure-JAX reference ------------------------------

def reference(tgt, src, tgt_mask_attn, src_kpm, tgt_kpm, params, n_heads):
    B, S1, D = tgt.shape
    S2 = src.shape[1]
    hd = D // n_heads
    p = params

    def mha(xq, xkv, wq, wk, wv, wo, mask):
        q = (xq @ wq).reshape(B, -1, n_heads, hd)
        k = (xkv @ wk).reshape(B, -1, n_heads, hd)
        v = (xkv @ wv).reshape(B, -1, n_heads, hd)
        attn = jnp.einsum('bshd,bthd->bhst', q, k) / math.sqrt(hd)
        attn = jnp.where(mask[:, None, :, :] > 0.5, -1e9, attn)
        attn = jax.nn.softmax(attn, axis=-1)
        y = jnp.einsum('bhst,bthd->bshd', attn, v).reshape(B, -1, D)
        return y @ wo

    def ln(x, g, b):
        mu = x.mean(-1, keepdims=True)
        var = ((x - mu) ** 2).mean(-1, keepdims=True)
        return (x - mu) / jnp.sqrt(var + 1e-5) * g + b

    self_mask = jnp.maximum(tgt_mask_attn[None], tgt_kpm[:, None, :])
    cross_mask = jnp.broadcast_to(src_kpm[:, None, :], (B, S1, S2))

    t = ln(tgt + mha(tgt, tgt, p['wq1'], p['wk1'], p['wv1'], p['wo1'], self_mask),
           p['g1'][0], p['b1'][0])
    t = ln(t + mha(t, src, p['wq2'], p['wk2'], p['wv2'], p['wo2'], cross_mask),
           p['g2'][0], p['b2'][0])
    f = jnp.maximum(t @ p['w_ff1'] + p['b_ff1'][0], 0.0) @ p['w_ff2'] + p['b_ff2'][0]
    return ln(t + f, p['g3'][0], p['b3'][0])


# --------------------------------- main --------------------------------------

if __name__ == "__main__":
    B, S1, S2 = 2, 8, 8          # batch, tgt_seq_len, src_seq_len
    D, F, H = 32, 64, 4          # d_model, d_ff, n_heads

    key = jax.random.PRNGKey(0)
    ks = jax.random.split(key, 16)

    def w(k, shape, scale=0.1):
        return (scale * jax.random.normal(k, shape)).astype(jnp.float32)

    params = {
        # attention weights stored pre-transposed: y = x @ W  (W: [in, out])
        "wq1": w(ks[0], (D, D)), "wk1": w(ks[1], (D, D)),
        "wv1": w(ks[2], (D, D)), "wo1": w(ks[3], (D, D)),
        "wq2": w(ks[4], (D, D)), "wk2": w(ks[5], (D, D)),
        "wv2": w(ks[6], (D, D)), "wo2": w(ks[7], (D, D)),
        # LayerNorm params, shaped (1, D) for 2-D friendliness in the kernel
        "g1": jnp.ones((1, D), jnp.float32), "b1": jnp.zeros((1, D), jnp.float32),
        "g2": jnp.ones((1, D), jnp.float32), "b2": jnp.zeros((1, D), jnp.float32),
        "g3": jnp.ones((1, D), jnp.float32), "b3": jnp.zeros((1, D), jnp.float32),
        # FFN
        "w_ff1": w(ks[8], (D, F)), "b_ff1": w(ks[9], (1, F)),
        "w_ff2": w(ks[10], (F, D)), "b_ff2": w(ks[11], (1, D)),
    }

    tgt = jax.random.normal(ks[12], (B, S1, D), jnp.float32)
    src = jax.random.normal(ks[13], (B, S2, D), jnp.float32)

    # causal mask: 1.0 where attending to subsequent tokens is forbidden
    causal = jnp.triu(jnp.ones((S1, S1), jnp.float32), k=1)
    # pad the last tgt token in batch 0 and the last 2 src tokens in batch 1
    tgt_kpm = jnp.zeros((B, S1), jnp.float32).at[0, -1].set(1.0)
    src_kpm = jnp.zeros((B, S2), jnp.float32).at[1, -2:].set(1.0)

    ref = reference(tgt, src, causal, src_kpm, tgt_kpm, params, H)

    # f32 compute path (tolerance covers the EUP approximate reciprocal).
    out = transformer_decoder_layer(tgt, src, causal, src_kpm, tgt_kpm,
                                    params, H, compute_dtype=jnp.float32)
    out = jax.block_until_ready(out)
    assert out.shape == (B, S1, D)
    assert jnp.allclose(out, ref, rtol=1e-2, atol=1e-2), (
        f"f32 max abs err {jnp.max(jnp.abs(out - ref))}")

    # bf16 compute + bf16 output path (halved HBM traffic, native MXU dtype
    # on v6e/v7x; LN/softmax/residual math stays f32 inside the kernel).
    out_bf16 = transformer_decoder_layer(tgt, src, causal, src_kpm, tgt_kpm,
                                         params, H, compute_dtype=jnp.bfloat16,
                                         out_dtype=jnp.bfloat16)
    out_bf16 = jax.block_until_ready(out_bf16)
    assert out_bf16.dtype == jnp.bfloat16
    assert jnp.allclose(out_bf16.astype(jnp.float32), ref,
                        rtol=1e-1, atol=1e-1), (
        f"bf16 max abs err {jnp.max(jnp.abs(out_bf16.astype(jnp.float32) - ref))}")

    print("KERNEL_OK")
</pallas_src>

<mosaic_0001>
module attributes {stable_mosaic.version = 11 : i64} {
  func.func @decoder_layer_kernel(%arg0: i32, %arg1: memref<1x8x32xf32, #tpu.memory_space<vmem>>, %arg2: memref<1x8x32xf32, #tpu.memory_space<vmem>>, %arg3: memref<1x1x8xf32, #tpu.memory_space<vmem>>, %arg4: memref<1x1x8xf32, #tpu.memory_space<vmem>>, %arg5: memref<4x32x8xf32, #tpu.memory_space<vmem>>, %arg6: memref<4x32x8xf32, #tpu.memory_space<vmem>>, %arg7: memref<4x32x8xf32, #tpu.memory_space<vmem>>, %arg8: memref<32x32xf32, #tpu.memory_space<vmem>>, %arg9: memref<4x32x8xf32, #tpu.memory_space<vmem>>, %arg10: memref<4x32x8xf32, #tpu.memory_space<vmem>>, %arg11: memref<4x32x8xf32, #tpu.memory_space<vmem>>, %arg12: memref<32x32xf32, #tpu.memory_space<vmem>>, %arg13: memref<1x32xf32, #tpu.memory_space<vmem>>, %arg14: memref<1x32xf32, #tpu.memory_space<vmem>>, %arg15: memref<1x32xf32, #tpu.memory_space<vmem>>, %arg16: memref<1x32xf32, #tpu.memory_space<vmem>>, %arg17: memref<1x32xf32, #tpu.memory_space<vmem>>, %arg18: memref<1x32xf32, #tpu.memory_space<vmem>>, %arg19: memref<32x64xf32, #tpu.memory_space<vmem>>, %arg20: memref<1x64xf32, #tpu.memory_space<vmem>>, %arg21: memref<64x32xf32, #tpu.memory_space<vmem>>, %arg22: memref<1x32xf32, #tpu.memory_space<vmem>>, %arg23: memref<1x8x32xf32, #tpu.memory_space<vmem>>) attributes {dimension_semantics = [#tpu.dimension_semantics<parallel>], iteration_bounds = array<i64: 2>, scalar_prefetch = 0 : i64, scratch_operands = 0 : i64, tpu.core_type = #tpu.core_type<tc>, window_params = [{transform_indices = @transform_0, window_bounds = array<i64: 1, 8, 32>}, {transform_indices = @transform_1, window_bounds = array<i64: 1, 8, 32>}, {transform_indices = @transform_2, window_bounds = array<i64: 1, 1, 8>}, {transform_indices = @transform_3, window_bounds = array<i64: 1, 1, 8>}, {pipeline_mode = #tpu.pipeline_mode<synchronous>, transform_indices = @transform_4, window_bounds = array<i64: 4, 32, 8>}, {pipeline_mode = #tpu.pipeline_mode<synchronous>, transform_indices = @transform_5, window_bounds = array<i64: 4, 32, 8>}, {pipeline_mode = #tpu.pipeline_mode<synchronous>, transform_indices = @transform_6, window_bounds = array<i64: 4, 32, 8>}, {pipeline_mode = #tpu.pipeline_mode<synchronous>, transform_indices = @transform_7, window_bounds = array<i64: 32, 32>}, {pipeline_mode = #tpu.pipeline_mode<synchronous>, transform_indices = @transform_8, window_bounds = array<i64: 4, 32, 8>}, {pipeline_mode = #tpu.pipeline_mode<synchronous>, transform_indices = @transform_9, window_bounds = array<i64: 4, 32, 8>}, {pipeline_mode = #tpu.pipeline_mode<synchronous>, transform_indices = @transform_10, window_bounds = array<i64: 4, 32, 8>}, {pipeline_mode = #tpu.pipeline_mode<synchronous>, transform_indices = @transform_11, window_bounds = array<i64: 32, 32>}, {pipeline_mode = #tpu.pipeline_mode<synchronous>, transform_indices = @transform_12, window_bounds = array<i64: 1, 32>}, {pipeline_mode = #tpu.pipeline_mode<synchronous>, transform_indices = @transform_13, window_bounds = array<i64: 1, 32>}, {pipeline_mode = #tpu.pipeline_mode<synchronous>, transform_indices = @transform_14, window_bounds = array<i64: 1, 32>}, {pipeline_mode = #tpu.pipeline_mode<synchronous>, transform_indices = @transform_15, window_bounds = array<i64: 1, 32>}, {pipeline_mode = #tpu.pipeline_mode<synchronous>, transform_indices = @transform_16, window_bounds = array<i64: 1, 32>}, {pipeline_mode = #tpu.pipeline_mode<synchronous>, transform_indices = @transform_17, window_bounds = array<i64: 1, 32>}, {pipeline_mode = #tpu.pipeline_mode<synchronous>, transform_indices = @transform_18, window_bounds = array<i64: 32, 64>}, {pipeline_mode = #tpu.pipeline_mode<synchronous>, transform_indices = @transform_19, window_bounds = array<i64: 1, 64>}, {pipeline_mode = #tpu.pipeline_mode<synchronous>, transform_indices = @transform_20, window_bounds = array<i64: 64, 32>}, {pipeline_mode = #tpu.pipeline_mode<synchronous>, transform_indices = @transform_21, window_bounds = array<i64: 1, 32>}, {transform_indices = @transform_22, window_bounds = array<i64: 1, 8, 32>}]} {
    %c0 = arith.constant 0 : index
    %c0_0 = arith.constant 0 : index
    %c0_1 = arith.constant 0 : index
    %0 = vector.load %arg1[%c0, %c0_0, %c0_1] : memref<1x8x32xf32, #tpu.memory_space<vmem>>, vector<1x8x32xf32>
    %1 = vector.shape_cast %0 : vector<1x8x32xf32> to vector<8x32xf32>
    %c0_2 = arith.constant 0 : index
    %c0_3 = arith.constant 0 : index
    %c0_4 = arith.constant 0 : index
    %2 = vector.load %arg2[%c0_2, %c0_3, %c0_4] : memref<1x8x32xf32, #tpu.memory_space<vmem>>, vector<1x8x32xf32>
    %3 = vector.shape_cast %2 : vector<1x8x32xf32> to vector<8x32xf32>
    %4 = tpu.iota {dimensions = array<i32: 0>} : vector<8x8xi32>
    %5 = tpu.iota {dimensions = array<i32: 1>} : vector<8x8xi32>
    %6 = arith.cmpi sgt, %5, %4 : vector<8x8xi32>
    %cst = arith.constant -1.000000e+09 : f32
    %cst_5 = arith.constant 0.000000e+00 : f32
    %7 = vector.broadcast %cst : f32 to vector<8x8xf32>
    %8 = vector.broadcast %cst_5 : f32 to vector<8x8xf32>
    %9 = arith.select %6, %7, %8 : vector<8x8xi1>, vector<8x8xf32>
    %c0_6 = arith.constant 0 : index
    %c0_7 = arith.constant 0 : index
    %c0_8 = arith.constant 0 : index
    %10 = vector.load %arg3[%c0_6, %c0_7, %c0_8] : memref<1x1x8xf32, #tpu.memory_space<vmem>>, vector<1x1x8xf32>
    %11 = vector.shape_cast %10 : vector<1x1x8xf32> to vector<1x8xf32>
    %cst_9 = arith.constant 5.000000e-01 : f32
    %12 = vector.broadcast %cst_9 : f32 to vector<1x8xf32>
    %13 = arith.cmpf ogt, %11, %12 : vector<1x8xf32>
    %cst_10 = arith.constant -1.000000e+09 : f32
    %cst_11 = arith.constant 0.000000e+00 : f32
    %14 = vector.broadcast %cst_10 : f32 to vector<1x8xf32>
    %15 = vector.broadcast %cst_11 : f32 to vector<1x8xf32>
    %16 = arith.select %13, %14, %15 : vector<1x8xi1>, vector<1x8xf32>
    %17 = vector.broadcast %16 : vector<1x8xf32> to vector<8x8xf32>
    %18 = arith.addf %9, %17 : vector<8x8xf32>
    %c0_12 = arith.constant 0 : index
    %c0_13 = arith.constant 0 : index
    %c0_14 = arith.constant 0 : index
    %19 = vector.load %arg4[%c0_12, %c0_13, %c0_14] : memref<1x1x8xf32, #tpu.memory_space<vmem>>, vector<1x1x8xf32>
    %20 = vector.shape_cast %19 : vector<1x1x8xf32> to vector<1x8xf32>
    %cst_15 = arith.constant 5.000000e-01 : f32
    %21 = vector.broadcast %cst_15 : f32 to vector<1x8xf32>
    %22 = arith.cmpf ogt, %20, %21 : vector<1x8xf32>
    %cst_16 = arith.constant -1.000000e+09 : f32
    %cst_17 = arith.constant 0.000000e+00 : f32
    %23 = vector.broadcast %cst_16 : f32 to vector<1x8xf32>
    %24 = vector.broadcast %cst_17 : f32 to vector<1x8xf32>
    %25 = arith.select %22, %23, %24 : vector<1x8xi1>, vector<1x8xf32>
    %c0_18 = arith.constant 0 : index
    %c0_19 = arith.constant 0 : index
    %c0_20 = arith.constant 0 : index
    %26 = vector.load %arg5[%c0_18, %c0_19, %c0_20] : memref<4x32x8xf32, #tpu.memory_space<vmem>>, vector<4x32x8xf32>
    %c0_21 = arith.constant 0 : index
    %c0_22 = arith.constant 0 : index
    %c0_23 = arith.constant 0 : index
    %27 = vector.load %arg6[%c0_21, %c0_22, %c0_23] : memref<4x32x8xf32, #tpu.memory_space<vmem>>, vector<4x32x8xf32>
    %c0_24 = arith.constant 0 : index
    %c0_25 = arith.constant 0 : index
    %c0_26 = arith.constant 0 : index
    %28 = vector.load %arg7[%c0_24, %c0_25, %c0_26] : memref<4x32x8xf32, #tpu.memory_space<vmem>>, vector<4x32x8xf32>
    %c0_27 = arith.constant 0 : index
    %c0_28 = arith.constant 0 : index
    %29 = vector.load %arg8[%c0_27, %c0_28] : memref<32x32xf32, #tpu.memory_space<vmem>>, vector<32x32xf32>
    %30 = vector.shape_cast %1 : vector<8x32xf32> to vector<1x8x32xf32>
    %31 = vector.shape_cast %30 : vector<1x8x32xf32> to vector<1x8x32xf32>
    %32 = vector.broadcast %31 : vector<1x8x32xf32> to vector<4x8x32xf32>
    "tpu.trace_start"() <{level = 10 : i32, message = "hsd,hde->hse"}> : () -> ()
    %cst_29 = arith.constant dense<0.000000e+00> : vector<4x8x8xf32>
    %33 = tpu.matmul %32, %26, %cst_29 {dimension_numbers = #tpu.dot_dimension_numbers<[2], [1], [1], [2], [0, 0, 0, 1, 1, 2], [0], [0]>} : vector<4x8x32xf32>, vector<4x32x8xf32>, vector<4x8x8xf32> -> vector<4x8x8xf32>
    "tpu.trace_stop"() : () -> ()
    %cst_30 = arith.constant 0.353553385 : f32
    %34 = vector.broadcast %cst_30 : f32 to vector<4x8x8xf32>
    %35 = arith.mulf %33, %34 : vector<4x8x8xf32>
    "tpu.trace_start"() <{level = 10 : i32, message = "hsd,hde->hse"}> : () -> ()
    %cst_31 = arith.constant dense<0.000000e+00> : vector<4x8x8xf32>
    %36 = tpu.matmul %32, %27, %cst_31 {dimension_numbers = #tpu.dot_dimension_numbers<[2], [1], [1], [2], [0, 0, 0, 1, 1, 2], [0], [0]>} : vector<4x8x32xf32>, vector<4x32x8xf32>, vector<4x8x8xf32> -> vector<4x8x8xf32>
    %cst_32 = arith.constant dense<0.000000e+00> : vector<4x8x8xf32>
    %37 = tpu.matmul %32, %28, %cst_32 {dimension_numbers = #tpu.dot_dimension_numbers<[2], [1], [1], [2], [0, 0, 0, 1, 1, 2], [0], [0]>} : vector<4x8x32xf32>, vector<4x32x8xf32>, vector<4x8x8xf32> -> vector<4x8x8xf32>
    "tpu.trace_stop"() : () -> ()
    "tpu.trace_start"() <{level = 10 : i32, message = "hqe,hke->hqk"}> : () -> ()
    %cst_33 = arith.constant dense<0.000000e+00> : vector<4x8x8xf32>
    %38 = tpu.matmul %35, %36, %cst_33 {dimension_numbers = #tpu.dot_dimension_numbers<[2], [2], [1], [1], [0, 0, 0, 1, 1, 1], [0], [0]>} : vector<4x8x8xf32>, vector<4x8x8xf32>, vector<4x8x8xf32> -> vector<4x8x8xf32>
    "tpu.trace_stop"() : () -> ()
    %39 = vector.shape_cast %18 : vector<8x8xf32> to vector<1x8x8xf32>
    %40 = vector.broadcast %39 : vector<1x8x8xf32> to vector<4x8x8xf32>
    %41 = arith.addf %38, %40 : vector<4x8x8xf32>
    %cst_34 = arith.constant dense<0xFF800000> : vector<4x8xf32>
    %42 = vector.multi_reduction <maximumf>, %41, %cst_34 [2] : vector<4x8x8xf32> to vector<4x8xf32>
    %43 = vector.shape_cast %42 : vector<4x8xf32> to vector<4x8x1xf32>
    %44 = vector.broadcast %43 : vector<4x8x1xf32> to vector<4x8x8xf32>
    %45 = arith.subf %41, %44 : vector<4x8x8xf32>
    %46 = math.exp %45 : vector<4x8x8xf32>
    %cst_35 = arith.constant dense<0.000000e+00> : vector<4x8xf32>
    %47 = vector.multi_reduction <add>, %46, %cst_35 [2] : vector<4x8x8xf32> to vector<4x8xf32>
    %48 = vector.shape_cast %47 : vector<4x8xf32> to vector<4x8x1xf32>
    %49 = tpu.reciprocal %48 {approx = true} : vector<4x8x1xf32> -> vector<4x8x1xf32>
    %50 = vector.broadcast %49 : vector<4x8x1xf32> to vector<4x8x8xf32>
    %51 = arith.mulf %46, %50 : vector<4x8x8xf32>
    "tpu.trace_start"() <{level = 10 : i32, message = "hqk,hke->hqe"}> : () -> ()
    %cst_36 = arith.constant dense<0.000000e+00> : vector<4x8x8xf32>
    %52 = tpu.matmul %51, %37, %cst_36 {dimension_numbers = #tpu.dot_dimension_numbers<[2], [1], [1], [2], [0, 0, 0, 1, 1, 2], [0], [0]>} : vector<4x8x8xf32>, vector<4x8x8xf32>, vector<4x8x8xf32> -> vector<4x8x8xf32>
    "tpu.trace_stop"() : () -> ()
    %53 = vector.extract_strided_slice %52 {offsets = [0, 0, 0], sizes = [1, 8, 8], strides = [1, 1, 1]} : vector<4x8x8xf32> to vector<1x8x8xf32>
    %54 = vector.shape_cast %53 : vector<1x8x8xf32> to vector<8x8xf32>
    %55 = vector.extract_strided_slice %52 {offsets = [1, 0, 0], sizes = [1, 8, 8], strides = [1, 1, 1]} : vector<4x8x8xf32> to vector<1x8x8xf32>
    %56 = vector.shape_cast %55 : vector<1x8x8xf32> to vector<8x8xf32>
    %57 = vector.extract_strided_slice %52 {offsets = [2, 0, 0], sizes = [1, 8, 8], strides = [1, 1, 1]} : vector<4x8x8xf32> to vector<1x8x8xf32>
    %58 = vector.shape_cast %57 : vector<1x8x8xf32> to vector<8x8xf32>
    %59 = vector.extract_strided_slice %52 {offsets = [3, 0, 0], sizes = [1, 8, 8], strides = [1, 1, 1]} : vector<4x8x8xf32> to vector<1x8x8xf32>
    %60 = vector.shape_cast %59 : vector<1x8x8xf32> to vector<8x8xf32>
    %61 = tpu.concatenate %54, %56, %58, %60 in 1 : vector<8x8xf32>, vector<8x8xf32>, vector<8x8xf32>, vector<8x8xf32> -> vector<8x32xf32>
    %cst_37 = arith.constant dense<0.000000e+00> : vector<8x32xf32>
    %62 = tpu.matmul %61, %29, %cst_37 {dimension_numbers = #tpu.dot_dimension_numbers<[1], [0], [0], [1], [0, 0, 1, 1], [], []>} : vector<8x32xf32>, vector<32x32xf32>, vector<8x32xf32> -> vector<8x32xf32>
    %63 = arith.addf %1, %62 : vector<8x32xf32>
    %c0_38 = arith.constant 0 : index
    %c0_39 = arith.constant 0 : index
    %64 = vector.load %arg13[%c0_38, %c0_39] : memref<1x32xf32, #tpu.memory_space<vmem>>, vector<1x32xf32>
    %c0_40 = arith.constant 0 : index
    %c0_41 = arith.constant 0 : index
    %65 = vector.load %arg14[%c0_40, %c0_41] : memref<1x32xf32, #tpu.memory_space<vmem>>, vector<1x32xf32>
    %cst_42 = arith.constant dense<0.000000e+00> : vector<8xf32>
    %66 = vector.multi_reduction <add>, %63, %cst_42 [1] : vector<8x32xf32> to vector<8xf32>
    %67 = vector.shape_cast %66 : vector<8xf32> to vector<8x1xf32>
    %cst_43 = arith.constant 3.200000e+01 : f32
    %68 = vector.broadcast %cst_43 : f32 to vector<8x1xf32>
    %69 = arith.divf %67, %68 : vector<8x1xf32>
    %70 = vector.broadcast %69 : vector<8x1xf32> to vector<8x32xf32>
    %71 = arith.subf %63, %70 : vector<8x32xf32>
    %72 = arith.mulf %71, %71 : vector<8x32xf32>
    %cst_44 = arith.constant dense<0.000000e+00> : vector<8xf32>
    %73 = vector.multi_reduction <add>, %72, %cst_44 [1] : vector<8x32xf32> to vector<8xf32>
    %74 = vector.shape_cast %73 : vector<8xf32> to vector<8x1xf32>
    %cst_45 = arith.constant 3.200000e+01 : f32
    %75 = vector.broadcast %cst_45 : f32 to vector<8x1xf32>
    %76 = arith.divf %74, %75 : vector<8x1xf32>
    %77 = vector.broadcast %69 : vector<8x1xf32> to vector<8x32xf32>
    %78 = arith.subf %63, %77 : vector<8x32xf32>
    %cst_46 = arith.constant 9.99999974E-6 : f32
    %79 = vector.broadcast %cst_46 : f32 to vector<8x1xf32>
    %80 = arith.addf %76, %79 : vector<8x1xf32>
    %81 = math.rsqrt %80 : vector<8x1xf32>
    %82 = vector.broadcast %81 : vector<8x1xf32> to vector<8x32xf32>
    %83 = arith.mulf %78, %82 : vector<8x32xf32>
    %84 = vector.broadcast %64 : vector<1x32xf32> to vector<8x32xf32>
    %85 = arith.mulf %83, %84 : vector<8x32xf32>
    %86 = vector.broadcast %65 : vector<1x32xf32> to vector<8x32xf32>
    %87 = arith.addf %85, %86 : vector<8x32xf32>
    %c0_47 = arith.constant 0 : index
    %c0_48 = arith.constant 0 : index
    %c0_49 = arith.constant 0 : index
    %88 = vector.load %arg9[%c0_47, %c0_48, %c0_49] : memref<4x32x8xf32, #tpu.memory_space<vmem>>, vector<4x32x8xf32>
    %c0_50 = arith.constant 0 : index
    %c0_51 = arith.constant 0 : index
    %c0_52 = arith.constant 0 : index
    %89 = vector.load %arg10[%c0_50, %c0_51, %c0_52] : memref<4x32x8xf32, #tpu.memory_space<vmem>>, vector<4x32x8xf32>
    %c0_53 = arith.constant 0 : index
    %c0_54 = arith.constant 0 : index
    %c0_55 = arith.constant 0 : index
    %90 = vector.load %arg11[%c0_53, %c0_54, %c0_55] : memref<4x32x8xf32, #tpu.memory_space<vmem>>, vector<4x32x8xf32>
    %c0_56 = arith.constant 0 : index
    %c0_57 = arith.constant 0 : index
    %91 = vector.load %arg12[%c0_56, %c0_57] : memref<32x32xf32, #tpu.memory_space<vmem>>, vector<32x32xf32>
    %92 = vector.shape_cast %87 : vector<8x32xf32> to vector<1x8x32xf32>
    %93 = vector.shape_cast %92 : vector<1x8x32xf32> to vector<1x8x32xf32>
    %94 = vector.broadcast %93 : vector<1x8x32xf32> to vector<4x8x32xf32>
    %95 = vector.shape_cast %3 : vector<8x32xf32> to vector<1x8x32xf32>
    %96 = vector.shape_cast %95 : vector<1x8x32xf32> to vector<1x8x32xf32>
    %97 = vector.broadcast %96 : vector<1x8x32xf32> to vector<4x8x32xf32>
    "tpu.trace_start"() <{level = 10 : i32, message = "hsd,hde->hse"}> : () -> ()
    %cst_58 = arith.constant dense<0.000000e+00> : vector<4x8x8xf32>
    %98 = tpu.matmul %94, %88, %cst_58 {dimension_numbers = #tpu.dot_dimension_numbers<[2], [1], [1], [2], [0, 0, 0, 1, 1, 2], [0], [0]>} : vector<4x8x32xf32>, vector<4x32x8xf32>, vector<4x8x8xf32> -> vector<4x8x8xf32>
    "tpu.trace_stop"() : () -> ()
    %cst_59 = arith.constant 0.353553385 : f32
    %99 = vector.broadcast %cst_59 : f32 to vector<4x8x8xf32>
    %100 = arith.mulf %98, %99 : vector<4x8x8xf32>
    "tpu.trace_start"() <{level = 10 : i32, message = "hsd,hde->hse"}> : () -> ()
    %cst_60 = arith.constant dense<0.000000e+00> : vector<4x8x8xf32>
    %101 = tpu.matmul %97, %89, %cst_60 {dimension_numbers = #tpu.dot_dimension_numbers<[2], [1], [1], [2], [0, 0, 0, 1, 1, 2], [0], [0]>} : vector<4x8x32xf32>, vector<4x32x8xf32>, vector<4x8x8xf32> -> vector<4x8x8xf32>
    %cst_61 = arith.constant dense<0.000000e+00> : vector<4x8x8xf32>
    %102 = tpu.matmul %97, %90, %cst_61 {dimension_numbers = #tpu.dot_dimension_numbers<[2], [1], [1], [2], [0, 0, 0, 1, 1, 2], [0], [0]>} : vector<4x8x32xf32>, vector<4x32x8xf32>, vector<4x8x8xf32> -> vector<4x8x8xf32>
    "tpu.trace_stop"() : () -> ()
    "tpu.trace_start"() <{level = 10 : i32, message = "hqe,hke->hqk"}> : () -> ()
    %cst_62 = arith.constant dense<0.000000e+00> : vector<4x8x8xf32>
    %103 = tpu.matmul %100, %101, %cst_62 {dimension_numbers = #tpu.dot_dimension_numbers<[2], [2], [1], [1], [0, 0, 0, 1, 1, 1], [0], [0]>} : vector<4x8x8xf32>, vector<4x8x8xf32>, vector<4x8x8xf32> -> vector<4x8x8xf32>
    "tpu.trace_stop"() : () -> ()
    %104 = vector.shape_cast %25 : vector<1x8xf32> to vector<1x1x8xf32>
    %105 = vector.broadcast %104 : vector<1x1x8xf32> to vector<4x8x8xf32>
    %106 = arith.addf %103, %105 : vector<4x8x8xf32>
    %cst_63 = arith.constant dense<0xFF800000> : vector<4x8xf32>
    %107 = vector.multi_reduction <maximumf>, %106, %cst_63 [2] : vector<4x8x8xf32> to vector<4x8xf32>
    %108 = vector.shape_cast %107 : vector<4x8xf32> to vector<4x8x1xf32>
    %109 = vector.broadcast %108 : vector<4x8x1xf32> to vector<4x8x8xf32>
    %110 = arith.subf %106, %109 : vector<4x8x8xf32>
    %111 = math.exp %110 : vector<4x8x8xf32>
    %cst_64 = arith.constant dense<0.000000e+00> : vector<4x8xf32>
    %112 = vector.multi_reduction <add>, %111, %cst_64 [2] : vector<4x8x8xf32> to vector<4x8xf32>
    %113 = vector.shape_cast %112 : vector<4x8xf32> to vector<4x8x1xf32>
    %114 = tpu.reciprocal %113 {approx = true} : vector<4x8x1xf32> -> vector<4x8x1xf32>
    %115 = vector.broadcast %114 : vector<4x8x1xf32> to vector<4x8x8xf32>
    %116 = arith.mulf %111, %115 : vector<4x8x8xf32>
    "tpu.trace_start"() <{level = 10 : i32, message = "hqk,hke->hqe"}> : () -> ()
    %cst_65 = arith.constant dense<0.000000e+00> : vector<4x8x8xf32>
    %117 = tpu.matmul %116, %102, %cst_65 {dimension_numbers = #tpu.dot_dimension_numbers<[2], [1], [1], [2], [0, 0, 0, 1, 1, 2], [0], [0]>} : vector<4x8x8xf32>, vector<4x8x8xf32>, vector<4x8x8xf32> -> vector<4x8x8xf32>
    "tpu.trace_stop"() : () -> ()
    %118 = vector.extract_strided_slice %117 {offsets = [0, 0, 0], sizes = [1, 8, 8], strides = [1, 1, 1]} : vector<4x8x8xf32> to vector<1x8x8xf32>
    %119 = vector.shape_cast %118 : vector<1x8x8xf32> to vector<8x8xf32>
    %120 = vector.extract_strided_slice %117 {offsets = [1, 0, 0], sizes = [1, 8, 8], strides = [1, 1, 1]} : vector<4x8x8xf32> to vector<1x8x8xf32>
    %121 = vector.shape_cast %120 : vector<1x8x8xf32> to vector<8x8xf32>
    %122 = vector.extract_strided_slice %117 {offsets = [2, 0, 0], sizes = [1, 8, 8], strides = [1, 1, 1]} : vector<4x8x8xf32> to vector<1x8x8xf32>
    %123 = vector.shape_cast %122 : vector<1x8x8xf32> to vector<8x8xf32>
    %124 = vector.extract_strided_slice %117 {offsets = [3, 0, 0], sizes = [1, 8, 8], strides = [1, 1, 1]} : vector<4x8x8xf32> to vector<1x8x8xf32>
    %125 = vector.shape_cast %124 : vector<1x8x8xf32> to vector<8x8xf32>
    %126 = tpu.concatenate %119, %121, %123, %125 in 1 : vector<8x8xf32>, vector<8x8xf32>, vector<8x8xf32>, vector<8x8xf32> -> vector<8x32xf32>
    %cst_66 = arith.constant dense<0.000000e+00> : vector<8x32xf32>
    %127 = tpu.matmul %126, %91, %cst_66 {dimension_numbers = #tpu.dot_dimension_numbers<[1], [0], [0], [1], [0, 0, 1, 1], [], []>} : vector<8x32xf32>, vector<32x32xf32>, vector<8x32xf32> -> vector<8x32xf32>
    %128 = arith.addf %87, %127 : vector<8x32xf32>
    %c0_67 = arith.constant 0 : index
    %c0_68 = arith.constant 0 : index
    %129 = vector.load %arg15[%c0_67, %c0_68] : memref<1x32xf32, #tpu.memory_space<vmem>>, vector<1x32xf32>
    %c0_69 = arith.constant 0 : index
    %c0_70 = arith.constant 0 : index
    %130 = vector.load %arg16[%c0_69, %c0_70] : memref<1x32xf32, #tpu.memory_space<vmem>>, vector<1x32xf32>
    %cst_71 = arith.constant dense<0.000000e+00> : vector<8xf32>
    %131 = vector.multi_reduction <add>, %128, %cst_71 [1] : vector<8x32xf32> to vector<8xf32>
    %132 = vector.shape_cast %131 : vector<8xf32> to vector<8x1xf32>
    %cst_72 = arith.constant 3.200000e+01 : f32
    %133 = vector.broadcast %cst_72 : f32 to vector<8x1xf32>
    %134 = arith.divf %132, %133 : vector<8x1xf32>
    %135 = vector.broadcast %134 : vector<8x1xf32> to vector<8x32xf32>
    %136 = arith.subf %128, %135 : vector<8x32xf32>
    %137 = arith.mulf %136, %136 : vector<8x32xf32>
    %cst_73 = arith.constant dense<0.000000e+00> : vector<8xf32>
    %138 = vector.multi_reduction <add>, %137, %cst_73 [1] : vector<8x32xf32> to vector<8xf32>
    %139 = vector.shape_cast %138 : vector<8xf32> to vector<8x1xf32>
    %cst_74 = arith.constant 3.200000e+01 : f32
    %140 = vector.broadcast %cst_74 : f32 to vector<8x1xf32>
    %141 = arith.divf %139, %140 : vector<8x1xf32>
    %142 = vector.broadcast %134 : vector<8x1xf32> to vector<8x32xf32>
    %143 = arith.subf %128, %142 : vector<8x32xf32>
    %cst_75 = arith.constant 9.99999974E-6 : f32
    %144 = vector.broadcast %cst_75 : f32 to vector<8x1xf32>
    %145 = arith.addf %141, %144 : vector<8x1xf32>
    %146 = math.rsqrt %145 : vector<8x1xf32>
    %147 = vector.broadcast %146 : vector<8x1xf32> to vector<8x32xf32>
    %148 = arith.mulf %143, %147 : vector<8x32xf32>
    %149 = vector.broadcast %129 : vector<1x32xf32> to vector<8x32xf32>
    %150 = arith.mulf %148, %149 : vector<8x32xf32>
    %151 = vector.broadcast %130 : vector<1x32xf32> to vector<8x32xf32>
    %152 = arith.addf %150, %151 : vector<8x32xf32>
    %c0_76 = arith.constant 0 : index
    %c0_77 = arith.constant 0 : index
    %153 = vector.load %arg19[%c0_76, %c0_77] : memref<32x64xf32, #tpu.memory_space<vmem>>, vector<32x64xf32>
    %cst_78 = arith.constant dense<0.000000e+00> : vector<8x64xf32>
    %154 = tpu.matmul %152, %153, %cst_78 {dimension_numbers = #tpu.dot_dimension_numbers<[1], [0], [0], [1], [0, 0, 1, 1], [], []>} : vector<8x32xf32>, vector<32x64xf32>, vector<8x64xf32> -> vector<8x64xf32>
    %c0_79 = arith.constant 0 : index
    %c0_80 = arith.constant 0 : index
    %155 = vector.load %arg20[%c0_79, %c0_80] : memref<1x64xf32, #tpu.memory_space<vmem>>, vector<1x64xf32>
    %156 = vector.broadcast %155 : vector<1x64xf32> to vector<8x64xf32>
    %157 = arith.addf %154, %156 : vector<8x64xf32>
    %cst_81 = arith.constant 0.000000e+00 : f32
    %158 = vector.broadcast %cst_81 : f32 to vector<8x64xf32>
    %159 = arith.maximumf %157, %158 : vector<8x64xf32>
    %c0_82 = arith.constant 0 : index
    %c0_83 = arith.constant 0 : index
    %160 = vector.load %arg21[%c0_82, %c0_83] : memref<64x32xf32, #tpu.memory_space<vmem>>, vector<64x32xf32>
    %cst_84 = arith.constant dense<0.000000e+00> : vector<8x32xf32>
    %161 = tpu.matmul %159, %160, %cst_84 {dimension_numbers = #tpu.dot_dimension_numbers<[1], [0], [0], [1], [0, 0, 1, 1], [], []>} : vector<8x64xf32>, vector<64x32xf32>, vector<8x32xf32> -> vector<8x32xf32>
    %c0_85 = arith.constant 0 : index
    %c0_86 = arith.constant 0 : index
    %162 = vector.load %arg22[%c0_85, %c0_86] : memref<1x32xf32, #tpu.memory_space<vmem>>, vector<1x32xf32>
    %163 = vector.broadcast %162 : vector<1x32xf32> to vector<8x32xf32>
    %164 = arith.addf %161, %163 : vector<8x32xf32>
    %165 = arith.addf %152, %164 : vector<8x32xf32>
    %c0_87 = arith.constant 0 : index
    %c0_88 = arith.constant 0 : index
    %166 = vector.load %arg17[%c0_87, %c0_88] : memref<1x32xf32, #tpu.memory_space<vmem>>, vector<1x32xf32>
    %c0_89 = arith.constant 0 : index
    %c0_90 = arith.constant 0 : index
    %167 = vector.load %arg18[%c0_89, %c0_90] : memref<1x32xf32, #tpu.memory_space<vmem>>, vector<1x32xf32>
    %cst_91 = arith.constant dense<0.000000e+00> : vector<8xf32>
    %168 = vector.multi_reduction <add>, %165, %cst_91 [1] : vector<8x32xf32> to vector<8xf32>
    %169 = vector.shape_cast %168 : vector<8xf32> to vector<8x1xf32>
    %cst_92 = arith.constant 3.200000e+01 : f32
    %170 = vector.broadcast %cst_92 : f32 to vector<8x1xf32>
    %171 = arith.divf %169, %170 : vector<8x1xf32>
    %172 = vector.broadcast %171 : vector<8x1xf32> to vector<8x32xf32>
    %173 = arith.subf %165, %172 : vector<8x32xf32>
    %174 = arith.mulf %173, %173 : vector<8x32xf32>
    %cst_93 = arith.constant dense<0.000000e+00> : vector<8xf32>
    %175 = vector.multi_reduction <add>, %174, %cst_93 [1] : vector<8x32xf32> to vector<8xf32>
    %176 = vector.shape_cast %175 : vector<8xf32> to vector<8x1xf32>
    %cst_94 = arith.constant 3.200000e+01 : f32
    %177 = vector.broadcast %cst_94 : f32 to vector<8x1xf32>
    %178 = arith.divf %176, %177 : vector<8x1xf32>
    %179 = vector.broadcast %171 : vector<8x1xf32> to vector<8x32xf32>
    %180 = arith.subf %165, %179 : vector<8x32xf32>
    %cst_95 = arith.constant 9.99999974E-6 : f32
    %181 = vector.broadcast %cst_95 : f32 to vector<8x1xf32>
    %182 = arith.addf %178, %181 : vector<8x1xf32>
    %183 = math.rsqrt %182 : vector<8x1xf32>
    %184 = vector.broadcast %183 : vector<8x1xf32> to vector<8x32xf32>
    %185 = arith.mulf %180, %184 : vector<8x32xf32>
    %186 = vector.broadcast %166 : vector<1x32xf32> to vector<8x32xf32>
    %187 = arith.mulf %185, %186 : vector<8x32xf32>
    %188 = vector.broadcast %167 : vector<1x32xf32> to vector<8x32xf32>
    %189 = arith.addf %187, %188 : vector<8x32xf32>
    %c0_96 = arith.constant 0 : index
    %c0_97 = arith.constant 0 : index
    %c0_98 = arith.constant 0 : index
    %190 = vector.load %arg23[%c0_96, %c0_97, %c0_98] : memref<1x8x32xf32, #tpu.memory_space<vmem>>, vector<1x8x32xf32>
    %191 = vector.shape_cast %190 : vector<1x8x32xf32> to vector<8x32xf32>
    %192 = vector.shape_cast %189 : vector<8x32xf32> to vector<1x8x32xf32>
    tpu.vector_store %arg23[%c0_96, %c0_97, %c0_98], %192 {strides = array<i32>} : memref<1x8x32xf32, #tpu.memory_space<vmem>>, vector<1x8x32xf32>,
    return
  }
  func.func @transform_0(%arg0: i32) -> (i32, i32, i32) {
    %c0_i32 = arith.constant 0 : i32
    %c0_i32_0 = arith.constant 0 : i32
    %c0_i32_1 = arith.constant 0 : i32
    return %arg0, %c0_i32, %c0_i32_0 : i32, i32, i32
  }
  func.func @transform_1(%arg0: i32) -> (i32, i32, i32) {
    %c0_i32 = arith.constant 0 : i32
    %c0_i32_0 = arith.constant 0 : i32
    %c0_i32_1 = arith.constant 0 : i32
    return %arg0, %c0_i32, %c0_i32_0 : i32, i32, i32
  }
  func.func @transform_2(%arg0: i32) -> (i32, i32, i32) {
    %c0_i32 = arith.constant 0 : i32
    %c0_i32_0 = arith.constant 0 : i32
    %c0_i32_1 = arith.constant 0 : i32
    return %arg0, %c0_i32, %c0_i32_0 : i32, i32, i32
  }
  func.func @transform_3(%arg0: i32) -> (i32, i32, i32) {
    %c0_i32 = arith.constant 0 : i32
    %c0_i32_0 = arith.constant 0 : i32
    %c0_i32_1 = arith.constant 0 : i32
    return %arg0, %c0_i32, %c0_i32_0 : i32, i32, i32
  }
  func.func @transform_4(%arg0: i32) -> (i32, i32, i32) {
    %c0_i32 = arith.constant 0 : i32
    %c0_i32_0 = arith.constant 0 : i32
    %c0_i32_1 = arith.constant 0 : i32
    %c0_i32_2 = arith.constant 0 : i32
    return %c0_i32, %c0_i32_0, %c0_i32_1 : i32, i32, i32
  }
  func.func @transform_5(%arg0: i32) -> (i32, i32, i32) {
    %c0_i32 = arith.constant 0 : i32
    %c0_i32_0 = arith.constant 0 : i32
    %c0_i32_1 = arith.constant 0 : i32
    %c0_i32_2 = arith.constant 0 : i32
    return %c0_i32, %c0_i32_0, %c0_i32_1 : i32, i32, i32
  }
  func.func @transform_6(%arg0: i32) -> (i32, i32, i32) {
    %c0_i32 = arith.constant 0 : i32
    %c0_i32_0 = arith.constant 0 : i32
    %c0_i32_1 = arith.constant 0 : i32
    %c0_i32_2 = arith.constant 0 : i32
    return %c0_i32, %c0_i32_0, %c0_i32_1 : i32, i32, i32
  }
  func.func @transform_7(%arg0: i32) -> (i32, i32) {
    %c0_i32 = arith.constant 0 : i32
    %c0_i32_0 = arith.constant 0 : i32
    %c0_i32_1 = arith.constant 0 : i32
    return %c0_i32, %c0_i32_0 : i32, i32
  }
  func.func @transform_8(%arg0: i32) -> (i32, i32, i32) {
    %c0_i32 = arith.constant 0 : i32
    %c0_i32_0 = arith.constant 0 : i32
    %c0_i32_1 = arith.constant 0 : i32
    %c0_i32_2 = arith.constant 0 : i32
    return %c0_i32, %c0_i32_0, %c0_i32_1 : i32, i32, i32
  }
  func.func @transform_9(%arg0: i32) -> (i32, i32, i32) {
    %c0_i32 = arith.constant 0 : i32
    %c0_i32_0 = arith.constant 0 : i32
    %c0_i32_1 = arith.constant 0 : i32
    %c0_i32_2 = arith.constant 0 : i32
    return %c0_i32, %c0_i32_0, %c0_i32_1 : i32, i32, i32
  }
  func.func @transform_10(%arg0: i32) -> (i32, i32, i32) {
    %c0_i32 = arith.constant 0 : i32
    %c0_i32_0 = arith.constant 0 : i32
    %c0_i32_1 = arith.constant 0 : i32
    %c0_i32_2 = arith.constant 0 : i32
    return %c0_i32, %c0_i32_0, %c0_i32_1 : i32, i32, i32
  }
  func.func @transform_11(%arg0: i32) -> (i32, i32) {
    %c0_i32 = arith.constant 0 : i32
    %c0_i32_0 = arith.constant 0 : i32
    %c0_i32_1 = arith.constant 0 : i32
    return %c0_i32, %c0_i32_0 : i32, i32
  }
  func.func @transform_12(%arg0: i32) -> (i32, i32) {
    %c0_i32 = arith.constant 0 : i32
    %c0_i32_0 = arith.constant 0 : i32
    %c0_i32_1 = arith.constant 0 : i32
    return %c0_i32, %c0_i32_0 : i32, i32
  }
  func.func @transform_13(%arg0: i32) -> (i32, i32) {
    %c0_i32 = arith.constant 0 : i32
    %c0_i32_0 = arith.constant 0 : i32
    %c0_i32_1 = arith.constant 0 : i32
    return %c0_i32, %c0_i32_0 : i32, i32
  }
  func.func @transform_14(%arg0: i32) -> (i32, i32) {
    %c0_i32 = arith.constant 0 : i32
    %c0_i32_0 = arith.constant 0 : i32
    %c0_i32_1 = arith.constant 0 : i32
    return %c0_i32, %c0_i32_0 : i32, i32
  }
  func.func @transform_15(%arg0: i32) -> (i32, i32) {
    %c0_i32 = arith.constant 0 : i32
    %c0_i32_0 = arith.constant 0 : i32
    %c0_i32_1 = arith.constant 0 : i32
    return %c0_i32, %c0_i32_0 : i32, i32
  }
  func.func @transform_16(%arg0: i32) -> (i32, i32) {
    %c0_i32 = arith.constant 0 : i32
    %c0_i32_0 = arith.constant 0 : i32
    %c0_i32_1 = arith.constant 0 : i32
    return %c0_i32, %c0_i32_0 : i32, i32
  }
  func.func @transform_17(%arg0: i32) -> (i32, i32) {
    %c0_i32 = arith.constant 0 : i32
    %c0_i32_0 = arith.constant 0 : i32
    %c0_i32_1 = arith.constant 0 : i32
    return %c0_i32, %c0_i32_0 : i32, i32
  }
  func.func @transform_18(%arg0: i32) -> (i32, i32) {
    %c0_i32 = arith.constant 0 : i32
    %c0_i32_0 = arith.constant 0 : i32
    %c0_i32_1 = arith.constant 0 : i32
    return %c0_i32, %c0_i32_0 : i32, i32
  }
  func.func @transform_19(%arg0: i32) -> (i32, i32) {
    %c0_i32 = arith.constant 0 : i32
    %c0_i32_0 = arith.constant 0 : i32
    %c0_i32_1 = arith.constant 0 : i32
    return %c0_i32, %c0_i32_0 : i32, i32
  }
  func.func @transform_20(%arg0: i32) -> (i32, i32) {
    %c0_i32 = arith.constant 0 : i32
    %c0_i32_0 = arith.constant 0 : i32
    %c0_i32_1 = arith.constant 0 : i32
    return %c0_i32, %c0_i32_0 : i32, i32
  }
  func.func @transform_21(%arg0: i32) -> (i32, i32) {
    %c0_i32 = arith.constant 0 : i32
    %c0_i32_0 = arith.constant 0 : i32
    %c0_i32_1 = arith.constant 0 : i32
    return %c0_i32, %c0_i32_0 : i32, i32
  }
  func.func @transform_22(%arg0: i32) -> (i32, i32, i32) {
    %c0_i32 = arith.constant 0 : i32
    %c0_i32_0 = arith.constant 0 : i32
    %c0_i32_1 = arith.constant 0 : i32
    return %arg0, %c0_i32, %c0_i32_0 : i32, i32, i32
  }
}

module attributes {stable_mosaic.version = 11 : i64} {
  func.func @decoder_layer_kernel(%arg0: i32, %arg1: memref<1x8x32xf32, #tpu.memory_space<vmem>>, %arg2: memref<1x8x32xf32, #tpu.memory_space<vmem>>, %arg3: memref<1x1x8xf32, #tpu.memory_space<vmem>>, %arg4: memref<1x1x8xf32, #tpu.memory_space<vmem>>, %arg5: memref<4x32x8xf32, #tpu.memory_space<vmem>>, %arg6: memref<4x32x8xf32, #tpu.memory_space<vmem>>, %arg7: memref<4x32x8xf32, #tpu.memory_space<vmem>>, %arg8: memref<32x32xf32, #tpu.memory_space<vmem>>, %arg9: memref<4x32x8xf32, #tpu.memory_space<vmem>>, %arg10: memref<4x32x8xf32, #tpu.memory_space<vmem>>, %arg11: memref<4x32x8xf32, #tpu.memory_space<vmem>>, %arg12: memref<32x32xf32, #tpu.memory_space<vmem>>, %arg13: memref<1x32xf32, #tpu.memory_space<vmem>>, %arg14: memref<1x32xf32, #tpu.memory_space<vmem>>, %arg15: memref<1x32xf32, #tpu.memory_space<vmem>>, %arg16: memref<1x32xf32, #tpu.memory_space<vmem>>, %arg17: memref<1x32xf32, #tpu.memory_space<vmem>>, %arg18: memref<1x32xf32, #tpu.memory_space<vmem>>, %arg19: memref<32x64xf32, #tpu.memory_space<vmem>>, %arg20: memref<1x64xf32, #tpu.memory_space<vmem>>, %arg21: memref<64x32xf32, #tpu.memory_space<vmem>>, %arg22: memref<1x32xf32, #tpu.memory_space<vmem>>, %arg23: memref<1x8x32xf32, #tpu.memory_space<vmem>>) attributes {dimension_semantics = [#tpu.dimension_semantics<parallel>], iteration_bounds = array<i64: 2>, scalar_prefetch = 0 : i64, scratch_operands = 0 : i64, tpu.core_type = #tpu.core_type<tc>, window_params = [{transform_indices = @transform_0, window_bounds = array<i64: 1, 8, 32>}, {transform_indices = @transform_1, window_bounds = array<i64: 1, 8, 32>}, {transform_indices = @transform_2, window_bounds = array<i64: 1, 1, 8>}, {transform_indices = @transform_3, window_bounds = array<i64: 1, 1, 8>}, {pipeline_mode = #tpu.pipeline_mode<synchronous>, transform_indices = @transform_4, window_bounds = array<i64: 4, 32, 8>}, {pipeline_mode = #tpu.pipeline_mode<synchronous>, transform_indices = @transform_5, window_bounds = array<i64: 4, 32, 8>}, {pipeline_mode = #tpu.pipeline_mode<synchronous>, transform_indices = @transform_6, window_bounds = array<i64: 4, 32, 8>}, {pipeline_mode = #tpu.pipeline_mode<synchronous>, transform_indices = @transform_7, window_bounds = array<i64: 32, 32>}, {pipeline_mode = #tpu.pipeline_mode<synchronous>, transform_indices = @transform_8, window_bounds = array<i64: 4, 32, 8>}, {pipeline_mode = #tpu.pipeline_mode<synchronous>, transform_indices = @transform_9, window_bounds = array<i64: 4, 32, 8>}, {pipeline_mode = #tpu.pipeline_mode<synchronous>, transform_indices = @transform_10, window_bounds = array<i64: 4, 32, 8>}, {pipeline_mode = #tpu.pipeline_mode<synchronous>, transform_indices = @transform_11, window_bounds = array<i64: 32, 32>}, {pipeline_mode = #tpu.pipeline_mode<synchronous>, transform_indices = @transform_12, window_bounds = array<i64: 1, 32>}, {pipeline_mode = #tpu.pipeline_mode<synchronous>, transform_indices = @transform_13, window_bounds = array<i64: 1, 32>}, {pipeline_mode = #tpu.pipeline_mode<synchronous>, transform_indices = @transform_14, window_bounds = array<i64: 1, 32>}, {pipeline_mode = #tpu.pipeline_mode<synchronous>, transform_indices = @transform_15, window_bounds = array<i64: 1, 32>}, {pipeline_mode = #tpu.pipeline_mode<synchronous>, transform_indices = @transform_16, window_bounds = array<i64: 1, 32>}, {pipeline_mode = #tpu.pipeline_mode<synchronous>, transform_indices = @transform_17, window_bounds = array<i64: 1, 32>}, {pipeline_mode = #tpu.pipeline_mode<synchronous>, transform_indices = @transform_18, window_bounds = array<i64: 32, 64>}, {pipeline_mode = #tpu.pipeline_mode<synchronous>, transform_indices = @transform_19, window_bounds = array<i64: 1, 64>}, {pipeline_mode = #tpu.pipeline_mode<synchronous>, transform_indices = @transform_20, window_bounds = array<i64: 64, 32>}, {pipeline_mode = #tpu.pipeline_mode<synchronous>, transform_indices = @transform_21, window_bounds = array<i64: 1, 32>}, {transform_indices = @transform_22, window_bounds = array<i64: 1, 8, 32>}]} {
    %c0 = arith.constant 0 : index
    %c0_0 = arith.constant 0 : index
    %c0_1 = arith.constant 0 : index
    %0 = vector.load %arg1[%c0, %c0_0, %c0_1] : memref<1x8x32xf32, #tpu.memory_space<vmem>>, vector<1x8x32xf32>
    %1 = vector.shape_cast %0 : vector<1x8x32xf32> to vector<8x32xf32>
    %c0_2 = arith.constant 0 : index
    %c0_3 = arith.constant 0 : index
    %c0_4 = arith.constant 0 : index
    %2 = vector.load %arg2[%c0_2, %c0_3, %c0_4] : memref<1x8x32xf32, #tpu.memory_space<vmem>>, vector<1x8x32xf32>
    %3 = vector.shape_cast %2 : vector<1x8x32xf32> to vector<8x32xf32>
    %4 = tpu.iota {dimensions = array<i32: 0>} : vector<8x8xi32>
    %5 = tpu.iota {dimensions = array<i32: 1>} : vector<8x8xi32>
    %6 = arith.cmpi sgt, %5, %4 : vector<8x8xi32>
    %cst = arith.constant -1.000000e+09 : f32
    %cst_5 = arith.constant 0.000000e+00 : f32
    %7 = vector.broadcast %cst : f32 to vector<8x8xf32>
    %8 = vector.broadcast %cst_5 : f32 to vector<8x8xf32>
    %9 = arith.select %6, %7, %8 : vector<8x8xi1>, vector<8x8xf32>
    %c0_6 = arith.constant 0 : index
    %c0_7 = arith.constant 0 : index
    %c0_8 = arith.constant 0 : index
    %10 = vector.load %arg3[%c0_6, %c0_7, %c0_8] : memref<1x1x8xf32, #tpu.memory_space<vmem>>, vector<1x1x8xf32>
    %11 = vector.shape_cast %10 : vector<1x1x8xf32> to vector<1x8xf32>
    %cst_9 = arith.constant 5.000000e-01 : f32
    %12 = vector.broadcast %cst_9 : f32 to vector<1x8xf32>
    %13 = arith.cmpf ogt, %11, %12 : vector<1x8xf32>
    %cst_10 = arith.constant -1.000000e+09 : f32
    %cst_11 = arith.constant 0.000000e+00 : f32
    %14 = vector.broadcast %cst_10 : f32 to vector<1x8xf32>
    %15 = vector.broadcast %cst_11 : f32 to vector<1x8xf32>
    %16 = arith.select %13, %14, %15 : vector<1x8xi1>, vector<1x8xf32>
    %17 = vector.broadcast %16 : vector<1x8xf32> to vector<8x8xf32>
    %18 = arith.addf %9, %17 : vector<8x8xf32>
    %c0_12 = arith.constant 0 : index
    %c0_13 = arith.constant 0 : index
    %c0_14 = arith.constant 0 : index
    %19 = vector.load %arg4[%c0_12, %c0_13, %c0_14] : memref<1x1x8xf32, #tpu.memory_space<vmem>>, vector<1x1x8xf32>
    %20 = vector.shape_cast %19 : vector<1x1x8xf32> to vector<1x8xf32>
    %cst_15 = arith.constant 5.000000e-01 : f32
    %21 = vector.broadcast %cst_15 : f32 to vector<1x8xf32>
    %22 = arith.cmpf ogt, %20, %21 : vector<1x8xf32>
    %cst_16 = arith.constant -1.000000e+09 : f32
    %cst_17 = arith.constant 0.000000e+00 : f32
    %23 = vector.broadcast %cst_16 : f32 to vector<1x8xf32>
    %24 = vector.broadcast %cst_17 : f32 to vector<1x8xf32>
    %25 = arith.select %22, %23, %24 : vector<1x8xi1>, vector<1x8xf32>
    %c0_18 = arith.constant 0 : index
    %c0_19 = arith.constant 0 : index
    %c0_20 = arith.constant 0 : index
    %26 = vector.load %arg5[%c0_18, %c0_19, %c0_20] : memref<4x32x8xf32, #tpu.memory_space<vmem>>, vector<4x32x8xf32>
    %c0_21 = arith.constant 0 : index
    %c0_22 = arith.constant 0 : index
    %c0_23 = arith.constant 0 : index
    %27 = vector.load %arg6[%c0_21, %c0_22, %c0_23] : memref<4x32x8xf32, #tpu.memory_space<vmem>>, vector<4x32x8xf32>
    %c0_24 = arith.constant 0 : index
    %c0_25 = arith.constant 0 : index
    %c0_26 = arith.constant 0 : index
    %28 = vector.load %arg7[%c0_24, %c0_25, %c0_26] : memref<4x32x8xf32, #tpu.memory_space<vmem>>, vector<4x32x8xf32>
    %c0_27 = arith.constant 0 : index
    %c0_28 = arith.constant 0 : index
    %29 = vector.load %arg8[%c0_27, %c0_28] : memref<32x32xf32, #tpu.memory_space<vmem>>, vector<32x32xf32>
    %30 = vector.shape_cast %1 : vector<8x32xf32> to vector<1x8x32xf32>
    %31 = vector.shape_cast %30 : vector<1x8x32xf32> to vector<1x8x32xf32>
    %32 = vector.broadcast %31 : vector<1x8x32xf32> to vector<4x8x32xf32>
    "tpu.trace_start"() <{level = 10 : i32, message = "hsd,hde->hse"}> : () -> ()
    %cst_29 = arith.constant dense<0.000000e+00> : vector<4x8x8xf32>
    %33 = tpu.matmul %32, %26, %cst_29 {dimension_numbers = #tpu.dot_dimension_numbers<[2], [1], [1], [2], [0, 0, 0, 1, 1, 2], [0], [0]>} : vector<4x8x32xf32>, vector<4x32x8xf32>, vector<4x8x8xf32> -> vector<4x8x8xf32>
    "tpu.trace_stop"() : () -> ()
    %cst_30 = arith.constant 0.353553385 : f32
    %34 = vector.broadcast %cst_30 : f32 to vector<4x8x8xf32>
    %35 = arith.mulf %33, %34 : vector<4x8x8xf32>
    "tpu.trace_start"() <{level = 10 : i32, message = "hsd,hde->hse"}> : () -> ()
    %cst_31 = arith.constant dense<0.000000e+00> : vector<4x8x8xf32>
    %36 = tpu.matmul %32, %27, %cst_31 {dimension_numbers = #tpu.dot_dimension_numbers<[2], [1], [1], [2], [0, 0, 0, 1, 1, 2], [0], [0]>} : vector<4x8x32xf32>, vector<4x32x8xf32>, vector<4x8x8xf32> -> vector<4x8x8xf32>
    %cst_32 = arith.constant dense<0.000000e+00> : vector<4x8x8xf32>
    %37 = tpu.matmul %32, %28, %cst_32 {dimension_numbers = #tpu.dot_dimension_numbers<[2], [1], [1], [2], [0, 0, 0, 1, 1, 2], [0], [0]>} : vector<4x8x32xf32>, vector<4x32x8xf32>, vector<4x8x8xf32> -> vector<4x8x8xf32>
    "tpu.trace_stop"() : () -> ()
    "tpu.trace_start"() <{level = 10 : i32, message = "hqe,hke->hqk"}> : () -> ()
    %cst_33 = arith.constant dense<0.000000e+00> : vector<4x8x8xf32>
    %38 = tpu.matmul %35, %36, %cst_33 {dimension_numbers = #tpu.dot_dimension_numbers<[2], [2], [1], [1], [0, 0, 0, 1, 1, 1], [0], [0]>} : vector<4x8x8xf32>, vector<4x8x8xf32>, vector<4x8x8xf32> -> vector<4x8x8xf32>
    "tpu.trace_stop"() : () -> ()
    %39 = vector.shape_cast %18 : vector<8x8xf32> to vector<1x8x8xf32>
    %40 = vector.broadcast %39 : vector<1x8x8xf32> to vector<4x8x8xf32>
    %41 = arith.addf %38, %40 : vector<4x8x8xf32>
    %cst_34 = arith.constant dense<0xFF800000> : vector<4x8xf32>
    %42 = vector.multi_reduction <maximumf>, %41, %cst_34 [2] : vector<4x8x8xf32> to vector<4x8xf32>
    %43 = vector.shape_cast %42 : vector<4x8xf32> to vector<4x8x1xf32>
    %44 = vector.broadcast %43 : vector<4x8x1xf32> to vector<4x8x8xf32>
    %45 = arith.subf %41, %44 : vector<4x8x8xf32>
    %46 = math.exp %45 : vector<4x8x8xf32>
    %cst_35 = arith.constant dense<0.000000e+00> : vector<4x8xf32>
    %47 = vector.multi_reduction <add>, %46, %cst_35 [2] : vector<4x8x8xf32> to vector<4x8xf32>
    %48 = vector.shape_cast %47 : vector<4x8xf32> to vector<4x8x1xf32>
    %49 = tpu.reciprocal %48 {approx = true} : vector<4x8x1xf32> -> vector<4x8x1xf32>
    %50 = vector.broadcast %49 : vector<4x8x1xf32> to vector<4x8x8xf32>
    %51 = arith.mulf %46, %50 : vector<4x8x8xf32>
    "tpu.trace_start"() <{level = 10 : i32, message = "hqk,hke->hqe"}> : () -> ()
    %cst_36 = arith.constant dense<0.000000e+00> : vector<4x8x8xf32>
    %52 = tpu.matmul %51, %37, %cst_36 {dimension_numbers = #tpu.dot_dimension_numbers<[2], [1], [1], [2], [0, 0, 0, 1, 1, 2], [0], [0]>} : vector<4x8x8xf32>, vector<4x8x8xf32>, vector<4x8x8xf32> -> vector<4x8x8xf32>
    "tpu.trace_stop"() : () -> ()
    %53 = vector.extract_strided_slice %52 {offsets = [0, 0, 0], sizes = [1, 8, 8], strides = [1, 1, 1]} : vector<4x8x8xf32> to vector<1x8x8xf32>
    %54 = vector.shape_cast %53 : vector<1x8x8xf32> to vector<8x8xf32>
    %55 = vector.extract_strided_slice %52 {offsets = [1, 0, 0], sizes = [1, 8, 8], strides = [1, 1, 1]} : vector<4x8x8xf32> to vector<1x8x8xf32>
    %56 = vector.shape_cast %55 : vector<1x8x8xf32> to vector<8x8xf32>
    %57 = vector.extract_strided_slice %52 {offsets = [2, 0, 0], sizes = [1, 8, 8], strides = [1, 1, 1]} : vector<4x8x8xf32> to vector<1x8x8xf32>
    %58 = vector.shape_cast %57 : vector<1x8x8xf32> to vector<8x8xf32>
    %59 = vector.extract_strided_slice %52 {offsets = [3, 0, 0], sizes = [1, 8, 8], strides = [1, 1, 1]} : vector<4x8x8xf32> to vector<1x8x8xf32>
    %60 = vector.shape_cast %59 : vector<1x8x8xf32> to vector<8x8xf32>
    %61 = tpu.concatenate %54, %56, %58, %60 in 1 : vector<8x8xf32>, vector<8x8xf32>, vector<8x8xf32>, vector<8x8xf32> -> vector<8x32xf32>
    %cst_37 = arith.constant dense<0.000000e+00> : vector<8x32xf32>
    %62 = tpu.matmul %61, %29, %cst_37 {dimension_numbers = #tpu.dot_dimension_numbers<[1], [0], [0], [1], [0, 0, 1, 1], [], []>} : vector<8x32xf32>, vector<32x32xf32>, vector<8x32xf32> -> vector<8x32xf32>
    %63 = arith.addf %1, %62 : vector<8x32xf32>
    %c0_38 = arith.constant 0 : index
    %c0_39 = arith.constant 0 : index
    %64 = vector.load %arg13[%c0_38, %c0_39] : memref<1x32xf32, #tpu.memory_space<vmem>>, vector<1x32xf32>
    %c0_40 = arith.constant 0 : index
    %c0_41 = arith.constant 0 : index
    %65 = vector.load %arg14[%c0_40, %c0_41] : memref<1x32xf32, #tpu.memory_space<vmem>>, vector<1x32xf32>
    %cst_42 = arith.constant dense<0.000000e+00> : vector<8xf32>
    %66 = vector.multi_reduction <add>, %63, %cst_42 [1] : vector<8x32xf32> to vector<8xf32>
    %67 = vector.shape_cast %66 : vector<8xf32> to vector<8x1xf32>
    %cst_43 = arith.constant 3.200000e+01 : f32
    %68 = vector.broadcast %cst_43 : f32 to vector<8x1xf32>
    %69 = arith.divf %67, %68 : vector<8x1xf32>
    %70 = vector.broadcast %69 : vector<8x1xf32> to vector<8x32xf32>
    %71 = arith.subf %63, %70 : vector<8x32xf32>
    %72 = arith.mulf %71, %71 : vector<8x32xf32>
    %cst_44 = arith.constant dense<0.000000e+00> : vector<8xf32>
    %73 = vector.multi_reduction <add>, %72, %cst_44 [1] : vector<8x32xf32> to vector<8xf32>
    %74 = vector.shape_cast %73 : vector<8xf32> to vector<8x1xf32>
    %cst_45 = arith.constant 3.200000e+01 : f32
    %75 = vector.broadcast %cst_45 : f32 to vector<8x1xf32>
    %76 = arith.divf %74, %75 : vector<8x1xf32>
    %77 = vector.broadcast %69 : vector<8x1xf32> to vector<8x32xf32>
    %78 = arith.subf %63, %77 : vector<8x32xf32>
    %cst_46 = arith.constant 9.99999974E-6 : f32
    %79 = vector.broadcast %cst_46 : f32 to vector<8x1xf32>
    %80 = arith.addf %76, %79 : vector<8x1xf32>
    %81 = math.rsqrt %80 : vector<8x1xf32>
    %82 = vector.broadcast %81 : vector<8x1xf32> to vector<8x32xf32>
    %83 = arith.mulf %78, %82 : vector<8x32xf32>
    %84 = vector.broadcast %64 : vector<1x32xf32> to vector<8x32xf32>
    %85 = arith.mulf %83, %84 : vector<8x32xf32>
    %86 = vector.broadcast %65 : vector<1x32xf32> to vector<8x32xf32>
    %87 = arith.addf %85, %86 : vector<8x32xf32>
    %c0_47 = arith.constant 0 : index
    %c0_48 = arith.constant 0 : index
    %c0_49 = arith.constant 0 : index
    %88 = vector.load %arg9[%c0_47, %c0_48, %c0_49] : memref<4x32x8xf32, #tpu.memory_space<vmem>>, vector<4x32x8xf32>
    %c0_50 = arith.constant 0 : index
    %c0_51 = arith.constant 0 : index
    %c0_52 = arith.constant 0 : index
    %89 = vector.load %arg10[%c0_50, %c0_51, %c0_52] : memref<4x32x8xf32, #tpu.memory_space<vmem>>, vector<4x32x8xf32>
    %c0_53 = arith.constant 0 : index
    %c0_54 = arith.constant 0 : index
    %c0_55 = arith.constant 0 : index
    %90 = vector.load %arg11[%c0_53, %c0_54, %c0_55] : memref<4x32x8xf32, #tpu.memory_space<vmem>>, vector<4x32x8xf32>
    %c0_56 = arith.constant 0 : index
    %c0_57 = arith.constant 0 : index
    %91 = vector.load %arg12[%c0_56, %c0_57] : memref<32x32xf32, #tpu.memory_space<vmem>>, vector<32x32xf32>
    %92 = vector.shape_cast %87 : vector<8x32xf32> to vector<1x8x32xf32>
    %93 = vector.shape_cast %92 : vector<1x8x32xf32> to vector<1x8x32xf32>
    %94 = vector.broadcast %93 : vector<1x8x32xf32> to vector<4x8x32xf32>
    %95 = vector.shape_cast %3 : vector<8x32xf32> to vector<1x8x32xf32>
    %96 = vector.shape_cast %95 : vector<1x8x32xf32> to vector<1x8x32xf32>
    %97 = vector.broadcast %96 : vector<1x8x32xf32> to vector<4x8x32xf32>
    "tpu.trace_start"() <{level = 10 : i32, message = "hsd,hde->hse"}> : () -> ()
    %cst_58 = arith.constant dense<0.000000e+00> : vector<4x8x8xf32>
    %98 = tpu.matmul %94, %88, %cst_58 {dimension_numbers = #tpu.dot_dimension_numbers<[2], [1], [1], [2], [0, 0, 0, 1, 1, 2], [0], [0]>} : vector<4x8x32xf32>, vector<4x32x8xf32>, vector<4x8x8xf32> -> vector<4x8x8xf32>
    "tpu.trace_stop"() : () -> ()
    %cst_59 = arith.constant 0.353553385 : f32
    %99 = vector.broadcast %cst_59 : f32 to vector<4x8x8xf32>
    %100 = arith.mulf %98, %99 : vector<4x8x8xf32>
    "tpu.trace_start"() <{level = 10 : i32, message = "hsd,hde->hse"}> : () -> ()
    %cst_60 = arith.constant dense<0.000000e+00> : vector<4x8x8xf32>
    %101 = tpu.matmul %97, %89, %cst_60 {dimension_numbers = #tpu.dot_dimension_numbers<[2], [1], [1], [2], [0, 0, 0, 1, 1, 2], [0], [0]>} : vector<4x8x32xf32>, vector<4x32x8xf32>, vector<4x8x8xf32> -> vector<4x8x8xf32>
    %cst_61 = arith.constant dense<0.000000e+00> : vector<4x8x8xf32>
    %102 = tpu.matmul %97, %90, %cst_61 {dimension_numbers = #tpu.dot_dimension_numbers<[2], [1], [1], [2], [0, 0, 0, 1, 1, 2], [0], [0]>} : vector<4x8x32xf32>, vector<4x32x8xf32>, vector<4x8x8xf32> -> vector<4x8x8xf32>
    "tpu.trace_stop"() : () -> ()
    "tpu.trace_start"() <{level = 10 : i32, message = "hqe,hke->hqk"}> : () -> ()
    %cst_62 = arith.constant dense<0.000000e+00> : vector<4x8x8xf32>
    %103 = tpu.matmul %100, %101, %cst_62 {dimension_numbers = #tpu.dot_dimension_numbers<[2], [2], [1], [1], [0, 0, 0, 1, 1, 1], [0], [0]>} : vector<4x8x8xf32>, vector<4x8x8xf32>, vector<4x8x8xf32> -> vector<4x8x8xf32>
    "tpu.trace_stop"() : () -> ()
    %104 = vector.shape_cast %25 : vector<1x8xf32> to vector<1x1x8xf32>
    %105 = vector.broadcast %104 : vector<1x1x8xf32> to vector<4x8x8xf32>
    %106 = arith.addf %103, %105 : vector<4x8x8xf32>
    %cst_63 = arith.constant dense<0xFF800000> : vector<4x8xf32>
    %107 = vector.multi_reduction <maximumf>, %106, %cst_63 [2] : vector<4x8x8xf32> to vector<4x8xf32>
    %108 = vector.shape_cast %107 : vector<4x8xf32> to vector<4x8x1xf32>
    %109 = vector.broadcast %108 : vector<4x8x1xf32> to vector<4x8x8xf32>
    %110 = arith.subf %106, %109 : vector<4x8x8xf32>
    %111 = math.exp %110 : vector<4x8x8xf32>
    %cst_64 = arith.constant dense<0.000000e+00> : vector<4x8xf32>
    %112 = vector.multi_reduction <add>, %111, %cst_64 [2] : vector<4x8x8xf32> to vector<4x8xf32>
    %113 = vector.shape_cast %112 : vector<4x8xf32> to vector<4x8x1xf32>
    %114 = tpu.reciprocal %113 {approx = true} : vector<4x8x1xf32> -> vector<4x8x1xf32>
    %115 = vector.broadcast %114 : vector<4x8x1xf32> to vector<4x8x8xf32>
    %116 = arith.mulf %111, %115 : vector<4x8x8xf32>
    "tpu.trace_start"() <{level = 10 : i32, message = "hqk,hke->hqe"}> : () -> ()
    %cst_65 = arith.constant dense<0.000000e+00> : vector<4x8x8xf32>
    %117 = tpu.matmul %116, %102, %cst_65 {dimension_numbers = #tpu.dot_dimension_numbers<[2], [1], [1], [2], [0, 0, 0, 1, 1, 2], [0], [0]>} : vector<4x8x8xf32>, vector<4x8x8xf32>, vector<4x8x8xf32> -> vector<4x8x8xf32>
    "tpu.trace_stop"() : () -> ()
    %118 = vector.extract_strided_slice %117 {offsets = [0, 0, 0], sizes = [1, 8, 8], strides = [1, 1, 1]} : vector<4x8x8xf32> to vector<1x8x8xf32>
    %119 = vector.shape_cast %118 : vector<1x8x8xf32> to vector<8x8xf32>
    %120 = vector.extract_strided_slice %117 {offsets = [1, 0, 0], sizes = [1, 8, 8], strides = [1, 1, 1]} : vector<4x8x8xf32> to vector<1x8x8xf32>
    %121 = vector.shape_cast %120 : vector<1x8x8xf32> to vector<8x8xf32>
    %122 = vector.extract_strided_slice %117 {offsets = [2, 0, 0], sizes = [1, 8, 8], strides = [1, 1, 1]} : vector<4x8x8xf32> to vector<1x8x8xf32>
    %123 = vector.shape_cast %122 : vector<1x8x8xf32> to vector<8x8xf32>
    %124 = vector.extract_strided_slice %117 {offsets = [3, 0, 0], sizes = [1, 8, 8], strides = [1, 1, 1]} : vector<4x8x8xf32> to vector<1x8x8xf32>
    %125 = vector.shape_cast %124 : vector<1x8x8xf32> to vector<8x8xf32>
    %126 = tpu.concatenate %119, %121, %123, %125 in 1 : vector<8x8xf32>, vector<8x8xf32>, vector<8x8xf32>, vector<8x8xf32> -> vector<8x32xf32>
    %cst_66 = arith.constant dense<0.000000e+00> : vector<8x32xf32>
    %127 = tpu.matmul %126, %91, %cst_66 {dimension_numbers = #tpu.dot_dimension_numbers<[1], [0], [0], [1], [0, 0, 1, 1], [], []>} : vector<8x32xf32>, vector<32x32xf32>, vector<8x32xf32> -> vector<8x32xf32>
    %128 = arith.addf %87, %127 : vector<8x32xf32>
    %c0_67 = arith.constant 0 : index
    %c0_68 = arith.constant 0 : index
    %129 = vector.load %arg15[%c0_67, %c0_68] : memref<1x32xf32, #tpu.memory_space<vmem>>, vector<1x32xf32>
    %c0_69 = arith.constant 0 : index
    %c0_70 = arith.constant 0 : index
    %130 = vector.load %arg16[%c0_69, %c0_70] : memref<1x32xf32, #tpu.memory_space<vmem>>, vector<1x32xf32>
    %cst_71 = arith.constant dense<0.000000e+00> : vector<8xf32>
    %131 = vector.multi_reduction <add>, %128, %cst_71 [1] : vector<8x32xf32> to vector<8xf32>
    %132 = vector.shape_cast %131 : vector<8xf32> to vector<8x1xf32>
    %cst_72 = arith.constant 3.200000e+01 : f32
    %133 = vector.broadcast %cst_72 : f32 to vector<8x1xf32>
    %134 = arith.divf %132, %133 : vector<8x1xf32>
    %135 = vector.broadcast %134 : vector<8x1xf32> to vector<8x32xf32>
    %136 = arith.subf %128, %135 : vector<8x32xf32>
    %137 = arith.mulf %136, %136 : vector<8x32xf32>
    %cst_73 = arith.constant dense<0.000000e+00> : vector<8xf32>
    %138 = vector.multi_reduction <add>, %137, %cst_73 [1] : vector<8x32xf32> to vector<8xf32>
    %139 = vector.shape_cast %138 : vector<8xf32> to vector<8x1xf32>
    %cst_74 = arith.constant 3.200000e+01 : f32
    %140 = vector.broadcast %cst_74 : f32 to vector<8x1xf32>
    %141 = arith.divf %139, %140 : vector<8x1xf32>
    %142 = vector.broadcast %134 : vector<8x1xf32> to vector<8x32xf32>
    %143 = arith.subf %128, %142 : vector<8x32xf32>
    %cst_75 = arith.constant 9.99999974E-6 : f32
    %144 = vector.broadcast %cst_75 : f32 to vector<8x1xf32>
    %145 = arith.addf %141, %144 : vector<8x1xf32>
    %146 = math.rsqrt %145 : vector<8x1xf32>
    %147 = vector.broadcast %146 : vector<8x1xf32> to vector<8x32xf32>
    %148 = arith.mulf %143, %147 : vector<8x32xf32>
    %149 = vector.broadcast %129 : vector<1x32xf32> to vector<8x32xf32>
    %150 = arith.mulf %148, %149 : vector<8x32xf32>
    %151 = vector.broadcast %130 : vector<1x32xf32> to vector<8x32xf32>
    %152 = arith.addf %150, %151 : vector<8x32xf32>
    %c0_76 = arith.constant 0 : index
    %c0_77 = arith.constant 0 : index
    %153 = vector.load %arg19[%c0_76, %c0_77] : memref<32x64xf32, #tpu.memory_space<vmem>>, vector<32x64xf32>
    %cst_78 = arith.constant dense<0.000000e+00> : vector<8x64xf32>
    %154 = tpu.matmul %152, %153, %cst_78 {dimension_numbers = #tpu.dot_dimension_numbers<[1], [0], [0], [1], [0, 0, 1, 1], [], []>} : vector<8x32xf32>, vector<32x64xf32>, vector<8x64xf32> -> vector<8x64xf32>
    %c0_79 = arith.constant 0 : index
    %c0_80 = arith.constant 0 : index
    %155 = vector.load %arg20[%c0_79, %c0_80] : memref<1x64xf32, #tpu.memory_space<vmem>>, vector<1x64xf32>
    %156 = vector.broadcast %155 : vector<1x64xf32> to vector<8x64xf32>
    %157 = arith.addf %154, %156 : vector<8x64xf32>
    %cst_81 = arith.constant 0.000000e+00 : f32
    %158 = vector.broadcast %cst_81 : f32 to vector<8x64xf32>
    %159 = arith.maximumf %157, %158 : vector<8x64xf32>
    %c0_82 = arith.constant 0 : index
    %c0_83 = arith.constant 0 : index
    %160 = vector.load %arg21[%c0_82, %c0_83] : memref<64x32xf32, #tpu.memory_space<vmem>>, vector<64x32xf32>
    %cst_84 = arith.constant dense<0.000000e+00> : vector<8x32xf32>
    %161 = tpu.matmul %159, %160, %cst_84 {dimension_numbers = #tpu.dot_dimension_numbers<[1], [0], [0], [1], [0, 0, 1, 1], [], []>} : vector<8x64xf32>, vector<64x32xf32>, vector<8x32xf32> -> vector<8x32xf32>
    %c0_85 = arith.constant 0 : index
    %c0_86 = arith.constant 0 : index
    %162 = vector.load %arg22[%c0_85, %c0_86] : memref<1x32xf32, #tpu.memory_space<vmem>>, vector<1x32xf32>
    %163 = vector.broadcast %162 : vector<1x32xf32> to vector<8x32xf32>
    %164 = arith.addf %161, %163 : vector<8x32xf32>
    %165 = arith.addf %152, %164 : vector<8x32xf32>
    %c0_87 = arith.constant 0 : index
    %c0_88 = arith.constant 0 : index
    %166 = vector.load %arg17[%c0_87, %c0_88] : memref<1x32xf32, #tpu.memory_space<vmem>>, vector<1x32xf32>
    %c0_89 = arith.constant 0 : index
    %c0_90 = arith.constant 0 : index
    %167 = vector.load %arg18[%c0_89, %c0_90] : memref<1x32xf32, #tpu.memory_space<vmem>>, vector<1x32xf32>
    %cst_91 = arith.constant dense<0.000000e+00> : vector<8xf32>
    %168 = vector.multi_reduction <add>, %165, %cst_91 [1] : vector<8x32xf32> to vector<8xf32>
    %169 = vector.shape_cast %168 : vector<8xf32> to vector<8x1xf32>
    %cst_92 = arith.constant 3.200000e+01 : f32
    %170 = vector.broadcast %cst_92 : f32 to vector<8x1xf32>
    %171 = arith.divf %169, %170 : vector<8x1xf32>
    %172 = vector.broadcast %171 : vector<8x1xf32> to vector<8x32xf32>
    %173 = arith.subf %165, %172 : vector<8x32xf32>
    %174 = arith.mulf %173, %173 : vector<8x32xf32>
    %cst_93 = arith.constant dense<0.000000e+00> : vector<8xf32>
    %175 = vector.multi_reduction <add>, %174, %cst_93 [1] : vector<8x32xf32> to vector<8xf32>
    %176 = vector.shape_cast %175 : vector<8xf32> to vector<8x1xf32>
    %cst_94 = arith.constant 3.200000e+01 : f32
    %177 = vector.broadcast %cst_94 : f32 to vector<8x1xf32>
    %178 = arith.divf %176, %177 : vector<8x1xf32>
    %179 = vector.broadcast %171 : vector<8x1xf32> to vector<8x32xf32>
    %180 = arith.subf %165, %179 : vector<8x32xf32>
    %cst_95 = arith.constant 9.99999974E-6 : f32
    %181 = vector.broadcast %cst_95 : f32 to vector<8x1xf32>
    %182 = arith.addf %178, %181 : vector<8x1xf32>
    %183 = math.rsqrt %182 : vector<8x1xf32>
    %184 = vector.broadcast %183 : vector<8x1xf32> to vector<8x32xf32>
    %185 = arith.mulf %180, %184 : vector<8x32xf32>
    %186 = vector.broadcast %166 : vector<1x32xf32> to vector<8x32xf32>
    %187 = arith.mulf %185, %186 : vector<8x32xf32>
    %188 = vector.broadcast %167 : vector<1x32xf32> to vector<8x32xf32>
    %189 = arith.addf %187, %188 : vector<8x32xf32>
    %c0_96 = arith.constant 0 : index
    %c0_97 = arith.constant 0 : index
    %c0_98 = arith.constant 0 : index
    %190 = vector.load %arg23[%c0_96, %c0_97, %c0_98] : memref<1x8x32xf32, #tpu.memory_space<vmem>>, vector<1x8x32xf32>
    %191 = vector.shape_cast %190 : vector<1x8x32xf32> to vector<8x32xf32>
    %192 = vector.shape_cast %189 : vector<8x32xf32> to vector<1x8x32xf32>
    tpu.vector_store %arg23[%c0_96, %c0_97, %c0_98], %192 {strides = array<i32>} : memref<1x8x32xf32, #tpu.memory_space<vmem>>, vector<1x8x32xf32>,
    return
  }
  func.func @transform_0(%arg0: i32) -> (i32, i32, i32) {
    %c0_i32 = arith.constant 0 : i32
    %c0_i32_0 = arith.constant 0 : i32
    %c0_i32_1 = arith.constant 0 : i32
    return %arg0, %c0_i32, %c0_i32_0 : i32, i32, i32
  }
  func.func @transform_1(%arg0: i32) -> (i32, i32, i32) {
    %c0_i32 = arith.constant 0 : i32
    %c0_i32_0 = arith.constant 0 : i32
    %c0_i32_1 = arith.constant 0 : i32
    return %arg0, %c0_i32, %c0_i32_0 : i32, i32, i32
  }
  func.func @transform_2(%arg0: i32) -> (i32, i32, i32) {
    %c0_i32 = arith.constant 0 : i32
    %c0_i32_0 = arith.constant 0 : i32
    %c0_i32_1 = arith.constant 0 : i32
    return %arg0, %c0_i32, %c0_i32_0 : i32, i32, i32
  }
  func.func @transform_3(%arg0: i32) -> (i32, i32, i32) {
    %c0_i32 = arith.constant 0 : i32
    %c0_i32_0 = arith.constant 0 : i32
    %c0_i32_1 = arith.constant 0 : i32
    return %arg0, %c0_i32, %c0_i32_0 : i32, i32, i32
  }
  func.func @transform_4(%arg0: i32) -> (i32, i32, i32) {
    %c0_i32 = arith.constant 0 : i32
    %c0_i32_0 = arith.constant 0 : i32
    %c0_i32_1 = arith.constant 0 : i32
    %c0_i32_2 = arith.constant 0 : i32
    return %c0_i32, %c0_i32_0, %c0_i32_1 : i32, i32, i32
  }
  func.func @transform_5(%arg0: i32) -> (i32, i32, i32) {
    %c0_i32 = arith.constant 0 : i32
    %c0_i32_0 = arith.constant 0 : i32
    %c0_i32_1 = arith.constant 0 : i32
    %c0_i32_2 = arith.constant 0 : i32
    return %c0_i32, %c0_i32_0, %c0_i32_1 : i32, i32, i32
  }
  func.func @transform_6(%arg0: i32) -> (i32, i32, i32) {
    %c0_i32 = arith.constant 0 : i32
    %c0_i32_0 = arith.constant 0 : i32
    %c0_i32_1 = arith.constant 0 : i32
    %c0_i32_2 = arith.constant 0 : i32
    return %c0_i32, %c0_i32_0, %c0_i32_1 : i32, i32, i32
  }
  func.func @transform_7(%arg0: i32) -> (i32, i32) {
    %c0_i32 = arith.constant 0 : i32
    %c0_i32_0 = arith.constant 0 : i32
    %c0_i32_1 = arith.constant 0 : i32
    return %c0_i32, %c0_i32_0 : i32, i32
  }
  func.func @transform_8(%arg0: i32) -> (i32, i32, i32) {
    %c0_i32 = arith.constant 0 : i32
    %c0_i32_0 = arith.constant 0 : i32
    %c0_i32_1 = arith.constant 0 : i32
    %c0_i32_2 = arith.constant 0 : i32
    return %c0_i32, %c0_i32_0, %c0_i32_1 : i32, i32, i32
  }
  func.func @transform_9(%arg0: i32) -> (i32, i32, i32) {
    %c0_i32 = arith.constant 0 : i32
    %c0_i32_0 = arith.constant 0 : i32
    %c0_i32_1 = arith.constant 0 : i32
    %c0_i32_2 = arith.constant 0 : i32
    return %c0_i32, %c0_i32_0, %c0_i32_1 : i32, i32, i32
  }
  func.func @transform_10(%arg0: i32) -> (i32, i32, i32) {
    %c0_i32 = arith.constant 0 : i32
    %c0_i32_0 = arith.constant 0 : i32
    %c0_i32_1 = arith.constant 0 : i32
    %c0_i32_2 = arith.constant 0 : i32
    return %c0_i32, %c0_i32_0, %c0_i32_1 : i32, i32, i32
  }
  func.func @transform_11(%arg0: i32) -> (i32, i32) {
    %c0_i32 = arith.constant 0 : i32
    %c0_i32_0 = arith.constant 0 : i32
    %c0_i32_1 = arith.constant 0 : i32
    return %c0_i32, %c0_i32_0 : i32, i32
  }
  func.func @transform_12(%arg0: i32) -> (i32, i32) {
    %c0_i32 = arith.constant 0 : i32
    %c0_i32_0 = arith.constant 0 : i32
    %c0_i32_1 = arith.constant 0 : i32
    return %c0_i32, %c0_i32_0 : i32, i32
  }
  func.func @transform_13(%arg0: i32) -> (i32, i32) {
    %c0_i32 = arith.constant 0 : i32
    %c0_i32_0 = arith.constant 0 : i32
    %c0_i32_1 = arith.constant 0 : i32
    return %c0_i32, %c0_i32_0 : i32, i32
  }
  func.func @transform_14(%arg0: i32) -> (i32, i32) {
    %c0_i32 = arith.constant 0 : i32
    %c0_i32_0 = arith.constant 0 : i32
    %c0_i32_1 = arith.constant 0 : i32
    return %c0_i32, %c0_i32_0 : i32, i32
  }
  func.func @transform_15(%arg0: i32) -> (i32, i32) {
    %c0_i32 = arith.constant 0 : i32
    %c0_i32_0 = arith.constant 0 : i32
    %c0_i32_1 = arith.constant 0 : i32
    return %c0_i32, %c0_i32_0 : i32, i32
  }
  func.func @transform_16(%arg0: i32) -> (i32, i32) {
    %c0_i32 = arith.constant 0 : i32
    %c0_i32_0 = arith.constant 0 : i32
    %c0_i32_1 = arith.constant 0 : i32
    return %c0_i32, %c0_i32_0 : i32, i32
  }
  func.func @transform_17(%arg0: i32) -> (i32, i32) {
    %c0_i32 = arith.constant 0 : i32
    %c0_i32_0 = arith.constant 0 : i32
    %c0_i32_1 = arith.constant 0 : i32
    return %c0_i32, %c0_i32_0 : i32, i32
  }
  func.func @transform_18(%arg0: i32) -> (i32, i32) {
    %c0_i32 = arith.constant 0 : i32
    %c0_i32_0 = arith.constant 0 : i32
    %c0_i32_1 = arith.constant 0 : i32
    return %c0_i32, %c0_i32_0 : i32, i32
  }
  func.func @transform_19(%arg0: i32) -> (i32, i32) {
    %c0_i32 = arith.constant 0 : i32
    %c0_i32_0 = arith.constant 0 : i32
    %c0_i32_1 = arith.constant 0 : i32
    return %c0_i32, %c0_i32_0 : i32, i32
  }
  func.func @transform_20(%arg0: i32) -> (i32, i32) {
    %c0_i32 = arith.constant 0 : i32
    %c0_i32_0 = arith.constant 0 : i32
    %c0_i32_1 = arith.constant 0 : i32
    return %c0_i32, %c0_i32_0 : i32, i32
  }
  func.func @transform_21(%arg0: i32) -> (i32, i32) {
    %c0_i32 = arith.constant 0 : i32
    %c0_i32_0 = arith.constant 0 : i32
    %c0_i32_1 = arith.constant 0 : i32
    return %c0_i32, %c0_i32_0 : i32, i32
  }
  func.func @transform_22(%arg0: i32) -> (i32, i32, i32) {
    %c0_i32 = arith.constant 0 : i32
    %c0_i32_0 = arith.constant 0 : i32
    %c0_i32_1 = arith.constant 0 : i32
    return %arg0, %c0_i32, %c0_i32_0 : i32, i32, i32
  }
}

</mosaic_0001>

<bundles_post_ra>
// kernel: tpu_custom_call.1
= control target key start
LH: loop header
LB: loop body
LE: loop exit
PB: predicated region body
PF: predicated region fallthrough
CT: control target
= control target key end

     0   :  { %s7995_s0 = inlined_call_operand.hbm [shape: f32[2,8,32], index: 0, kind: input, shape index: {}]   ;;  %s7996_s1 = inlined_call_operand.hbm [shape: f32[2,8,32], index: 1, kind: input, shape index: {}]   ;;  %s7997_s2 = inlined_call_operand.hbm [shape: f32[2,1,8], index: 2, kind: input, shape index: {}]   ;;  %s7998_s3 = inlined_call_operand.hbm [shape: f32[2,1,8], index: 3, kind: input, shape index: {}]   ;;  %s7999_s4 = inlined_call_operand.hbm [shape: f32[4,32,8], index: 4, kind: input, shape index: {}]   ;;  %s8000_s5 = inlined_call_operand.hbm [shape: f32[4,32,8], index: 5, kind: input, shape index: {}]   ;;  %s8001_s6 = inlined_call_operand.hbm [shape: f32[4,32,8], index: 6, kind: input, shape index: {}]   ;;  %s8002_s7 = inlined_call_operand.hbm [shape: f32[32,32], index: 7, kind: input, shape index: {}]   ;;  %s8003_s8 = inlined_call_operand.hbm [shape: f32[4,32,8], index: 8, kind: input, shape index: {}]   ;;  %s8004_s9 = inlined_call_operand.hbm [shape: f32[4,32,8], index: 9, kind: input, shape index: {}]   ;;  %s8005_s10 = inlined_call_operand.hbm [shape: f32[4,32,8], index: 10, kind: input, shape index: {}]   ;;  %s8006_s11 = inlined_call_operand.hbm [shape: f32[32,32], index: 11, kind: input, shape index: {}]   ;;  %s8007_s12 = inlined_call_operand.hbm [shape: f32[1,32], index: 12, kind: input, shape index: {}]   ;;  %s8008_s13 = inlined_call_operand.hbm [shape: f32[1,32], index: 13, kind: input, shape index: {}]   ;;  %s8009_s14 = inlined_call_operand.hbm [shape: f32[1,32], index: 14, kind: input, shape index: {}]   ;;  %s8010_s15 = inlined_call_operand.hbm [shape: f32[1,32], index: 15, kind: input, shape index: {}]   ;;  %s8011_s16 = inlined_call_operand.hbm [shape: f32[1,32], index: 16, kind: input, shape index: {}]   ;;  %s8012_s17 = inlined_call_operand.hbm [shape: f32[1,32], index: 17, kind: input, shape index: {}]   ;;  %s8013_s18 = inlined_call_operand.hbm [shape: f32[32,64], index: 18, kind: input, shape index: {}]   ;;  %s8014_s19 = inlined_call_operand.hbm [shape: f32[1,64], index: 19, kind: input, shape index: {}]   ;;  %s8015_s20 = inlined_call_operand.hbm [shape: f32[64,32], index: 20, kind: input, shape index: {}]   ;;  %s8016_s21 = inlined_call_operand.hbm [shape: f32[1,32], index: 21, kind: input, shape index: {}]   ;;  %s8017_s22 = inlined_call_operand.hbm [shape: f32[2,8,32], index: 22, kind: output, shape index: {}]  }
   0x1   :  { %8066 = sst [smem:[#allocation57_spill]] %s7995_s0 }
   0x2   :  { %8067 = sst [smem:[#allocation58_spill]] %s7996_s1 }
   0x3   :  { %8068 = sst [smem:[#allocation59_spill]] %s7997_s2 }
   0x4   :  { %8069 = sst [smem:[#allocation60_spill]] %s7998_s3 }
   0x5   :  { %8070 = sst [smem:[#allocation61_spill]] %s7999_s4 }
   0x6   :  { %8071 = sst [smem:[#allocation62_spill]] %s8000_s5 }
   0x7   :  { %8072 = sst [smem:[#allocation63_spill]] %s8001_s6 }
   0x8   :  { %8073 = sst [smem:[#allocation64_spill]] %s8002_s7 }
   0x9   :  { %8074 = sst [smem:[#allocation65_spill]] %s8003_s8 }
   0xa   :  { %8075 = sst [smem:[#allocation66_spill]] %s8004_s9 }
   0xb   :  { %8076 = sst [smem:[#allocation67_spill]] %s8005_s10 }
   0xc   :  { %8077 = sst [smem:[#allocation68_spill]] %s8006_s11 }
   0xd   :  { %8078 = sst [smem:[#allocation69_spill]] %s8007_s12 }
   0xe   :  { %8079 = sst [smem:[#allocation70_spill]] %s8008_s13 }
   0xf   :  { %8080 = sst [smem:[#allocation71_spill]] %s8009_s14 }
  0x10   :  { %8081 = sst [smem:[#allocation72_spill]] %s8010_s15 }
  0x11   :  { %8082 = sst [smem:[#allocation73_spill]] %s8011_s16 }
  0x12   :  { %8083 = sst [smem:[#allocation74_spill]] %s8012_s17 }
  0x13   :  { %8084 = sst [smem:[#allocation75_spill]] %s8013_s18 }
  0x14   :  { %8085 = sst [smem:[#allocation76_spill]] %s8014_s19 }
  0x15   :  { %8086 = sst [smem:[#allocation77_spill]] %s8015_s20 }
  0x16   :  { %8087 = sst [smem:[#allocation78_spill]] %s8016_s21 }
  0x17   :  { %8088 = sst [smem:[#allocation79_spill]] %s8017_s22 }
  0x18   :  { %27 = vsyncpa [#allocation3], 0 }
  0x19   :  { %29 = vsyncpa [#allocation3 + $0x1], 0 }
  0x1a   :  { %30 = vsyncpa [#allocation6], 0 }
  0x1b   :  { %32 = vsyncpa [#allocation6 + $0x1], 0 }
  0x1c   :  { %33 = vsyncpa [#allocation9], 0 }
  0x1d   :  { %35 = vsyncpa [#allocation9 + $0x1], 0 }
  0x1e   :  { %36 = vsyncpa [#allocation12], 0 }
  0x1f   :  { %37 = vsyncpa [#allocation15], 0 }
  0x20   :  { %38 = vsyncpa [#allocation18], 0 }
  0x21   :  { %39 = vsyncpa [#allocation21], 0 }
  0x22   :  { %40 = vsyncpa [#allocation24], 0 }
  0x23   :  { %41 = vsyncpa [#allocation27], 0 }
  0x24   :  { %42 = vsyncpa [#allocation30], 0 }
  0x25   :  { %43 = vsyncpa [#allocation33], 0 }
  0x26   :  { %44 = vsyncpa [#allocation36], 0 }
  0x27   :  { %45 = vsyncpa [#allocation4], 0 }
  0x28   :  { %47 = vsyncpa [#allocation4 + $0x1], 0  ;;  %s6948_s3 = smov 0   ;;  %s6950_s28 = smov 0  }
  0x29   :  { %s6952_s29 = smov 0   ;;  %s6954_s30 = smov 0  }
  0x2a LB: > { %8089 = sst [smem:[#allocation52_spill]] %s6796_s29  ;;  %s6802_s4 = smov [#allocation10]   ;;  %s6800_s30 = sphi %s6954_s30, %s8166_s30   ;;  %s6796_s29 = sphi %s6952_s29, %s8168_s29   ;;  %s6792_s28 = sphi %s6950_s28, %s8170_s28   ;;  %s6788_s3 = sphi %s6948_s3, %s8169_s3  }
  0x2b   : > { %s578_s0 = sshll.u32 %s6802_s4, 4  ;;  %s6969_s23 = sadd.s32 4294967295, %s6800_s30   ;;  %s6974_s0 = int_to_ptr.vmem [resolvable:$true] %s578_s0 }
  0x2c   : > { %p4916_p0 = scmp.ge.s32.totalorder %s6800_s30, 1  ;;  %p8035_p1 = scmp.eq.s32.totalorder %s6969_s23, 0 }
  0x2d   : > { %p566_p2 = scmp.lt.s32.totalorder %s6800_s30, 3  ;;  %s6803_s5 = smov [#allocation11]  }
  0x2e   : > { %s591_s24 = sshll.u32 %s6803_s5, 4  ;;  %s6804_s25 = smov [#allocation14]   ;;  %s6989_s24 = int_to_ptr.vmem [resolvable:$true] %s591_s24 }
  0x2f   : > { %p6976_p3 = pnand %p4916_p0, %p566_p2  ;;  %s617_s26 = sshll.u32 %s6804_s25, 4  ;;  %s6991_s26 = int_to_ptr.vmem [resolvable:$true] %s617_s26 }
  0x30   : > { %s8093_s4 = sld [smem:[#allocation61_spill]] }
  0x31   : > { %s8090_s1 = scalar_select %p6976_p3, 1, 0 }
  0x32   : > { %p5856_p5 = pneg %p6976_p3 }
  0x33   : > { %8091 = sst [smem:[#allocation53_spill]] %s8090_s1 }
  0x34   : > { %p6985_p6 = pnand %p5856_p5, %p8035_p1 }
  0x36   : > { %s8092_s6 = scalar_select %p6985_p6, 1, 0 }
  0x37   : > { %s6062_s22 = scalar_lea.hbm %s8093_s4, 2048  ;;  %p7001_p8 = pneg %p6985_p6 }
  0x38   : > { %p6063_p7 = scmp.ne.s32.totalorder %s8093_s4, %s6062_s22  ;;  %p6069_p11 = scmp.lt.u32.totalorder %s6062_s22, %s8093_s4 }
  0x39   : > { %s8094_s5 = scalar_select %p7001_p8, 1, 0 }
  0x3a   : > { %p6065_p9 = pnand %p7001_p8, %p6063_p7 }
  0x3c   : > { %p6066_p10 = pneg %p6065_p9 }
  0x3e   : > { %p6071_p12 = pnand %p6069_p11, %p6066_p10 }
  0x40   : > { %6074 = shalt.err (!%p6071_p12)
}
  0x41   : > { %s6075_s21 = scalar_lea.vmem %s6974_s0, 2048  ;;  %p6083_p5 = scmp.lt.s32.totalorder %s6974_s0, %s6974_s0 }
  0x42   : > { %p6076_p13 = scmp.ne.s32.totalorder %s6974_s0, %s6075_s21  ;;  %p6084_p4 = scmp.lt.s32.totalorder %s6075_s21, %s6075_s21 }
  0x44   : > { %p6078_p0 = pnand %p6076_p13, %p7001_p8  ;;  %p6085_p7 = por %p6084_p4, %p6083_p5 }
  0x46   : > { %p6079_p2 = pneg %p6078_p0 }
  0x48   : > { %p6086_p9 = pnand %p6085_p7, %p6079_p2 }
  0x4a   : > { %6089 = shalt.err (!%p6086_p9)
}
  0x4b   : > { %s8037_s1 = smov 128   ;;  %s8039_s20 = smov 8  }
  0x4c   : > { %5859 = dma.hbm_to_vmem [thread:$0]  (!%p6985_p6), %s8093_s4, 2048, %s6974_s0, [#allocation9], %s8037_s1, %s8037_s1, %s8039_s20  }
  0x4d   : > { %s8095_s18 = sld [smem:[#allocation62_spill]] }
  0x53   : > { %s6090_s21 = scalar_lea.hbm %s8095_s18, 2048 }
  0x54   : > { %p6091_p4 = scmp.ne.s32.totalorder %s8095_s18, %s6090_s21  ;;  %p6097_p12 = scmp.lt.u32.totalorder %s6090_s21, %s8095_s18 }
  0x56   : > { %p6093_p10 = pnand %p6091_p4, %p7001_p8 }
  0x58   : > { %p6094_p11 = pneg %p6093_p10 }
  0x5a   : > { %p6099_p13 = pnand %p6097_p12, %p6094_p11 }
  0x5c   : > { %6102 = shalt.err (!%p6099_p13)
}
  0x5d   : > { %s6103_s0 = scalar_lea.vmem %s6989_s24, 2048  ;;  %p6111_p7 = scmp.lt.s32.totalorder %s6989_s24, %s6989_s24 }
  0x5e   : > { %p6104_p0 = scmp.ne.s32.totalorder %s6989_s24, %s6103_s0  ;;  %p6112_p9 = scmp.lt.s32.totalorder %s6103_s0, %s6103_s0 }
  0x60   : > { %p6106_p2 = pnand %p6104_p0, %p7001_p8  ;;  %p6113_p4 = por %p6112_p9, %p6111_p7 }
  0x62   : > { %p6107_p5 = pneg %p6106_p2 }
  0x64   : > { %p6114_p10 = pnand %p6113_p4, %p6107_p5 }
  0x66   : > { %6117 = shalt.err (!%p6114_p10)
}
  0x67   : > { %5862 = dma.hbm_to_vmem [thread:$0]  (!%p6985_p6), %s8095_s18, 2048, %s6989_s24, [#allocation12], %s8037_s1, %s8037_s1, %s8039_s20  }
  0x68   : > { %s8096_s7 = sld [smem:[#allocation64_spill]] }
  0x6e   : > { %s6118_s22 = scalar_lea.hbm %s8096_s7, 512 }
  0x6f   : > { %p6119_p11 = scmp.ne.s32.totalorder %s8096_s7, %s6118_s22  ;;  %p6125_p0 = scmp.lt.u32.totalorder %s6118_s22, %s8096_s7 }
  0x71   : > { %p6121_p12 = pnand %p6119_p11, %p7001_p8 }
  0x73   : > { %p6122_p13 = pneg %p6121_p12 }
  0x75   : > { %p6127_p2 = pnand %p6125_p0, %p6122_p13 }
  0x77   : > { %6130 = shalt.err (!%p6127_p2)
}
  0x78   : > { %s6131_s24 = scalar_lea.vmem %s6991_s26, 512  ;;  %p6139_p4 = scmp.lt.s32.totalorder %s6991_s26, %s6991_s26 }
  0x79   : > { %p6132_p5 = scmp.ne.s32.totalorder %s6991_s26, %s6131_s24  ;;  %p6140_p10 = scmp.lt.s32.totalorder %s6131_s24, %s6131_s24 }
  0x7b   : > { %p6134_p7 = pnand %p6132_p5, %p7001_p8  ;;  %p6141_p11 = por %p6140_p10, %p6139_p4 }
  0x7d   : > { %p6135_p9 = pneg %p6134_p7 }
  0x7f   : > { %p6142_p12 = pnand %p6141_p11, %p6135_p9 }
  0x81   : > { %6145 = shalt.err (!%p6142_p12)
}
  0x82   : > { %5868 = dma.hbm_to_vmem [thread:$0]  (!%p6985_p6), %s8096_s7, 512, %s6991_s26, [#allocation15], %s8037_s1, %s8037_s1, %s8039_s20  }
  0x83   : > { %s6807_s12 = smov [#allocation17]   ;;  %s6808_s16 = smov [#allocation20]  }
  0x84   : > { %s643_s14 = sshll.u32 %s6807_s12, 4  ;;  %s669_s22 = sshll.u32 %s6808_s16, 4  ;;  %s644_s14 = int_to_ptr.vmem [resolvable:$true] %s643_s14  ;;  %s670_s22 = int_to_ptr.vmem [resolvable:$true] %s669_s22 }
  0x85   : > { %s8097_s9 = sld [smem:[#allocation66_spill]] }
  0x8b   : > { %s6146_s25 = scalar_lea.hbm %s8097_s9, 2048 }
  0x8c   : > { %p6147_p13 = scmp.ne.s32.totalorder %s8097_s9, %s6146_s25  ;;  %p6153_p5 = scmp.lt.u32.totalorder %s6146_s25, %s8097_s9 }
  0x8e   : > { %p6149_p0 = pnand %p6147_p13, %p7001_p8 }
  0x90   : > { %p6150_p2 = pneg %p6149_p0 }
  0x92   : > { %p6155_p7 = pnand %p6153_p5, %p6150_p2 }
  0x94   : > { %6158 = shalt.err (!%p6155_p7)
}
  0x95   : > { %s6159_s26 = scalar_lea.vmem %s644_s14, 2048  ;;  %p6167_p11 = scmp.lt.s32.totalorder %s644_s14, %s644_s14 }
  0x96   : > { %p6160_p9 = scmp.ne.s32.totalorder %s644_s14, %s6159_s26  ;;  %p6168_p12 = scmp.lt.s32.totalorder %s6159_s26, %s6159_s26 }
  0x98   : > { %p6162_p4 = pnand %p6160_p9, %p7001_p8  ;;  %p6169_p1 = por %p6168_p12, %p6167_p11 }
  0x9a   : > { %p6163_p10 = pneg %p6162_p4 }
  0x9c   : > { %p6170_p3 = pnand %p6169_p1, %p6163_p10 }
  0x9e   : > { %6173 = shalt.err (!%p6170_p3)
}
  0x9f   : > { %5874 = dma.hbm_to_vmem [thread:$0]  (!%p6985_p6), %s8097_s9, 2048, %s644_s14, [#allocation18], %s8037_s1, %s8037_s1, %s8039_s20  }
  0xa0   : > { %s8098_s11 = sld [smem:[#allocation68_spill]] }
  0xa6   : > { %s6174_s2 = scalar_lea.hbm %s8098_s11, 512 }
  0xa7   : > { %p6175_p1 = scmp.ne.s32.totalorder %s8098_s11, %s6174_s2  ;;  %p6181_p0 = scmp.lt.u32.totalorder %s6174_s2, %s8098_s11 }
  0xa9   : > { %p6177_p3 = pnand %p6175_p1, %p7001_p8 }
  0xab   : > { %p6178_p13 = pneg %p6177_p3 }
  0xad   : > { %p6183_p2 = pnand %p6181_p0, %p6178_p13 }
  0xaf   : > { %6186 = shalt.err (!%p6183_p2)
}
  0xb0   : > { %s6187_s0 = scalar_lea.vmem %s670_s22, 512  ;;  %p6195_p4 = scmp.lt.s32.totalorder %s670_s22, %s670_s22 }
  0xb1   : > { %p6188_p5 = scmp.ne.s32.totalorder %s670_s22, %s6187_s0  ;;  %p6196_p10 = scmp.lt.s32.totalorder %s6187_s0, %s6187_s0 }
  0xb3   : > { %p6190_p7 = pnand %p6188_p5, %p7001_p8  ;;  %p6197_p11 = por %p6196_p10, %p6195_p4 }
  0xb5   : > { %p6191_p9 = pneg %p6190_p7 }
  0xb7   : > { %p6198_p12 = pnand %p6197_p11, %p6191_p9 }
  0xb9   : > { %6201 = shalt.err (!%p6198_p12)
}
  0xba   : > { %5880 = dma.hbm_to_vmem [thread:$0]  (!%p6985_p6), %s8098_s11, 512, %s670_s22, [#allocation21], %s8037_s1, %s8037_s1, %s8039_s20  }
  0xbb   : > { %s6809_s4 = smov [#allocation23]   ;;  %s6810_s12 = smov [#allocation26]  }
  0xbc   : > { %s694_s10 = sshll.u32 %s6809_s4, 4  ;;  %s716_s16 = sshll.u32 %s6810_s12, 4  ;;  %s695_s10 = int_to_ptr.vmem [resolvable:$true] %s694_s10  ;;  %s717_s16 = int_to_ptr.vmem [resolvable:$true] %s716_s16 }
  0xbd   : > { %s8099_s13 = sld [smem:[#allocation70_spill]] }
  0xc3   : > { %s6202_s25 = scalar_lea.hbm %s8099_s13, 16 }
  0xc4   : > { %p6203_p1 = scmp.ne.s32.totalorder %s8099_s13, %s6202_s25  ;;  %p6209_p0 = scmp.lt.u32.totalorder %s6202_s25, %s8099_s13 }
  0xc6   : > { %p6205_p3 = pnand %p6203_p1, %p7001_p8 }
  0xc8   : > { %p6206_p13 = pneg %p6205_p3 }
  0xca   : > { %p6211_p2 = pnand %p6209_p0, %p6206_p13 }
  0xcc   : > { %6214 = shalt.err (!%p6211_p2)
}
  0xcd   : > { %s6215_s22 = scalar_lea.vmem %s695_s10, 16  ;;  %s6222_s26 = scalar_lea.vmem %s695_s10, 32 }
  0xce   : > { %p6216_p5 = scmp.ne.s32.totalorder %s695_s10, %s6215_s22  ;;  %p6223_p4 = scmp.lt.s32.totalorder %s695_s10, %s695_s10 }
  0xcf   : > { %p6224_p10 = scmp.lt.s32.totalorder %s6222_s26, %s6215_s22 }
  0xd0   : > { %p6218_p7 = pnand %p6216_p5, %p7001_p8 }
  0xd1   : > { %p6225_p11 = por %p6224_p10, %p6223_p4 }
  0xd2   : > { %p6219_p9 = pneg %p6218_p7 }
  0xd4   : > { %p6226_p12 = pnand %p6225_p11, %p6219_p9 }
  0xd6   : > { %6229 = shalt.err (!%p6226_p12)
}
  0xd7   : > { %5886 = dma.hbm_to_vmem [thread:$0]  (!%p6985_p6), %s8099_s13, 16, %s695_s10, [#allocation24]  }
  0xd8   : > { %s8100_s15 = sld [smem:[#allocation72_spill]] }
  0xde   : > { %s6230_s25 = scalar_lea.hbm %s8100_s15, 16 }
  0xdf   : > { %p6231_p1 = scmp.ne.s32.totalorder %s8100_s15, %s6230_s25  ;;  %p6237_p0 = scmp.lt.u32.totalorder %s6230_s25, %s8100_s15 }
  0xe1   : > { %p6233_p3 = pnand %p6231_p1, %p7001_p8 }
  0xe3   : > { %p6234_p13 = pneg %p6233_p3 }
  0xe5   : > { %p6239_p2 = pnand %p6237_p0, %p6234_p13 }
  0xe7   : > { %6242 = shalt.err (!%p6239_p2)
}
  0xe8   : > { %s6243_s22 = scalar_lea.vmem %s717_s16, 16  ;;  %s6250_s10 = scalar_lea.vmem %s717_s16, 32 }
  0xe9   : > { %p6244_p5 = scmp.ne.s32.totalorder %s717_s16, %s6243_s22  ;;  %p6251_p4 = scmp.lt.s32.totalorder %s717_s16, %s717_s16 }
  0xea   : > { %p6252_p10 = scmp.lt.s32.totalorder %s6250_s10, %s6243_s22 }
  0xeb   : > { %p6246_p7 = pnand %p6244_p5, %p7001_p8 }
  0xec   : > { %p6253_p11 = por %p6252_p10, %p6251_p4 }
  0xed   : > { %p6247_p9 = pneg %p6246_p7 }
  0xef   : > { %p6254_p12 = pnand %p6253_p11, %p6247_p9 }
  0xf1   : > { %6257 = shalt.err (!%p6254_p12)
}
  0xf2   : > { %5892 = dma.hbm_to_vmem [thread:$0]  (!%p6985_p6), %s8100_s15, 16, %s717_s16, [#allocation27]  }
  0xf3   : > { %s6811_s12 = smov [#allocation29]   ;;  %s6812_s27 = smov [#allocation32]  }
  0xf4   : > { %s738_s2 = sshll.u32 %s6811_s12, 4  ;;  %s762_s25 = sshll.u32 %s6812_s27, 4  ;;  %s739_s2 = int_to_ptr.vmem [resolvable:$true] %s738_s2  ;;  %s763_s25 = int_to_ptr.vmem [resolvable:$true] %s762_s25 }
  0xf5   : > { %s8101_s17 = sld [smem:[#allocation74_spill]] }
  0xfb   : > { %s6258_s0 = scalar_lea.hbm %s8101_s17, 16 }
  0xfc   : > { %p6259_p1 = scmp.ne.s32.totalorder %s8101_s17, %s6258_s0  ;;  %p6265_p0 = scmp.lt.u32.totalorder %s6258_s0, %s8101_s17 }
  0xfe   : > { %p6261_p3 = pnand %p6259_p1, %p7001_p8 }
 0x100   : > { %p6262_p13 = pneg %p6261_p3 }
 0x102   : > { %p6267_p2 = pnand %p6265_p0, %p6262_p13 }
 0x104   : > { %6270 = shalt.err (!%p6267_p2)
}
 0x105   : > { %s6271_s16 = scalar_lea.vmem %s739_s2, 16  ;;  %s6278_s4 = scalar_lea.vmem %s739_s2, 32 }
 0x106   : > { %p6272_p5 = scmp.ne.s32.totalorder %s739_s2, %s6271_s16  ;;  %p6279_p4 = scmp.lt.s32.totalorder %s739_s2, %s739_s2 }
 0x107   : > { %p6280_p10 = scmp.lt.s32.totalorder %s6278_s4, %s6271_s16 }
 0x108   : > { %p6274_p7 = pnand %p6272_p5, %p7001_p8 }
 0x109   : > { %p6281_p11 = por %p6280_p10, %p6279_p4 }
 0x10a   : > { %p6275_p9 = pneg %p6274_p7 }
 0x10c   : > { %p6282_p12 = pnand %p6281_p11, %p6275_p9 }
 0x10e   : > { %6285 = shalt.err (!%p6282_p12)
}
 0x10f   : > { %5898 = dma.hbm_to_vmem [thread:$0]  (!%p6985_p6), %s8101_s17, 16, %s739_s2, [#allocation30]  }
 0x110   : > { %s8102_s19 = sld [smem:[#allocation76_spill]] }
 0x116   : > { %s6286_s0 = scalar_lea.hbm %s8102_s19, 16 }
 0x117   : > { %p6287_p1 = scmp.ne.s32.totalorder %s8102_s19, %s6286_s0  ;;  %p6293_p0 = scmp.lt.u32.totalorder %s6286_s0, %s8102_s19 }
 0x119   : > { %p6289_p3 = pnand %p6287_p1, %p7001_p8 }
 0x11b   : > { %p6290_p13 = pneg %p6289_p3 }
 0x11d   : > { %p6295_p2 = pnand %p6293_p0, %p6290_p13 }
 0x11f   : > { %6298 = shalt.err (!%p6295_p2)
}
 0x120   : > { %s6299_s16 = scalar_lea.vmem %s763_s25, 16  ;;  %s6306_s2 = scalar_lea.vmem %s763_s25, 32 }
 0x121   : > { %p6300_p5 = scmp.ne.s32.totalorder %s763_s25, %s6299_s16  ;;  %p6307_p4 = scmp.lt.s32.totalorder %s763_s25, %s763_s25 }
 0x122   : > { %p6308_p10 = scmp.lt.s32.totalorder %s6306_s2, %s6299_s16 }
 0x123   : > { %p6302_p7 = pnand %p6300_p5, %p7001_p8 }
 0x124   : > { %p6309_p11 = por %p6308_p10, %p6307_p4 }
 0x125   : > { %p6303_p9 = pneg %p6302_p7 }
 0x127   : > { %p6310_p12 = pnand %p6309_p11, %p6303_p9 }
 0x129   : > { %6313 = shalt.err (!%p6310_p12)
}
 0x12a   : > { %5904 = dma.hbm_to_vmem [thread:$0]  (!%p6985_p6), %s8102_s19, 16, %s763_s25, [#allocation33]  }
 0x12b   : > { %s4915_s27 = sadd.s32 4294967294, %s6800_s30   ;;  %s7193_s21 = sadd.s32 1, %s6800_s30  }
 0x12c   : > { %8103 = sst [smem:[#allocation54_spill]] %s7193_s21  ;;  %s60_s24 = sadd.s32 1, %s6796_s29 }
 0x12d   : > { %s57_s0 = ssub.s32 %s6800_s30, %s7193_s21  ;;  %p67_p1 = scmp.ne.s32.totalorder %s6796_s29, %s6792_s28 }
 0x12e   : > { %p58_p3 = scmp.eq.s32.totalorder %s57_s0, 0  ;;  %p68_p13 = scmp.eq.s32.totalorder %s6800_s30, 0 }
 0x12f   : > { %p73_p0 = scmp.ne.s32.totalorder %s6792_s28, %s6788_s3  ;;  %p553_p2 = scmp.eq.s32.totalorder %s6969_s23, 1 }
 0x130   : > { %s7205_s14 = scalar_select %p58_p3, %s6796_s29, %s60_s24  }
 0x131   : > { %p69_p5 = por %p68_p13, %p67_p1  ;;  %p8105_p7 = scmp.eq.s32.totalorder %s6969_s23, 0 }
 0x132   : > { %8104 = sst [smem:[#allocation55_spill]] %s7205_s14  ;;  %p7213_p4 = por %p553_p2, %p67_p1 }
 0x133   : > { %p7209_p9 = por %p8105_p7, %p73_p0  ;;  %p559_p10 = scmp.eq.s32.totalorder %s4915_s27, 1 }
 0x134   : > { %s8107_s22 = scalar_select %p7213_p4, 1, 0 }
 0x135   : > { %s8106_s25 = scalar_select %p7209_p9, 1, 0 }
 0x136   : > { %p5946_p11 = scmp.lt.s32.totalorder %s6800_s30, 2  ;;  %s7219_s10 = sand.u32 1, %s6796_s29  }
 0x137   : > { %p7221_p12 = por %p559_p10, %p73_p0  ;;  %s8041_s16 = sshll.u32 %s7219_s10, 3 }
 0x138   : > { %s8042_s2 = sshll.u32 %s6800_s30, 7  ;;  %p7227_p3 = pnand %p5946_p11, %p69_p5 }
 0x139   : > { %s8108_s26 = scalar_select %p7221_p12, 1, 0 }
 0x13a   : > { %s8110_s4 = scalar_select %p7227_p3, 1, 0 }
 0x13b   : > { %8109 = sst [smem:[#allocation56_spill]] %s8108_s26  ;;  %s8044_s12 = sand.u32 1, %s6800_s30  }
 0x13c   : > { %s8111_s0 = sld [smem:[#allocation58_spill]]  ;;  %s819_s20 = scalar_lea.vmem [#allocation5], %s8041_s16 }
 0x13d   : > { %s826_s7 = sshll.u32 %s819_s20, 4  ;;  %s7245_s9 = scalar_lea.sflag [#allocation6], %s8044_s12  ;;  %s7241_s7 = int_to_ptr.vmem [resolvable:$true] %s826_s7 }
 0x13e   : > { %p7251_p13 = pneg %p7227_p3 }
 0x140   : > { %s8112_s13 = scalar_select %p7251_p13, 1, 0 }
 0x142   : > { %s7237_s1 = scalar_lea.hbm %s8111_s0, %s8042_s2  ;;  %s6319_s20 = scalar_lea.hbm %s8111_s0, 256 }
 0x143   : > { %s6314_s11 = scalar_lea.hbm %s7237_s1, 128  ;;  %p6320_p5 = scmp.lt.u32.totalorder %s7237_s1, %s8111_s0 }
 0x144   : > { %p6315_p1 = scmp.ne.s32.totalorder %s7237_s1, %s6314_s11  ;;  %p6321_p7 = scmp.lt.u32.totalorder %s6319_s20, %s6314_s11 }
 0x145   : > { %p6323_p11 = scmp.lt.u32.totalorder %s6314_s11, %s7237_s1 }
 0x146   : > { %p6317_p0 = pnand %p7251_p13, %p6315_p1  ;;  %p6322_p10 = por %p6321_p7, %p6320_p5 }
 0x148   : > { %p6318_p2 = pneg %p6317_p0  ;;  %p6324_p12 = por %p6323_p11, %p6322_p10 }
 0x14a   : > { %p6325_p4 = pnand %p6324_p12, %p6318_p2 }
 0x14c   : > { %6328 = shalt.err (!%p6325_p4)
}
 0x14d   : > { %s6329_s12 = scalar_lea.vmem %s7241_s7, 128  ;;  %s6813_s24 = smov [#allocation5]  }
 0x14e   : > { %p6330_p1 = scmp.ne.s32.totalorder %s7241_s7, %s6329_s12  ;;  %s6334_s27 = sshll.u32 %s6813_s24, 4  ;;  %s6335_s27 = int_to_ptr.vmem [resolvable:$false] %s6334_s27 }
 0x14f   : > { %s6336_s16 = scalar_lea.vmem %s6335_s27, 256  ;;  %p6337_p6 = scmp.lt.s32.totalorder %s7241_s7, %s6335_s27 }
 0x150   : > { %p6332_p0 = pnand %p6330_p1, %p7251_p13  ;;  %p6338_p8 = scmp.lt.s32.totalorder %s6336_s16, %s6329_s12 }
 0x152   : > { %p6333_p9 = pneg %p6332_p0  ;;  %p6339_p5 = por %p6338_p8, %p6337_p6 }
 0x154   : > { %p6340_p7 = pnand %p6339_p5, %p6333_p9 }
 0x156   : > { %6343 = shalt.err (!%p6340_p7)
}
 0x157   : > { %5917 = dma.hbm_to_vmem [thread:$0]  (!%p7227_p3), %s7237_s1, 128, %s7241_s7, %s7245_s9  }
 0x158   : > { %s6814_s11 = smov [#allocation13]   ;;  %s6815_s20 = smov [#allocation16]  }
 0x159   : > { %s604_s2 = sshll.u32 %s6814_s11, 4  ;;  %s630_s0 = sshll.u32 %s6815_s20, 4  ;;  %s605_s2 = int_to_ptr.vmem [resolvable:$true] %s604_s2  ;;  %s7275_s0 = int_to_ptr.vmem [resolvable:$true] %s630_s0 }
 0x15a   : > { %s8113_s12 = sld [smem:[#allocation63_spill]]  ;;  %p8114_p8 = scmp.ne.s32.totalorder %s8094_s5, 0 }
 0x160   : > { %s6344_s16 = scalar_lea.hbm %s8113_s12, 2048 }
 0x161   : > { %p6345_p6 = scmp.ne.s32.totalorder %s8113_s12, %s6344_s16  ;;  %p6351_p12 = scmp.lt.u32.totalorder %s6344_s16, %s8113_s12 }
 0x163   : > { %p6347_p9 = pnand %p6345_p6, %p8114_p8 }
 0x165   : > { %p6348_p4 = pneg %p6347_p9 }
 0x167   : > { %p6353_p2 = pnand %p6351_p12, %p6348_p4 }
 0x169   : > { %6356 = shalt.err (!%p6353_p2)
}
 0x16a   : > { %s6357_s1 = scalar_lea.vmem %s605_s2, 2048  ;;  %p6365_p0 = scmp.lt.s32.totalorder %s605_s2, %s605_s2 }
 0x16b   : > { %p6358_p10 = scmp.ne.s32.totalorder %s605_s2, %s6357_s1  ;;  %p6366_p5 = scmp.lt.s32.totalorder %s6357_s1, %s6357_s1 }
 0x16d   : > { %p6360_p11 = pnand %p6358_p10, %p8114_p8  ;;  %p6367_p7 = por %p6366_p5, %p6365_p0 }
 0x16f   : > { %p6361_p1 = pneg %p6360_p11 }
 0x171   : > { %p6368_p3 = pnand %p6367_p7, %p6361_p1 }
 0x173   : > { %6371 = shalt.err (!%p6368_p3)
}
 0x174   : > { %p8115_p6 = scmp.ne.s32.totalorder %s8092_s6, 0  ;;  %s8116_s15 = smov 8  }
 0x175   : > { %s8117_s17 = smov 128   ;;  %s8118_s8 = sld [smem:[#allocation65_spill]] }
 0x176   : > { %5865 = dma.hbm_to_vmem [thread:$0]  (!%p8115_p6), %s8113_s12, 2048, %s605_s2, [#allocation12], %s8117_s17, %s8117_s17, %s8116_s15  }
 0x17b   : > { %s6372_s27 = scalar_lea.hbm %s8118_s8, 2048 }
 0x17c   : > { %p6373_p9 = scmp.ne.s32.totalorder %s8118_s8, %s6372_s27  ;;  %p6379_p12 = scmp.lt.u32.totalorder %s6372_s27, %s8118_s8 }
 0x17e   : > { %p6375_p3 = pnand %p6373_p9, %p8114_p8 }
 0x180   : > { %p6376_p4 = pneg %p6375_p3 }
 0x182   : > { %p6381_p2 = pnand %p6379_p12, %p6376_p4 }
 0x184   : > { %6384 = shalt.err (!%p6381_p2)
}
 0x185   : > { %s6385_s2 = scalar_lea.vmem %s7275_s0, 2048  ;;  %p6393_p0 = scmp.lt.s32.totalorder %s7275_s0, %s7275_s0 }
 0x186   : > { %p6386_p10 = scmp.ne.s32.totalorder %s7275_s0, %s6385_s2  ;;  %p6394_p5 = scmp.lt.s32.totalorder %s6385_s2, %s6385_s2 }
 0x188   : > { %p6388_p11 = pnand %p6386_p10, %p8114_p8  ;;  %p6395_p7 = por %p6394_p5, %p6393_p0 }
 0x18a   : > { %p6389_p1 = pneg %p6388_p11 }
 0x18c   : > { %p6396_p9 = pnand %p6395_p7, %p6389_p1 }
 0x18e   : > { %6399 = shalt.err (!%p6396_p9)
}
 0x18f   : > { %5871 = dma.hbm_to_vmem [thread:$0]  (!%p8115_p6), %s8118_s8, 2048, %s7275_s0, [#allocation15], %s8117_s17, %s8117_s17, %s8116_s15  }
 0x190   : > { %s6816_s11 = smov [#allocation19]   ;;  %s6817_s24 = smov [#allocation22]  }
 0x191   : > { %s656_s20 = sshll.u32 %s6816_s11, 4  ;;  %s683_s27 = sshll.u32 %s6817_s24, 4  ;;  %s657_s20 = int_to_ptr.vmem [resolvable:$true] %s656_s20  ;;  %s7324_s27 = int_to_ptr.vmem [resolvable:$true] %s683_s27 }
 0x192   : > { %s8119_s1 = sld [smem:[#allocation67_spill]] }
 0x198   : > { %s6400_s2 = scalar_lea.hbm %s8119_s1, 2048 }
 0x199   : > { %p6401_p3 = scmp.ne.s32.totalorder %s8119_s1, %s6400_s2  ;;  %p6407_p2 = scmp.lt.u32.totalorder %s6400_s2, %s8119_s1 }
 0x19b   : > { %p6403_p4 = pnand %p6401_p3, %p8114_p8 }
 0x19d   : > { %p6404_p12 = pneg %p6403_p4 }
 0x19f   : > { %p6409_p10 = pnand %p6407_p2, %p6404_p12 }
 0x1a1   : > { %6412 = shalt.err (!%p6409_p10)
}
 0x1a2   : > { %s6413_s18 = scalar_lea.vmem %s657_s20, 2048  ;;  %p6421_p5 = scmp.lt.s32.totalorder %s657_s20, %s657_s20 }
 0x1a3   : > { %p6414_p11 = scmp.ne.s32.totalorder %s657_s20, %s6413_s18  ;;  %p6422_p7 = scmp.lt.s32.totalorder %s6413_s18, %s6413_s18 }
 0x1a5   : > { %p6416_p1 = pnand %p6414_p11, %p8114_p8  ;;  %p6423_p9 = por %p6422_p7, %p6421_p5 }
 0x1a7   : > { %p6417_p0 = pneg %p6416_p1 }
 0x1a9   : > { %p6424_p13 = pnand %p6423_p9, %p6417_p0 }
 0x1ab   : > { %6427 = shalt.err (!%p6424_p13)
}
 0x1ac   : > { %5877 = dma.hbm_to_vmem [thread:$0]  (!%p8115_p6), %s8119_s1, 2048, %s657_s20, [#allocation18], %s8117_s17, %s8117_s17, %s8116_s15  }
 0x1ad   : > { %s8120_s16 = sld [smem:[#allocation69_spill]] }
 0x1b3   : > { %s6428_s7 = scalar_lea.hbm %s8120_s16, 16 }
 0x1b4   : > { %p6429_p3 = scmp.ne.s32.totalorder %s8120_s16, %s6428_s7  ;;  %p6435_p12 = scmp.lt.u32.totalorder %s6428_s7, %s8120_s16 }
 0x1b6   : > { %p6431_p13 = pnand %p6429_p3, %p8114_p8 }
 0x1b8   : > { %p6432_p4 = pneg %p6431_p13 }
 0x1ba   : > { %p6437_p2 = pnand %p6435_p12, %p6432_p4 }
 0x1bc   : > { %6440 = shalt.err (!%p6437_p2)
}
 0x1bd   : > { %s6441_s20 = scalar_lea.vmem %s7324_s27, 16  ;;  %s6448_s14 = scalar_lea.vmem %s7324_s27, 32 }
 0x1be   : > { %p6442_p10 = scmp.ne.s32.totalorder %s7324_s27, %s6441_s20  ;;  %p6449_p0 = scmp.lt.s32.totalorder %s7324_s27, %s7324_s27 }
 0x1bf   : > { %p6450_p5 = scmp.lt.s32.totalorder %s6448_s14, %s6441_s20 }
 0x1c0   : > { %p6444_p11 = pnand %p6442_p10, %p8114_p8 }
 0x1c1   : > { %p6451_p7 = por %p6450_p5, %p6449_p0 }
 0x1c2   : > { %p6445_p1 = pneg %p6444_p11 }
 0x1c4   : > { %p6452_p9 = pnand %p6451_p7, %p6445_p1 }
 0x1c6   : > { %6455 = shalt.err (!%p6452_p9)
}
 0x1c7   : > { %5883 = dma.hbm_to_vmem [thread:$0]  (!%p8115_p6), %s8120_s16, 16, %s7324_s27, [#allocation21]  }
 0x1c8   : > { %s6818_s24 = smov [#allocation25]   ;;  %s6819_s2 = smov [#allocation28]  }
 0x1c9   : > { %s705_s7 = sshll.u32 %s6818_s24, 4  ;;  %s727_s19 = sshll.u32 %s6819_s2, 4  ;;  %s706_s7 = int_to_ptr.vmem [resolvable:$true] %s705_s7  ;;  %s7371_s19 = int_to_ptr.vmem [resolvable:$true] %s727_s19 }
 0x1ca   : > { %s8121_s20 = sld [smem:[#allocation71_spill]] }
 0x1d0   : > { %s6456_s14 = scalar_lea.hbm %s8121_s20, 16 }
 0x1d1   : > { %p6457_p3 = scmp.ne.s32.totalorder %s8121_s20, %s6456_s14  ;;  %p6463_p12 = scmp.lt.u32.totalorder %s6456_s14, %s8121_s20 }
 0x1d3   : > { %p6459_p13 = pnand %p6457_p3, %p8114_p8 }
 0x1d5   : > { %p6460_p4 = pneg %p6459_p13 }
 0x1d7   : > { %p6465_p2 = pnand %p6463_p12, %p6460_p4 }
 0x1d9   : > { %6468 = shalt.err (!%p6465_p2)
}
 0x1da   : > { %s6469_s11 = scalar_lea.vmem %s706_s7, 16  ;;  %s6476_s24 = scalar_lea.vmem %s706_s7, 32 }
 0x1db   : > { %p6470_p10 = scmp.ne.s32.totalorder %s706_s7, %s6469_s11  ;;  %p6477_p0 = scmp.lt.s32.totalorder %s706_s7, %s706_s7 }
 0x1dc   : > { %p6478_p5 = scmp.lt.s32.totalorder %s6476_s24, %s6469_s11 }
 0x1dd   : > { %p6472_p11 = pnand %p6470_p10, %p8114_p8 }
 0x1de   : > { %p6479_p7 = por %p6478_p5, %p6477_p0 }
 0x1df   : > { %p6473_p1 = pneg %p6472_p11 }
 0x1e1   : > { %p6480_p9 = pnand %p6479_p7, %p6473_p1 }
 0x1e3   : > { %6483 = shalt.err (!%p6480_p9)
}
 0x1e4   : > { %5889 = dma.hbm_to_vmem [thread:$0]  (!%p8115_p6), %s8121_s20, 16, %s706_s7, [#allocation24]  }
 0x1e5   : > { %s8122_s18 = sld [smem:[#allocation73_spill]] }
 0x1eb   : > { %s6484_s14 = scalar_lea.hbm %s8122_s18, 16 }
 0x1ec   : > { %p6485_p3 = scmp.ne.s32.totalorder %s8122_s18, %s6484_s14  ;;  %p6491_p12 = scmp.lt.u32.totalorder %s6484_s14, %s8122_s18 }
 0x1ee   : > { %p6487_p13 = pnand %p6485_p3, %p8114_p8 }
 0x1f0   : > { %p6488_p4 = pneg %p6487_p13 }
 0x1f2   : > { %p6493_p2 = pnand %p6491_p12, %p6488_p4 }
 0x1f4   : > { %6496 = shalt.err (!%p6493_p2)
}
 0x1f5   : > { %s6497_s7 = scalar_lea.vmem %s7371_s19, 16  ;;  %s6504_s8 = scalar_lea.vmem %s7371_s19, 32 }
 0x1f6   : > { %p6498_p10 = scmp.ne.s32.totalorder %s7371_s19, %s6497_s7  ;;  %p6505_p0 = scmp.lt.s32.totalorder %s7371_s19, %s7371_s19 }
 0x1f7   : > { %p6506_p5 = scmp.lt.s32.totalorder %s6504_s8, %s6497_s7 }
 0x1f8   : > { %p6500_p11 = pnand %p6498_p10, %p8114_p8 }
 0x1f9   : > { %p6507_p7 = por %p6506_p5, %p6505_p0 }
 0x1fa   : > { %p6501_p1 = pneg %p6500_p11 }
 0x1fc   : > { %p6508_p9 = pnand %p6507_p7, %p6501_p1 }
 0x1fe   : > { %6511 = shalt.err (!%p6508_p9)
}
 0x1ff   : > { %5895 = dma.hbm_to_vmem [thread:$0]  (!%p8115_p6), %s8122_s18, 16, %s7371_s19, [#allocation27]  }
 0x200   : > { %s6820_s0 = smov [#allocation31]   ;;  %s6821_s12 = smov [#allocation34]  }
 0x201   : > { %s748_s14 = sshll.u32 %s6820_s0, 4  ;;  %s772_s27 = sshll.u32 %s6821_s12, 4  ;;  %s749_s14 = int_to_ptr.vmem [resolvable:$true] %s748_s14  ;;  %s7415_s27 = int_to_ptr.vmem [resolvable:$true] %s772_s27 }
 0x202   : > { %s8123_s7 = sld [smem:[#allocation75_spill]] }
 0x208   : > { %s6512_s8 = scalar_lea.hbm %s8123_s7, 512 }
 0x209   : > { %p6513_p3 = scmp.ne.s32.totalorder %s8123_s7, %s6512_s8  ;;  %p6519_p12 = scmp.lt.u32.totalorder %s6512_s8, %s8123_s7 }
 0x20b   : > { %p6515_p13 = pnand %p6513_p3, %p8114_p8 }
 0x20d   : > { %p6516_p4 = pneg %p6515_p13 }
 0x20f   : > { %p6521_p2 = pnand %p6519_p12, %p6516_p4 }
 0x211   : > { %6524 = shalt.err (!%p6521_p2)
}
 0x212   : > { %s6525_s2 = scalar_lea.vmem %s749_s14, 512  ;;  %p6533_p0 = scmp.lt.s32.totalorder %s749_s14, %s749_s14 }
 0x213   : > { %p6526_p10 = scmp.ne.s32.totalorder %s749_s14, %s6525_s2  ;;  %p6534_p5 = scmp.lt.s32.totalorder %s6525_s2, %s6525_s2 }
 0x215   : > { %p6528_p11 = pnand %p6526_p10, %p8114_p8  ;;  %p6535_p7 = por %p6534_p5, %p6533_p0 }
 0x217   : > { %p6529_p1 = pneg %p6528_p11 }
 0x219   : > { %p6536_p9 = pnand %p6535_p7, %p6529_p1 }
 0x21b   : > { %6539 = shalt.err (!%p6536_p9)
}
 0x21c   : > { %5901 = dma.hbm_to_vmem [thread:$0]  (!%p8115_p6), %s8123_s7, 512, %s749_s14, [#allocation30], %s8117_s17, %s8117_s17, %s8116_s15  }
 0x21d   : > { %s8124_s11 = sld [smem:[#allocation77_spill]] }
 0x223   : > { %s6540_s24 = scalar_lea.hbm %s8124_s11, 1024 }
 0x224   : > { %p6541_p3 = scmp.ne.s32.totalorder %s8124_s11, %s6540_s24  ;;  %p6547_p12 = scmp.lt.u32.totalorder %s6540_s24, %s8124_s11 }
 0x226   : > { %p6543_p13 = pnand %p6541_p3, %p8114_p8 }
 0x228   : > { %p6544_p4 = pneg %p6543_p13 }
 0x22a   : > { %p6549_p2 = pnand %p6547_p12, %p6544_p4 }
 0x22c   : > { %6552 = shalt.err (!%p6549_p2)
}
 0x22d   : > { %s6553_s14 = scalar_lea.vmem %s7415_s27, 1024  ;;  %p6561_p0 = scmp.lt.s32.totalorder %s7415_s27, %s7415_s27 }
 0x22e   : > { %p6554_p10 = scmp.ne.s32.totalorder %s7415_s27, %s6553_s14  ;;  %p6562_p5 = scmp.lt.s32.totalorder %s6553_s14, %s6553_s14 }
 0x230   : > { %p6556_p11 = pnand %p6554_p10, %p8114_p8  ;;  %p6563_p7 = por %p6562_p5, %p6561_p0 }
 0x232   : > { %p6557_p1 = pneg %p6556_p11 }
 0x234   : > { %p6564_p9 = pnand %p6563_p7, %p6557_p1 }
 0x236   : > { %6567 = shalt.err (!%p6564_p9)
}
 0x237   : > { %5907 = dma.hbm_to_vmem [thread:$0]  (!%p8115_p6), %s8124_s11, 1024, %s7415_s27, [#allocation33], %s8117_s17, %s8117_s17, %s8116_s15  }
 0x238   : > { %s6822_s0 = smov [#allocation35]   ;;  %s8125_s24 = sshll.u32 %s6800_s30, 7 }
 0x239   : > { %s786_s12 = sshll.u32 %s6822_s0, 4  ;;  %s8126_s19 = sld [smem:[#allocation57_spill]]  ;;  %s787_s12 = int_to_ptr.vmem [resolvable:$true] %s786_s12 }
 0x23a   : > { %s8127_s18 = sld [smem:[#allocation78_spill]] }
 0x23f   : > { %s7469_s2 = scalar_lea.hbm %s8126_s19, %s8125_s24 }
 0x240   : > { %s6568_s29 = scalar_lea.hbm %s8127_s18, 16 }
 0x241   : > { %p6569_p3 = scmp.ne.s32.totalorder %s8127_s18, %s6568_s29  ;;  %p6575_p12 = scmp.lt.u32.totalorder %s6568_s29, %s8127_s18 }
 0x243   : > { %p6571_p13 = pnand %p6569_p3, %p8114_p8 }
 0x245   : > { %p6572_p4 = pneg %p6571_p13 }
 0x247   : > { %p6577_p2 = pnand %p6575_p12, %p6572_p4 }
 0x249   : > { %6580 = shalt.err (!%p6577_p2)
}
 0x24a   : > { %s6581_s27 = scalar_lea.vmem %s787_s12, 16  ;;  %s6588_s7 = scalar_lea.vmem %s787_s12, 32 }
 0x24b   : > { %p6582_p10 = scmp.ne.s32.totalorder %s787_s12, %s6581_s27  ;;  %p6589_p0 = scmp.lt.s32.totalorder %s787_s12, %s787_s12 }
 0x24c   : > { %p6590_p5 = scmp.lt.s32.totalorder %s6588_s7, %s6581_s27 }
 0x24d   : > { %p6584_p11 = pnand %p6582_p10, %p8114_p8 }
 0x24e   : > { %p6591_p7 = por %p6590_p5, %p6589_p0 }
 0x24f   : > { %p6585_p1 = pneg %p6584_p11 }
 0x251   : > { %p6592_p9 = pnand %p6591_p7, %p6585_p1 }
 0x253   : > { %6595 = shalt.err (!%p6592_p9)
}
 0x254   : > { %5910 = dma.hbm_to_vmem [thread:$0]  (!%p8115_p6), %s8127_s18, 16, %s787_s12, [#allocation36]  }
 0x255   : > { %s8128_s29 = sshll.u32 %s7219_s10, 3  ;;  %s4940_s20 = sshll.u32 %s6800_s30, 4 }
 0x256   : > { %s801_s5 = scalar_lea.vmem [#allocation2], %s8128_s29  ;;  %s798_s0 = scalar_lea.sflag [#allocation3], %s7219_s10 }
 0x257   : > { %s808_s16 = sshll.u32 %s801_s5, 4  ;;  %s6596_s6 = scalar_lea.hbm %s7469_s2, 128  ;;  %s7491_s16 = int_to_ptr.vmem [resolvable:$true] %s808_s16 }
 0x258   : > { %p6597_p8 = scmp.ne.s32.totalorder %s7469_s2, %s6596_s6  ;;  %p8129_p3 = scmp.ne.s32.totalorder %s8112_s13, 0 }
 0x259   : > { %s6601_s1 = scalar_lea.hbm %s8126_s19, 256  ;;  %p6602_p6 = scmp.lt.u32.totalorder %s7469_s2, %s8126_s19 }
 0x25a   : > { %p6599_p13 = pnand %p6597_p8, %p8129_p3  ;;  %p6603_p12 = scmp.lt.u32.totalorder %s6601_s1, %s6596_s6 }
 0x25b   : > { %p6605_p10 = scmp.lt.u32.totalorder %s6596_s6, %s7469_s2 }
 0x25c   : > { %p6600_p4 = pneg %p6599_p13  ;;  %p6604_p2 = por %p6603_p12, %p6602_p6 }
 0x25e   : > { %p6606_p11 = por %p6605_p10, %p6604_p2 }
 0x260   : > { %p6607_p1 = pnand %p6606_p11, %p6600_p4 }
 0x262   : > { %6610 = shalt.err (!%p6607_p1)
}
 0x263   : > { %s6611_s12 = scalar_lea.vmem %s7491_s16, 128  ;;  %s6823_s17 = smov [#allocation2]  }
 0x264   : > { %p6612_p0 = scmp.ne.s32.totalorder %s7491_s16, %s6611_s12  ;;  %s6616_s27 = sshll.u32 %s6823_s17, 4  ;;  %s6617_s27 = int_to_ptr.vmem [resolvable:$false] %s6616_s27 }
 0x265   : > { %s6618_s7 = scalar_lea.vmem %s6617_s27, 256  ;;  %p6619_p9 = scmp.lt.s32.totalorder %s7491_s16, %s6617_s27 }
 0x266   : > { %p6614_p5 = pnand %p6612_p0, %p8129_p3  ;;  %p6620_p8 = scmp.lt.s32.totalorder %s6618_s7, %s6611_s12 }
 0x268   : > { %p6615_p7 = pneg %p6614_p5  ;;  %p6621_p13 = por %p6620_p8, %p6619_p9 }
 0x26a   : > { %p6622_p6 = pnand %p6621_p13, %p6615_p7 }
 0x26c   : > { %6625 = shalt.err (!%p6622_p6)
}
 0x26d   : > { %p8130_p4 = scmp.ne.s32.totalorder %s8110_s4, 0  ;;  %s8131_s29 = sld [smem:[#allocation59_spill]] }
 0x26e   : > { %s836_s24 = scalar_lea.vmem [#allocation7], %s7219_s10 }
 0x26f   : > { %5914 = dma.hbm_to_vmem [thread:$0]  (!%p8130_p4), %s7469_s2, 128, %s7491_s16, %s798_s0  }
 0x270   : > { %s843_s8 = sshll.u32 %s836_s24, 4  ;;  %s844_s8 = int_to_ptr.vmem [resolvable:$true] %s843_s8 }
 0x273   : > { %s8132_s5 = smov %s8131_s29  ;;  %s7521_s6 = scalar_lea.hbm %s8131_s29, %s4940_s20 }
 0x274   : > { %s6626_s1 = scalar_lea.hbm %s7521_s6, 16  ;;  %s6631_s16 = scalar_lea.hbm %s8132_s5, 32 }
 0x275   : > { %p6627_p12 = scmp.ne.s32.totalorder %s7521_s6, %s6626_s1  ;;  %p6632_p11 = scmp.lt.u32.totalorder %s7521_s6, %s8132_s5 }
 0x276   : > { %p6633_p1 = scmp.lt.u32.totalorder %s6631_s16, %s6626_s1  ;;  %p6635_p5 = scmp.lt.u32.totalorder %s6626_s1, %s7521_s6 }
 0x277   : > { %p6629_p2 = pnand %p6627_p12, %p8129_p3 }
 0x278   : > { %p6634_p0 = por %p6633_p1, %p6632_p11 }
 0x279   : > { %p6630_p10 = pneg %p6629_p2 }
 0x27a   : > { %p6636_p7 = por %p6635_p5, %p6634_p0 }
 0x27c   : > { %p6637_p9 = pnand %p6636_p7, %p6630_p10 }
 0x27e   : > { %6640 = shalt.err (!%p6637_p9)
}
 0x27f   : > { %s6641_s12 = scalar_lea.vmem %s844_s8, 16  ;;  %s6824_s17 = smov [#allocation7]  }
 0x280   : > { %p6642_p8 = scmp.ne.s32.totalorder %s844_s8, %s6641_s12  ;;  %s6646_s27 = sshll.u32 %s6824_s17, 4  ;;  %s6647_s27 = int_to_ptr.vmem [resolvable:$false] %s6646_s27 }
 0x281   : > { %s6648_s7 = scalar_lea.vmem %s6647_s27, 32  ;;  %p6649_p12 = scmp.lt.s32.totalorder %s844_s8, %s6647_s27 }
 0x282   : > { %p6644_p13 = pnand %p6642_p8, %p8129_p3  ;;  %p6650_p2 = scmp.lt.s32.totalorder %s6648_s7, %s6641_s12 }
 0x284   : > { %p6645_p6 = pneg %p6644_p13  ;;  %p6651_p4 = por %p6650_p2, %p6649_p12 }
 0x286   : > { %p6652_p1 = pnand %p6651_p4, %p6645_p6 }
 0x288   : > { %6655 = shalt.err (!%p6652_p1)
}
 0x289   : > { %p8133_p11 = scmp.ne.s32.totalorder %s8110_s4, 0  ;;  %s8134_s29 = sld [smem:[#allocation60_spill]] }
 0x28a   : > { %s853_s14 = scalar_lea.vmem [#allocation8], %s7219_s10  ;;  %s8136_s16 = sand.u32 1, %s6800_s30  }
 0x28b   : > { %5920 = dma.hbm_to_vmem [thread:$0]  (!%p8133_p11), %s7521_s6, 16, %s844_s8, %s7245_s9  }
 0x28c   : > { %s860_s2 = sshll.u32 %s853_s14, 4  ;;  %s851_s0 = scalar_lea.sflag [#allocation9], %s8136_s16  ;;  %s861_s2 = int_to_ptr.vmem [resolvable:$true] %s860_s2 }
 0x28f   : > { %s8135_s24 = smov %s8134_s29  ;;  %s7547_s1 = scalar_lea.hbm %s8134_s29, %s4940_s20 }
 0x290   : > { %s6656_s15 = scalar_lea.hbm %s7547_s1, 16  ;;  %s6661_s8 = scalar_lea.hbm %s8135_s24, 32 }
 0x291   : > { %p6657_p4 = scmp.ne.s32.totalorder %s7547_s1, %s6656_s15  ;;  %p6662_p5 = scmp.lt.u32.totalorder %s7547_s1, %s8135_s24 }
 0x292   : > { %p6663_p7 = scmp.lt.u32.totalorder %s6661_s8, %s6656_s15  ;;  %p6665_p8 = scmp.lt.u32.totalorder %s6656_s15, %s7547_s1 }
 0x293   : > { %p6659_p10 = pnand %p6657_p4, %p8129_p3 }
 0x294   : > { %p6664_p9 = por %p6663_p7, %p6662_p5 }
 0x295   : > { %p6660_p0 = pneg %p6659_p10 }
 0x296   : > { %p6666_p13 = por %p6665_p8, %p6664_p9 }
 0x298   : > { %p6667_p6 = pnand %p6666_p13, %p6660_p0 }
 0x29a   : > { %6670 = shalt.err (!%p6667_p6)
}
 0x29b   : > { %s6671_s10 = scalar_lea.vmem %s861_s2, 16  ;;  %s6825_s17 = smov [#allocation8]  }
 0x29c   : > { %p6672_p12 = scmp.ne.s32.totalorder %s861_s2, %s6671_s10  ;;  %s6676_s27 = sshll.u32 %s6825_s17, 4  ;;  %s6677_s27 = int_to_ptr.vmem [resolvable:$false] %s6676_s27 }
 0x29d   : > { %s6678_s7 = scalar_lea.vmem %s6677_s27, 32  ;;  %p6679_p4 = scmp.lt.s32.totalorder %s861_s2, %s6677_s27 }
 0x29e   : > { %p6674_p2 = pnand %p6672_p12, %p8129_p3  ;;  %p6680_p10 = scmp.lt.s32.totalorder %s6678_s7, %s6671_s10 }
 0x2a0   : > { %p6675_p1 = pneg %p6674_p2  ;;  %p6681_p11 = por %p6680_p10, %p6679_p4 }
 0x2a2   : > { %p6682_p5 = pnand %p6681_p11, %p6675_p1 }
 0x2a4   : > { %6685 = shalt.err (!%p6682_p5)
}
 0x2a5   : > { %p8137_p7 = scmp.ne.s32.totalorder %s8110_s4, 0  ;;  %s8138_s21 = sld [smem:[#allocation53_spill]] }
 0x2a7   : > { %5923 = dma.hbm_to_vmem [thread:$0]  (!%p8137_p7), %s7547_s1, 16, %s861_s2, %s851_s0  }
 0x2ab   : > { %p8139_p0 = scmp.ne.s32.totalorder %s8138_s21, 0 }
 0x2ac   : > { %s7572_s13 = sand.u32 (!%p8139_p0), 1, %s6792_s28   ;;  %p8140_p3 = scmp.ne.s32.totalorder (!%p8139_p0), %s8106_s25, 0 }
 0x2ad   : > { %869 = sbr.rel (%p8139_p0) target bundleno = 4753 (0x1291), region = 108  ;;  %s7575_s26 = sshll.u32 (!%p8139_p0), %s7572_s13, 3 }
 0x2ae   : > { %s872_s29 = scalar_lea.sflag (!%p8139_p0), [#allocation3], %s7572_s13  ;;  %s875_s14 = scalar_lea.vmem (!%p8139_p0), [#allocation2], %s7575_s26 }
 0x2b4   : > { %6731 = dma.done.wait (%p8140_p3), %s872_s29, 128  }
 0x2b5   : > { %6733 = vsyncadd (%p8140_p3), %s872_s29, 4294967168  ;;  %s880_s4 = sand.u32 1, %s6969_s23   ;;  %s884_s2 = scalar_lea.vmem [#allocation5], %s7575_s26 }
 0x2b6   : > { %s881_s1 = scalar_lea.sflag [#allocation6], %s880_s4 }
 0x2b7   : > { %6735 = dma.done.wait (%p8140_p3), %s881_s1, 144  }
 0x2b8   : > { %6737 = vsyncadd (%p8140_p3), %s881_s1, 4294967152  ;;  %s892_s16 = scalar_lea.vmem [#allocation7], %s7572_s13  ;;  %s898_s0 = scalar_lea.sflag [#allocation9], %s880_s4 }
 0x2b9   : > { %s900_s15 = scalar_lea.vmem [#allocation8], %s7572_s13 }
 0x2ba   : > { %6739 = dma.done.wait (%p8140_p3), %s898_s0, 16  }
 0x2bb   : > { %6741 = vsyncadd (%p8140_p3), %s898_s0, 4294967280  ;;  %p8141_p11 = scmp.eq.s32.totalorder %s6969_s23, 0 }
 0x2bd   : > { %6743 = dma.done.wait (%p8141_p11), [#allocation9], 2048   ;;  %p8142_p9 = pmov %p8141_p11 }
 0x2bf   : > { %6745 = vsyncadd (%p8142_p9), [#allocation9], 4294965248  ;;  %p8143_p8 = pmov %p8142_p9 }
 0x2c1   : > { %6747 = dma.done.wait (%p8143_p8), [#allocation12], 4096   ;;  %p8144_p13 = pmov %p8143_p8 }
 0x2c2   : > { %p8145_p6 = pmov %p8143_p8 }
 0x2c3   : > { %6749 = vsyncadd (%p8144_p13), [#allocation12], 4294963200 }
 0x2c4   : > { %6751 = dma.done.wait (%p8145_p6), [#allocation15], 2560   ;;  %p8146_p12 = pmov %p8145_p6 }
 0x2c5   : > { %p8147_p2 = pmov %p8145_p6 }
 0x2c6   : > { %6753 = vsyncadd (%p8146_p12), [#allocation15], 4294964736 }
 0x2c7   : > { %6755 = dma.done.wait (%p8147_p2), [#allocation18], 4096   ;;  %p8148_p1 = pmov %p8147_p2 }
 0x2c9   : > { %6757 = vsyncadd (%p8148_p1), [#allocation18], 4294963200  ;;  %p8149_p4 = pmov %p8148_p1 }
 0x2ca   : > { %p8150_p10 = pmov %p8148_p1 }
 0x2cb   : > { %6759 = dma.done.wait (%p8149_p4), [#allocation21], 528  }
 0x2cc   : > { %6761 = vsyncadd (%p8150_p10), [#allocation21], 4294966768  ;;  %p8151_p5 = pmov %p8148_p1 }
 0x2cd   : > { %p8152_p7 = pmov %p8148_p1 }
 0x2ce   : > { %6763 = dma.done.wait (%p8151_p5), [#allocation24], 32  }
 0x2cf   : > { %6765 = vsyncadd (%p8152_p7), [#allocation24], 4294967264  ;;  %p8153_p0 = pmov %p8148_p1 }
 0x2d1   : > { %6767 = dma.done.wait (%p8153_p0), [#allocation27], 32   ;;  %p8154_p3 = pmov %p8153_p0 }
 0x2d2   : > { %p8155_p11 = pmov %p8153_p0 }
 0x2d3   : > { %6769 = vsyncadd (%p8154_p3), [#allocation27], 4294967264 }
 0x2d4   : > { %6771 = dma.done.wait (%p8155_p11), [#allocation30], 528   ;;  %p8156_p9 = pmov %p8153_p0 }
 0x2d5   : > { %p8157_p8 = pmov %p8153_p0 }
 0x2d6   : > { %6773 = vsyncadd (%p8156_p9), [#allocation30], 4294966768 }
 0x2d7   : > { %6775 = dma.done.wait (%p8157_p8), [#allocation33], 1040   ;;  %p8158_p13 = pmov %p8153_p0 }
 0x2d8   : > { %p8159_p6 = pmov %p8153_p0 }
 0x2d9   : > { %6777 = vsyncadd (%p8158_p13), [#allocation33], 4294966256 }
 0x2da   : > { %6779 = dma.done.wait (%p8159_p6), [#allocation36], 16   ;;  %p8160_p12 = pmov %p8153_p0 }
 0x2db   : > { %v6826_v0 = vmov 0.0|0.0   ;;  %vm6827_vm0 = vmmov 0   ;;  %v6828_v1 = vmov 0.0   ;;  %v1067_v2 = vld [vmem:[#allocation10] sm:$0xff]  ;;  %v1068_v3 = vld [vmem:[#allocation10 + $0x8] sm:$0xff]  ;;  %v1069_v7 = vld [vmem:[#allocation10 + $0x10] sm:$0xff] }
 0x2dc   : > { %6781 = vsyncadd (%p8160_p12), [#allocation36], 4294967280  ;;  %5600 = vmatprep.subr.bf16.mxu1 %v6826_v0  ;;  %5612 = vmatprep.subr.bf16.mxu0 %v6826_v0  ;;  %v1075_v4 = vld [vmem:[#allocation10 + $0x40] sm:$0xff]  ;;  %v5601_v5 = vpack.c.bf16 %v1068_v3, %v1067_v2  ;;  %v1076_v6 = vld [vmem:[#allocation10 + $0x48] sm:$0xff]  ;;  %vm1119_vm1 = vcmask 261120   ;;  %vm1967_vm2 = vcmask 64512  }
 0x2dd   : > { %5212 = vmatprep.mubr.msk.f32.mxu1 %vm6827_vm0, %v6828_v1  ;;  %5234 = vmatprep.mubr.msk.f32.mxu0 %vm6827_vm0, %v6828_v1  ;;  %v1070_v8 = vld [vmem:[#allocation10 + $0x18] sm:$0xff]  ;;  %v5613_v9 = vpack.c.bf16 %v1076_v6, %v1075_v4  ;;  %v1077_v10 = vld [vmem:[#allocation10 + $0x50] sm:$0xff]  ;;  %v1071_v14 = vld [vmem:[#allocation10 + $0x20] sm:$0xff]  ;;  %s6829_s25 = smov 16   ;;  %s6830_s9 = smov 8   ;;  %vm2621_vm5 = vcmask 130048  }
 0x2de   : > { %v1078_v11 = vld [vmem:[#allocation10 + $0x58] sm:$0xff]  ;;  %5602 = vmatpush3.bf16.msra.mxu1 %v5601_v5  ;;  %v5604_v12 = vpack.c.bf16 %v1070_v8, %v1069_v7  ;;  %v1072_v15 = vld [vmem:[#allocation10 + $0x28] sm:$0xff]  ;;  %v1083_v16 = vld [vmem:[#allocation11] sm:$0xff]  ;;  %s6831_s6 = smov 24   ;;  %vm2623_vm6 = vcmask 195584   ;;  %vm4495_vm8 = vcmask 523264  }
 0x2df   : > { %5614 = vmatpush3.bf16.msra.mxu0 %v5613_v9  ;;  %5603 = vmatprep.subr.bf16.mxu1 %v6826_v0  ;;  %v5616_v13 = vpack.c.bf16 %v1078_v11, %v1077_v10  ;;  %v1084_v17 = vld [vmem:[#allocation11 + $0x8] sm:$0xff]  ;;  %v5607_v19 = vpack.c.bf16 %v1072_v15, %v1071_v14  ;;  %v1073_v21 = vld [vmem:[#allocation10 + $0x30] sm:$0xff]  ;;  %v1074_v22 = vld [vmem:[#allocation10 + $0x38] sm:$0xff]  ;;  %s5025_s8 = sshll.u32 %s6969_s23, 7  ;;  %s1045_s20 = scalar_lea.vmem [#allocation37], %s7575_s26 }
 0x2e0   : > { %5615 = vmatprep.subr.bf16.mxu0 %v6826_v0  ;;  %v7645_v18 = vld [vmem:[%s875_s14] sm:$0xff]  ;;  %v5625_v20 = vpack.c.bf16 %v1084_v17, %v1083_v16  ;;  %v1085_v23 = vld [vmem:[#allocation11 + $0x10] sm:$0xff]  ;;  %v5610_v25 = vpack.c.bf16 %v1074_v22, %v1073_v21  ;;  %s4614_s12 = sshll.u32 %s1045_s20, 4  ;;  %s8161_s27 = sld [smem:[#allocation79_spill]]  ;;  %s7952_s12 = int_to_ptr.vmem [resolvable:$true] %s4614_s12 }
 0x2e1   : > { %v1086_v24 = vld [vmem:[#allocation11 + $0x18] sm:$0xff]  ;;  %v1079_v27 = vld [vmem:[#allocation10 + $0x60] sm:$0xff]  ;;  %v1080_v28 = vld [vmem:[#allocation10 + $0x68] sm:$0xff]  ;;  %s4601_s21 = scalar_lea.sflag [#allocation4], %s7572_s13  ;;  %s6686_s29 = scalar_lea.vmem %s7952_s12, 128 }
 0x2e2   : > { %5605 = vmatpush3.bf16.msra.mxu1 %v5604_v12  ;;  %v5628_v26 = vpack.c.bf16 %v1086_v24, %v1085_v23  ;;  %v1091_v29 = vld [vmem:[#allocation11 + $0x40] sm:$0xff]  ;;  %v1092_v30 = vld [vmem:[#allocation11 + $0x48] sm:$0xff]  ;;  %v5619_v31 = vpack.c.bf16 %v1080_v28, %v1079_v27  ;;  %v1081_v33 = vld [vmem:[#allocation10 + $0x70] sm:$0xff]  ;;  %p6687_p2 = scmp.ne.s32.totalorder %s7952_s12, %s6686_s29  ;;  %p8162_p1 = scmp.ne.s32.totalorder %s8107_s22, 0 }
 0x2e3   : > { %5617 = vmatpush3.bf16.msra.mxu0 %v5616_v13  ;;  %5606 = vmatprep.subr.bf16.mxu1 %v6826_v0  ;;  %v5637_v32 = vpack.c.bf16 %v1092_v30, %v1091_v29  ;;  %v1082_v34 = vld [vmem:[#allocation10 + $0x78] sm:$0xff]  ;;  %v1093_v35 = vld [vmem:[#allocation11 + $0x50] sm:$0xff]  ;;  %v1087_v39 = vld [vmem:[#allocation11 + $0x20] sm:$0xff]  ;;  %s6832_s23 = smov [#allocation37]  }
 0x2e4   : > { %5624 = vmatprep.subr.bf16.mxu0 %v6826_v0  ;;  %v1094_v36 = vld [vmem:[#allocation11 + $0x58] sm:$0xff]  ;;  %v5622_v37 = vpack.c.bf16 %v1082_v34, %v1081_v33  ;;  %v1088_v40 = vld [vmem:[#allocation11 + $0x28] sm:$0xff]  ;;  %v1099_v41 = vld [vmem:[#allocation13] sm:$0xff]  ;;  %p6688_p4 = pnand %p6687_p2, %p8162_p1  ;;  %s6690_s26 = sshll.u32 %s6832_s23, 4  ;;  %s6691_s26 = int_to_ptr.vmem [resolvable:$false] %s6690_s26 }
 0x2e5   : > { %5213 = vmatmul.mubr.msk.f32.vlgmr.msra.gmra.mrb[0].mxu1 %vm1119_vm1, %v7645_v18  ;;  %v5640_v38 = vpack.c.bf16 %v1094_v36, %v1093_v35  ;;  %v1100_v42 = vld [vmem:[#allocation13 + $0x8] sm:$0xff]  ;;  %v5631_v43 = vpack.c.bf16 %v1088_v40, %v1087_v39  ;;  %v1089_v44 = vld [vmem:[#allocation11 + $0x30] sm:$0xff]  ;;  %v1090_v45 = vld [vmem:[#allocation11 + $0x38] sm:$0xff]  ;;  %s6692_s14 = scalar_lea.vmem %s6691_s26, 256  ;;  %p6693_p5 = scmp.lt.s32.totalorder %s7952_s12, %s6691_s26 }
 0x2e6   : > { %5608 = vmatpush3.bf16.msra.mxu1 %v5607_v19  ;;  %5235 = vmatmul.mubr.msk.f32.vlgmr.msra.gmra.mrb[0].mxu0 %vm1119_vm1, %v7645_v18  ;;  %v5649_v46 = vpack.c.bf16 %v1100_v42, %v1099_v41  ;;  %v1101_v47 = vld [vmem:[#allocation13 + $0x10] sm:$0xff]  ;;  %v1102_v48 = vld [vmem:[#allocation13 + $0x18] sm:$0xff]  ;;  %v5634_v49 = vpack.c.bf16 %v1090_v45, %v1089_v44  ;;  %v1095_v50 = vld [vmem:[#allocation11 + $0x60] sm:$0xff]  ;;  %v1048_v42 = vlaneseq  ;;  %s7950_s7 = scalar_lea.hbm %s8161_s27, %s5025_s8  ;;  %p6689_p10 = pneg %p6688_p4 }
 0x2e7   : > { %5626 = vmatpush3.bf16.msra.mxu0 %v5625_v20  ;;  %5609 = vmatprep.subr.bf16.mxu1 %v6826_v0  ;;  %v1096_v51 = vld [vmem:[#allocation11 + $0x68] sm:$0xff]  ;;  %v5652_v52 = vpack.c.bf16 %v1102_v48, %v1101_v47  ;;  %v1107_v53 = vld [vmem:[#allocation13 + $0x40] sm:$0xff]  ;;  %v1097_v56 = vld [vmem:[#allocation11 + $0x70] sm:$0xff]  ;;  %p6694_p7 = scmp.lt.s32.totalorder %s6692_s14, %s6686_s29 }
 0x2e8   : > { %5627 = vmatprep.subr.bf16.mxu0 %v6826_v0  ;;  %5223 = vmatprep.mubr.msk.f32.mxu1 %vm6827_vm0, %v6828_v1  ;;  %v1108_v54 = vld [vmem:[#allocation13 + $0x48] sm:$0xff]  ;;  %v5643_v55 = vpack.c.bf16 %v1096_v51, %v1095_v50  ;;  %v1098_v57 = vld [vmem:[#allocation11 + $0x78] sm:$0xff]  ;;  %v1109_v60 = vld [vmem:[#allocation13 + $0x50] sm:$0xff]  ;;  %v7745_v44 = vshrl.u32 %v1048_v42, 7  ;;  %v1051_v45 = vand.u32 127, %v1048_v42 }
 0x2e9   : > { %5256 = vmatprep.mubr.msk.f32.mxu0 %vm6827_vm0, %v6828_v1  ;;  %v5661_v58 = vpack.c.bf16 %v1108_v54, %v1107_v53  ;;  %v5646_v59 = vpack.c.bf16 %v1098_v57, %v1097_v56  ;;  %v1110_v61 = vld [vmem:[#allocation13 + $0x58] sm:$0xff]  ;;  %v1103_v63 = vld [vmem:[#allocation13 + $0x20] sm:$0xff]  ;;  %v1104_v2 = vld [vmem:[#allocation13 + $0x28] sm:$0xff]  ;;  %p6695_p0 = por %p6694_p7, %p6693_p5 }
 0x2ea   : > { %5611 = vmatpush3.bf16.msra.mxu1 %v5610_v25  ;;  %v5664_v62 = vpack.c.bf16 %v1110_v61, %v1109_v60  ;;  %v5655_v3 = vpack.c.bf16 %v1104_v2, %v1103_v63  ;;  %v1105_v4 = vld [vmem:[#allocation13 + $0x30] sm:$0xff]  ;;  %v1106_v5 = vld [vmem:[#allocation13 + $0x38] sm:$0xff]  ;;  %v1111_v7 = vld [vmem:[#allocation13 + $0x60] sm:$0xff]  ;;  %vm1052_vm4 = vcmp.gt.s32.totalorder %v1051_v45, %v7745_v44 }
 0x2eb   : > { %5629 = vmatpush3.bf16.msra.mxu0 %v5628_v26  ;;  %5618 = vmatprep.subr.bf16.mxu1 %v6826_v0  ;;  %v5658_v6 = vpack.c.bf16 %v1106_v5, %v1105_v4  ;;  %v1112_v8 = vld [vmem:[#allocation13 + $0x68] sm:$0xff]  ;;  %v1113_v10 = vld [vmem:[#allocation13 + $0x70] sm:$0xff]  ;;  %v1114_v11 = vld [vmem:[#allocation13 + $0x78] sm:$0xff]  ;;  %p6696_p3 = pnand %p6695_p0, %p6689_p10 }
 0x2ec   : > { %5636 = vmatprep.subr.bf16.mxu0 %v6826_v0  ;;  %v5667_v9 = vpack.c.bf16 %v1112_v8, %v1111_v7  ;;  %v5670_v12 = vpack.c.bf16 %v1114_v11, %v1113_v10  ;;  %v1116_v42 = vld [vmem:[#allocation14 + $0x8] sm:$0xff] }
 0x2ed   : > { %5224 = vmatmul.mubr.msk.f32.vlgmr.msra.gmra.mrb[2].mxu1 %vm1119_vm1, %v7645_v18 }
 0x2ee   : > { %5257 = vmatmul.mubr.msk.f32.vlgmr.msra.gmra.mrb[2].mxu0 %vm1119_vm1, %v7645_v18  ;;  %5620 = vmatpush3.bf16.msra.mxu1 %v5619_v31 }
 0x2ef   : > { %5638 = vmatpush3.bf16.msra.mxu0 %v5637_v32  ;;  %5621 = vmatprep.subr.bf16.mxu1 %v6826_v0 }
 0x2f0   : > { %5639 = vmatprep.subr.bf16.mxu0 %v6826_v0  ;;  %5245 = vmatprep.mubr.msk.f32.mxu1 %vm6827_vm0, %v6828_v1 }
 0x2f1   : > { %5278 = vmatprep.mubr.msk.f32.mxu0 %vm6827_vm0, %v6828_v1 }
 0x2f2   : > { %5623 = vmatpush3.bf16.msra.mxu1 %v5622_v37 }
 0x2f3   : > { %5641 = vmatpush3.bf16.msra.mxu0 %v5640_v38  ;;  %5630 = vmatprep.subr.bf16.mxu1 %v6826_v0 }
 0x2f4   : > { %5648 = vmatprep.subr.bf16.mxu0 %v6826_v0 }
 0x2f5   : > { %5246 = vmatmul.mubr.msk.f32.vlgmr.msra.gmra.mrb[4].mxu1 %vm1119_vm1, %v7645_v18 }
 0x2f6   : > { %5279 = vmatmul.mubr.msk.f32.vlgmr.msra.gmra.mrb[4].mxu0 %vm1119_vm1, %v7645_v18  ;;  %5632 = vmatpush3.bf16.msra.mxu1 %v5631_v43  ;;  %v1054_v43 = vld [vmem:[%s892_s16] sm:$0x1] }
 0x2f7   : > { %5633 = vmatprep.subr.bf16.mxu1 %v6826_v0  ;;  %5267 = vmatprep.mubr.msk.f32.mxu1 %vm6827_vm0, %v6828_v1  ;;  %vm1055_vm3 = vcmp.gt.f32.partialorder %v1054_v43, 0.5  ;;  %v1117_v43 = vld [vmem:[#allocation14 + $0x10] sm:$0xff] }
 0x2f8   : > { %5650 = vmatpush3.bf16.msra.mxu0 %v5649_v46  ;;  %5300 = vmatprep.mubr.msk.f32.mxu0 %vm6827_vm0, %v6828_v1  ;;  %v1060_v46 = vsub.s32 0, %v7745_v44  ;;  %v1056_v47 = vsel %vm1055_vm3, -1e+09, %v6828_v1 }
 0x2f9   : > { %5651 = vmatprep.subr.bf16.mxu0 %v6826_v0 }
 0x2fa   : > { %5635 = vmatpush3.bf16.msra.mxu1 %v5634_v49  ;;  %v1061_v48 = vrot.slane %v1056_v47, %v1060_v46  ;;  %v1053_v49 = vsel %vm1052_vm4, -1e+09, %v6828_v1  ;;  %v1118_v47 = vld [vmem:[#allocation14 + $0x18] sm:$0xff] }
 0x2fb   : > { %5642 = vmatprep.subr.bf16.mxu1 %v6826_v0 }
 0x2fc   : > { %5653 = vmatpush3.bf16.msra.mxu0 %v5652_v52  ;;  %v1063_v50 = vadd.f32 %v1061_v48, %v1053_v49 }
 0x2fd   : > { %5268 = vmatmul.mubr.msk.f32.vlgmr.msra.gmra.mrb[6].mxu1 %vm1119_vm1, %v7645_v18  ;;  %5660 = vmatprep.subr.bf16.mxu0 %v6826_v0 }
 0x2fe   : > { %5644 = vmatpush3.bf16.msra.mxu1 %v5643_v55  ;;  %5289 = vmatprep.mubr.msk.f32.mxu1 %vm6827_vm0, %v6828_v1 }
 0x2ff   : > { %5645 = vmatprep.subr.bf16.mxu1 %v6826_v0  ;;  %5301 = vmatmul.mubr.msk.f32.vlgmr.msra.gmra.mrb[6].mxu0 %vm1119_vm1, %v7645_v18 }
 0x300   : > { %5662 = vmatpush3.bf16.msra.mxu0 %v5661_v58  ;;  %5322 = vmatprep.mubr.msk.f32.mxu0 %vm6827_vm0, %v6828_v1 }
 0x301   : > { %5663 = vmatprep.subr.bf16.mxu0 %v6826_v0 }
 0x302   : > { %5647 = vmatpush3.bf16.msra.mxu1 %v5646_v59 }
 0x303   : > { %5654 = vmatprep.subr.bf16.mxu1 %v6826_v0 }
 0x304   : > { %5665 = vmatpush3.bf16.msra.mxu0 %v5664_v62 }
 0x305   : > { %5290 = vmatmul.mubr.msk.f32.vlgmr.msra.gmra.mrb[8].mxu1 %vm1119_vm1, %v7645_v18  ;;  %5336 = vmatprep.subr.mxu0 %v6828_v1 }
 0x306   : > { %5311 = vmatprep.mubr.msk.f32.mxu1 %vm6827_vm0, %v6828_v1  ;;  %5656 = vmatpush3.bf16.msra.mxu1 %v5655_v3 }
 0x307   : > { %5323 = vmatmul.mubr.msk.f32.vlgmr.msra.gmra.mrb[8].mxu0 %vm1119_vm1, %v7645_v18  ;;  %5657 = vmatprep.subr.bf16.mxu1 %v6826_v0 }
 0x308   : > { %5338 = vmatprep.mubr.msk.f32.mxu0 %vm6827_vm0, %v6828_v1 }
 0x30a   : > { %5659 = vmatpush3.bf16.msra.mxu1 %v5658_v6 }
 0x30b   : > { %5666 = vmatprep.subr.bf16.mxu1 %v6826_v0 }
 0x30d   : > { %5312 = vmatmul.mubr.msk.f32.vlgmr.msra.gmra.mrb[10].mxu1 %vm1119_vm1, %v7645_v18 }
 0x30e   : > { %5668 = vmatpush3.bf16.msra.mxu1 %v5667_v9  ;;  %5333 = vmatprep.mubr.msk.f32.mxu1 %vm6827_vm0, %v6828_v1 }
 0x30f   : > { %5669 = vmatprep.subr.bf16.mxu1 %v6826_v0 }
 0x312   : > { %5671 = vmatpush3.bf16.msra.mxu1 %v5670_v12 }
 0x313   : > { %5341 = vmatprep.subr.mxu1 %v6828_v1 }
 0x315   : > { %5334 = vmatmul.mubr.msk.f32.vlgmr.msra.gmra.mrb[12].mxu1 %vm1119_vm1, %v7645_v18 }
 0x316   : > { %5343 = vmatprep.mubr.msk.f32.mxu1 %vm6827_vm0, %v6828_v1 }
 0x3b8   : > { %v1189_v13 = vpop.f32.mrb[0].mxu1 }
 0x3b9   : > { %v5214_v14 = vpop.f32.mrb[1].mxu1  ;;  %v1329_v15 = vpop.f32.mrb[0].mxu0  ;;  %v1403_v22 = vmul.f32 0.35355338, %v1189_v13 }
 0x3ba   : > { %v5236_v16 = vpop.f32.mrb[1].mxu0  ;;  %v1405_v27 = vmul.f32 0.35355338, %v1329_v15 }
 0x3c0   : > { %v1259_v17 = vpop.f32.mrb[2].mxu1 }
 0x3c1   : > { %v1473_v19 = vpop.f32.mrb[2].mxu0  ;;  %v5225_v20 = vpop.f32.mrb[3].mxu1  ;;  %v1404_v30 = vmul.f32 0.35355338, %v1259_v17 }
 0x3c2   : > { %5337 = vmatpush3.xpose.msk.msra.mxu0 %vm1967_vm2, %v1473_v19  ;;  %v5258_v21 = vpop.f32.mrb[3].mxu0 }
 0x3c3   : > { %5346 = vmatprep.subr.mxu0 %v6828_v1 }
 0x3c5   : > { %5339 = vmatmul.mubr.msk.f32.vlgmr.msra.gmra.mrb[10].mxu0 %vm1967_vm2, %v1403_v22 }
 0x3c6   : > { %5348 = vmatprep.mubr.msk.f32.mxu0 %vm6827_vm0, %v6828_v1 }
 0x3c8   : > { %v1399_v23 = vpop.f32.mrb[4].mxu1 }
 0x3c9   : > { %v1613_v24 = vpop.f32.mrb[4].mxu0  ;;  %v5247_v25 = vpop.f32.mrb[5].mxu1  ;;  %v1406_v35 = vmul.f32 0.35355338, %v1399_v23 }
 0x3ca   : > { %5347 = vmatpush3.xpose.msk.msra.mxu0 %vm1967_vm2, %v1613_v24  ;;  %v5280_v26 = vpop.f32.mrb[5].mxu0 }
 0x3cb   : > { %5356 = vmatprep.subr.mxu0 %v6828_v1 }
 0x3cd   : > { %5349 = vmatmul.mubr.msk.f32.vlgmr.msra.gmra.mrb[12].mxu0 %vm1967_vm2, %v1405_v27 }
 0x3ce   : > { %5358 = vmatprep.mubr.msk.f32.mxu0 %vm6827_vm0, %v6828_v1 }
 0x3d0   : > { %v1543_v28 = vpop.f32.mrb[6].mxu1 }
 0x3d1   : > { %v5269_v29 = vpop.f32.mrb[7].mxu1  ;;  %5342 = vmatpush3.xpose.msk.msra.mxu1 %vm1967_vm2, %v1543_v28 }
 0x3d2   : > { %5351 = vmatprep.subr.mxu1 %v6828_v1  ;;  %v1753_v31 = vpop.f32.mrb[6].mxu0 }
 0x3d3   : > { %v5302_v32 = vpop.f32.mrb[7].mxu0  ;;  %5357 = vmatpush3.msra.mxu0 %v1753_v31 }
 0x3d4   : > { %5344 = vmatmul.mubr.msk.f32.vlgmr.msra.gmra.mrb[14].mxu1 %vm1967_vm2, %v1404_v30  ;;  %5366 = vmatprep.subr.mxu0 %v6828_v1 }
 0x3d5   : > { %5353 = vmatprep.mubr.msk.f32.mxu1 %vm6827_vm0, %v6828_v1 }
 0x3d8   : > { %v1683_v33 = vpop.f32.mrb[8].mxu1 }
 0x3d9   : > { %v5291_v34 = vpop.f32.mrb[9].mxu1  ;;  %5352 = vmatpush3.xpose.msk.msra.mxu1 %vm1967_vm2, %v1683_v33 }
 0x3da   : > { %5361 = vmatprep.subr.mxu1 %v6828_v1  ;;  %v7738_v36 = vpop.f32.mrb[8].mxu0 }
 0x3db   : > { %v5324_v37 = vpop.f32.mrb[9].mxu0 }
 0x3dc   : > { %5354 = vmatmul.mubr.msk.f32.vlgmr.msra.gmra.mrb[16].mxu1 %vm1967_vm2, %v1406_v35 }
 0x3dd   : > { %5363 = vmatprep.mubr.msk.f32.mxu1 %vm6827_vm0, %v6828_v1 }
 0x3e0   : > { %v1823_v38 = vpop.f32.mrb[10].mxu1 }
 0x3e1   : > { %v5313_v39 = vpop.f32.mrb[11].mxu1  ;;  %5362 = vmatpush3.msra.mxu1 %v1823_v38 }
 0x3e2   : > { %5371 = vmatprep.subr.mxu1 %v6828_v1 }
 0x3e8   : > { %v7741_v40 = vpop.f32.mrb[12].mxu1 }
 0x3e9   : > { %v5335_v41 = vpop.f32.mrb[13].mxu1 }
 0x3ea   : > { %v1115_v41 = vld [vmem:[#allocation14] sm:$0xff] }
 0x3eb   : > { %v5673_v45 = vpack.c.bf16 %v1116_v42, %v1115_v41  ;;  %v2745_v41 = vld [vmem:[#allocation17] sm:$0xff]  ;;  %v2746_v42 = vld [vmem:[#allocation17 + $0x8] sm:$0xff] }
 0x498   : > { %v2040_v51 = vpop.f32.mrb[10].mxu0 }
 0x499   : > { %v2041_v52 = vadd.f32 %v2040_v51, %v1063_v50  ;;  %v5340_v53 = vpop.f32.mrb[11].mxu0 }
 0x49b   : > { %v2272_v54 = vsel %vm1967_vm2, %v2041_v52, -inf }
 0x49c   : > { %2273 = vmax.xlane.f32.xlu0 %v2272_v54 }
 0x4a0   : > { %v2192_v55 = vpop.f32.mrb[12].mxu0 }
 0x4a1   : > { %v2193_v56 = vadd.f32 %v2192_v55, %v1063_v50  ;;  %v5350_v57 = vpop.f32.mrb[13].mxu0 }
 0x4a3   : > { %v2278_v58 = vsel %vm1967_vm2, %v2193_v56, -inf }
 0x4a4   : > { %2279 = vmax.xlane.f32.xlu1 %v2278_v58 }
 0x4a7   : > { %v2116_v59 = vpop.f32.mrb[14].mxu1 }
 0x4a8   : > { %v2117_v60 = vadd.f32 %v2116_v59, %v1063_v50  ;;  %v5345_v61 = vpop.f32.mrb[15].mxu1 }
 0x4aa   : > { %v2275_v62 = vsel %vm1967_vm2, %v2117_v60, -inf }
 0x4ab   : > { %2276 = vmax.xlane.f32.xlu0 %v2275_v62 }
 0x4af   : > { %v2268_v63 = vpop.f32.mrb[16].mxu1 }
 0x4b0   : > { %v2269_v2 = vadd.f32 %v2268_v63, %v1063_v50  ;;  %v5355_v3 = vpop.f32.mrb[17].mxu1 }
 0x4b2   : > { %v2281_v4 = vsel %vm1967_vm2, %v2269_v2, -inf }
 0x4b3   : > { %2282 = vmax.xlane.f32.xlu1 %v2281_v4 }
 0x529   : > { %v2274_v5 = vpop.xlane.xlu0 %2273 }
 0x52a   : > { %v2284_v6 = vsub.f32 %v2041_v52, %v2274_v5 }
 0x52c   : > { %v2288_v7 = vmul.f32 1.442695, %v2284_v6 }
 0x52e   : > { %6024 = vpow2.f32 %v2288_v7  ;;  %v2729_v7 = vld [vmem:[#allocation16] sm:$0xff] }
 0x531   : > { %v2280_v8 = vpop.xlane.xlu1 %2279 }
 0x532   : > { %v2286_v9 = vsub.f32 %v2193_v56, %v2280_v8  ;;  %v2730_v8 = vld [vmem:[#allocation16 + $0x8] sm:$0xff] }
 0x534   : > { %v2292_v10 = vmul.f32 1.442695, %v2286_v9  ;;  %v2733_v9 = vld [vmem:[#allocation16 + $0x20] sm:$0xff] }
 0x536   : > { %6026 = vpow2.f32 %v2292_v10  ;;  %v5679_v10 = vpack.c.bf16 %v2730_v8, %v2729_v7  ;;  %v2763_v8 = vld [vmem:[#allocation19 + $0x10] sm:$0xff] }
 0x538   : > { %v6025_v11 = vpop.eup %6024  ;;  %v2277_v12 = vpop.xlane.xlu0 %2276 }
 0x539   : > { %v2285_v13 = vsub.f32 %v2117_v60, %v2277_v12  ;;  %v2296_v14 = vsel %vm1967_vm2, %v6025_v11, 0.0 }
 0x53a   : > { %2297 = vadd.xlane.f32.xlu0 %v2296_v14  ;;  %v2735_v14 = vld [vmem:[#allocation16 + $0x30] sm:$0xff] }
 0x53b   : > { %v2290_v15 = vmul.f32 1.442695, %v2285_v13  ;;  %v2731_v13 = vld [vmem:[#allocation16 + $0x10] sm:$0xff] }
 0x53d   : > { %6028 = vpow2.f32 %v2290_v15 }
 0x540   : > { %v6027_v16 = vpop.eup %6026  ;;  %v2283_v17 = vpop.xlane.xlu1 %2282 }
 0x541   : > { %v2287_v19 = vsub.f32 %v2269_v2, %v2283_v17  ;;  %v2302_v20 = vsel %vm1967_vm2, %v6027_v16, 0.0 }
 0x542   : > { %2303 = vadd.xlane.f32.xlu0 %v2302_v20 }
 0x543   : > { %v2294_v21 = vmul.f32 1.442695, %v2287_v19 }
 0x545   : > { %6030 = vpow2.f32 %v2294_v21 }
 0x547   : > { %v6029_v22 = vpop.eup %6028 }
 0x548   : > { %v2299_v23 = vsel %vm1967_vm2, %v6029_v22, 0.0 }
 0x549   : > { %2300 = vadd.xlane.f32.xlu1 %v2299_v23  ;;  %v4989_v23 = vld [vmem:[#allocation22] ss:$0 sm:$0xff] }
 0x54f   : > { %v6031_v24 = vpop.eup %6030 }
 0x550   : > { %v2305_v25 = vsel %vm1967_vm2, %v6031_v24, 0.0 }
 0x551   : > { %2306 = vadd.xlane.f32.xlu1 %v2305_v25 }
 0x5c7   : > { %v2298_v26 = vpop.xlane.xlu0 %2297 }
 0x5c8   : > { %6032 = vrcp.f32 %v2298_v26  ;;  %v2738_v26 = vld [vmem:[#allocation16 + $0x48] sm:$0xff] }
 0x5cf   : > { %v2304_v27 = vpop.xlane.xlu0 %2303 }
 0x5d0   : > { %6034 = vrcp.f32 %v2304_v27  ;;  %v2741_v27 = vld [vmem:[#allocation16 + $0x60] sm:$0xff] }
 0x5d2   : > { %v6033_v28 = vpop.eup %6032 }
 0x5d3   : > { %v2312_v29 = vmul.f32 %v6033_v28, %v6025_v11  ;;  %v2734_v11 = vld [vmem:[#allocation16 + $0x28] sm:$0xff] }
 0x5d4   : > { %v5685_v12 = vpack.c.bf16 %v2734_v11, %v2733_v9  ;;  %v2742_v28 = vld [vmem:[#allocation16 + $0x68] sm:$0xff]  ;;  %v2764_v9 = vld [vmem:[#allocation19 + $0x18] sm:$0xff]  ;;  %v2765_v11 = vld [vmem:[#allocation19 + $0x20] sm:$0xff] }
 0x5d5   : > { %5359 = vmatmul.mubr.msk.f32.vlgmr.msra.gmra.mrb[14].mxu0 %vm1967_vm2, %v2312_v29  ;;  %v4990_v29 = vld [vmem:[#allocation23] ss:$0 sm:$0xff] }
 0x5d6   : > { %5367 = vmatpush3.msra.mxu0 %v7738_v36  ;;  %v2301_v30 = vpop.xlane.xlu1 %2300  ;;  %5368 = vmatprep.mubr.msk.f32.mxu0 %vm6827_vm0, %v6828_v1 }
 0x5d7   : > { %6036 = vrcp.f32 %v2301_v30  ;;  %5672 = vmatprep.subr.bf16.mxu0 %v6826_v0 }
 0x5da   : > { %v6035_v31 = vpop.eup %6034 }
 0x5db   : > { %v2314_v32 = vmul.f32 %v6035_v31, %v6027_v16  ;;  %v2736_v16 = vld [vmem:[#allocation16 + $0x38] sm:$0xff] }
 0x5dc   : > { %v5688_v17 = vpack.c.bf16 %v2736_v16, %v2735_v14  ;;  %v2770_v14 = vld [vmem:[#allocation19 + $0x48] sm:$0xff]  ;;  %v2767_v16 = vld [vmem:[#allocation19 + $0x30] sm:$0xff] }
 0x5dd   : > { %5369 = vmatmul.mubr.msk.f32.vlgmr.msra.gmra.mrb[16].mxu0 %vm1967_vm2, %v2314_v32  ;;  %v5697_v32 = vpack.c.bf16 %v2742_v28, %v2741_v27  ;;  %v2776_v27 = vld [vmem:[#allocation19 + $0x78] sm:$0xff] }
 0x5de   : > { %v2307_v33 = vpop.xlane.xlu1 %2306  ;;  %5384 = vmatprep.mubr.msk.f32.mxu0 %vm6827_vm0, %v6828_v1  ;;  %5674 = vmatpush3.bf16.msra.mxu0 %v5673_v45  ;;  %v2750_v45 = vld [vmem:[#allocation17 + $0x28] sm:$0xff] }
 0x5df   : > { %6038 = vrcp.f32 %v2307_v33  ;;  %5675 = vmatprep.subr.bf16.mxu0 %v6826_v0  ;;  %v2739_v33 = vld [vmem:[#allocation16 + $0x50] sm:$0xff] }
 0x5e1   : > { %v6037_v34 = vpop.eup %6036 }
 0x5e2   : > { %v2313_v35 = vmul.f32 %v6037_v34, %v6029_v22 }
 0x5e4   : > { %5364 = vmatmul.mubr.msk.f32.vlgmr.msra.gmra.mrb[18].mxu1 %vm1967_vm2, %v2313_v35  ;;  %v2740_v35 = vld [vmem:[#allocation16 + $0x58] sm:$0xff] }
 0x5e5   : > { %5372 = vmatpush3.msra.mxu1 %v7741_v40  ;;  %5373 = vmatprep.mubr.msk.f32.mxu1 %vm6827_vm0, %v6828_v1  ;;  %v5676_v40 = vpack.c.bf16 %v1118_v47, %v1117_v43  ;;  %v2749_v43 = vld [vmem:[#allocation17 + $0x20] sm:$0xff]  ;;  %v5703_v47 = vpack.c.bf16 %v2746_v42, %v2745_v41 }
 0x5e6   : > { %5678 = vmatprep.subr.bf16.mxu1 %v6826_v0 }
 0x5e7   : > { %5677 = vmatpush3.bf16.msra.mxu0 %v5676_v40  ;;  %v5709_v40 = vpack.c.bf16 %v2750_v45, %v2749_v43 }
 0x5e8   : > { %5684 = vmatprep.subr.bf16.mxu0 %v6826_v0 }
 0x5e9   : > { %v6039_v36 = vpop.eup %6038 }
 0x5ea   : > { %v2315_v37 = vmul.f32 %v6039_v36, %v6031_v24  ;;  %v2737_v24 = vld [vmem:[#allocation16 + $0x40] sm:$0xff]  ;;  %v2743_v36 = vld [vmem:[#allocation16 + $0x70] sm:$0xff] }
 0x5eb   : > { %v5691_v31 = vpack.c.bf16 %v2738_v26, %v2737_v24  ;;  %v2774_v24 = vld [vmem:[#allocation19 + $0x68] sm:$0xff]  ;;  %v2775_v26 = vld [vmem:[#allocation19 + $0x70] sm:$0xff] }
 0x5ec   : > { %5374 = vmatmul.mubr.msk.f32.vlgmr.msra.gmra.mrb[20].mxu1 %vm1967_vm2, %v2315_v37  ;;  %v2744_v37 = vld [vmem:[#allocation16 + $0x78] sm:$0xff]  ;;  %v5748_v28 = vpack.c.bf16 %v2776_v27, %v2775_v26 }
 0x5ed   : > { %5395 = vmatprep.mubr.msk.f32.mxu1 %vm6827_vm0, %v6828_v1  ;;  %5680 = vmatpush3.bf16.msra.mxu1 %v5679_v10  ;;  %v5730_v10 = vpack.c.bf16 %v2764_v9, %v2763_v8 }
 0x5ee   : > { %5681 = vmatprep.subr.bf16.mxu1 %v6826_v0 }
 0x6a8   : > { %v2385_v38 = vpop.f32.mrb[14].mxu0 }
 0x6a9   : > { %v5360_v39 = vpop.f32.mrb[15].mxu0 }
 0x6aa   : > { %v5700_v39 = vpack.c.bf16 %v2744_v37, %v2743_v36 }
 0x6b0   : > { %v2531_v48 = vpop.f32.mrb[16].mxu0 }
 0x6b1   : > { %v5370_v49 = vpop.f32.mrb[17].mxu0  ;;  %2613 = vrot.lane.b32.xlu1 %v2531_v48, %s6829_s25  ;;  %v2747_v48 = vld [vmem:[#allocation17 + $0x10] sm:$0xff] }
 0x6b2   : > { %v2748_v49 = vld [vmem:[#allocation17 + $0x18] sm:$0xff] }
 0x6b7   : > { %v2458_v50 = vpop.f32.mrb[18].mxu1 }
 0x6b8   : > { %2609 = vrot.lane.b32.xlu0 %v2458_v50, %s6830_s9  ;;  %v5365_v51 = vpop.f32.mrb[19].mxu1  ;;  %v2751_v50 = vld [vmem:[#allocation17 + $0x30] sm:$0xff] }
 0x6b9   : > { %v2752_v51 = vld [vmem:[#allocation17 + $0x38] sm:$0xff] }
 0x6bf   : > { %v2604_v52 = vpop.f32.mrb[20].mxu1 }
 0x6c0   : > { %2617 = vrot.lane.b32.xlu1 %v2604_v52, %s6831_s6  ;;  %v5375_v53 = vpop.f32.mrb[21].mxu1  ;;  %v5706_v52 = vpack.c.bf16 %v2748_v49, %v2747_v48 }
 0x6c1   : > { %v5712_v53 = vpack.c.bf16 %v2752_v51, %v2751_v50 }
 0x723   : > { %v2614_v55 = vpop.permute.xlu1 %2613 }
 0x72a   : > { %v2610_v54 = vpop.permute.xlu0 %2609 }
 0x72b   : > { %v2620_v56 = vsel %vm1967_vm2, %v2385_v38, %v2610_v54  ;;  %v5694_v38 = vpack.c.bf16 %v2740_v35, %v2739_v33  ;;  %v2753_v54 = vld [vmem:[#allocation17 + $0x40] sm:$0xff] }
 0x72c   : > { %v2622_v57 = vsel %vm2621_vm5, %v2620_v56, %v2614_v55  ;;  %v2754_v55 = vld [vmem:[#allocation17 + $0x48] sm:$0xff]  ;;  %v2757_v56 = vld [vmem:[#allocation17 + $0x60] sm:$0xff] }
 0x732   : > { %v2618_v58 = vpop.permute.xlu1 %2617 }
 0x733   : > { %v2624_v59 = vsel %vm2623_vm6, %v2622_v57, %v2618_v58  ;;  %v2758_v57 = vld [vmem:[#allocation17 + $0x68] sm:$0xff] }
 0x734   : > { %5385 = vmatmul.mubr.msk.f32.vlgmr.msra.gmra.mrb[18].mxu0 %vm1119_vm1, %v2624_v59  ;;  %v7821_v58 = vld [vmem:[%s884_s2] sm:$0xff]  ;;  %v5715_v59 = vpack.c.bf16 %v2754_v55, %v2753_v54 }
 0x735   : > { %5406 = vmatprep.mubr.msk.f32.mxu0 %vm6827_vm0, %v6828_v1  ;;  %5686 = vmatpush3.bf16.msra.mxu0 %v5685_v12  ;;  %v2766_v12 = vld [vmem:[#allocation19 + $0x28] sm:$0xff] }
 0x736   : > { %5687 = vmatprep.subr.bf16.mxu0 %v6826_v0 }
 0x739   : > { %5689 = vmatpush3.bf16.msra.mxu0 %v5688_v17  ;;  %v2768_v17 = vld [vmem:[#allocation19 + $0x38] sm:$0xff] }
 0x73a   : > { %5696 = vmatprep.subr.bf16.mxu0 %v6826_v0 }
 0x807   : > { %v2694_v60 = vpop.f32.mrb[18].mxu0 }
 0x808   : > { %v2698_v61 = vadd.f32 %v2694_v60, %v7645_v18  ;;  %v5386_v62 = vpop.f32.mrb[19].mxu0  ;;  %v2732_v18 = vld [vmem:[#allocation16 + $0x18] sm:$0xff]  ;;  %v5721_v60 = vpack.c.bf16 %v2758_v57, %v2757_v56 }
 0x809   : > { %v5682_v15 = vpack.c.bf16 %v2732_v18, %v2731_v13  ;;  %v2756_v62 = vld [vmem:[#allocation17 + $0x58] sm:$0xff]  ;;  %v2769_v13 = vld [vmem:[#allocation19 + $0x40] sm:$0xff]  ;;  %v5733_v18 = vpack.c.bf16 %v2766_v12, %v2765_v11 }
 0x80a   : > { %v2701_v63 = vsel %vm1119_vm1, %v2698_v61, 0.0 }
 0x80b   : > { %2702 = vadd.xlane.f32.xlu1 %v2701_v63  ;;  %5683 = vmatpush3.bf16.msra.mxu1 %v5682_v15  ;;  %v2759_v63 = vld [vmem:[#allocation17 + $0x70] sm:$0xff]  ;;  %v5739_v15 = vpack.c.bf16 %v2770_v14, %v2769_v13 }
 0x80c   : > { %5690 = vmatprep.subr.bf16.mxu1 %v6826_v0 }
 0x898   : > { %v2703_v2 = vpop.xlane.xlu1 %2702 }
 0x899   : > { %v2705_v3 = vmul.f32 0.03125, %v2703_v2  ;;  %v2760_v2 = vld [vmem:[#allocation17 + $0x78] sm:$0xff] }
 0x89b   : > { %v2706_v4 = vsub.f32 %v2698_v61, %v2705_v3  ;;  %v2755_v61 = vld [vmem:[#allocation17 + $0x50] sm:$0xff] }
 0x89c   : > { %v5718_v3 = vpack.c.bf16 %v2756_v62, %v2755_v61 }
 0x89d   : > { %v2707_v5 = vmul.f32 %v2706_v4, %v2706_v4 }
 0x89f   : > { %v2708_v6 = vsel %vm1119_vm1, %v2707_v5, 0.0  ;;  %v2761_v5 = vld [vmem:[#allocation19] sm:$0xff] }
 0x8a0   : > { %2709 = vadd.xlane.f32.xlu0 %v2708_v6  ;;  %v2762_v6 = vld [vmem:[#allocation19 + $0x8] sm:$0xff] }
 0x8a1   : > { %v5727_v7 = vpack.c.bf16 %v2762_v6, %v2761_v5 }
 0x92d   : > { %v2710_v19 = vpop.xlane.xlu0 %2709 }
 0x92e   : > { %v2711_v20 = vmul.f32 0.03125, %v2710_v19  ;;  %v2771_v19 = vld [vmem:[#allocation19 + $0x50] sm:$0xff] }
 0x930   : > { %v2712_v21 = vadd.f32 1e-05, %v2711_v20  ;;  %v5736_v20 = vpack.c.bf16 %v2768_v17, %v2767_v16 }
 0x932   : > { %6040 = vrsqrt.f32 %v2712_v21  ;;  %v2772_v21 = vld [vmem:[#allocation19 + $0x58] sm:$0xff] }
 0x93c   : > { %v6041_v22 = vpop.eup %6040 }
 0x93d   : > { %v2714_v25 = vmul.f32 %v6041_v22, %v2706_v4  ;;  %v5724_v4 = vpack.c.bf16 %v2760_v2, %v2759_v63  ;;  %v5742_v22 = vpack.c.bf16 %v2772_v21, %v2771_v19 }
 0x93f   : > { %v2721_v30 = vmul.f32 %v4989_v23, %v2714_v25  ;;  %v2773_v23 = vld [vmem:[#allocation19 + $0x60] sm:$0xff] }
 0x940   : > { %v5745_v25 = vpack.c.bf16 %v2774_v24, %v2773_v23 }
 0x941   : > { %v7795_v34 = vadd.f32 %v4990_v29, %v2721_v30 }
 0x943   : > { %5396 = vmatmul.mubr.msk.f32.vlgmr.msra.gmra.mrb[22].mxu1 %vm1119_vm1, %v7795_v34  ;;  %5407 = vmatmul.mubr.msk.f32.vlgmr.msra.gmra.mrb[20].mxu0 %vm1119_vm1, %v7795_v34 }
 0x944   : > { %5692 = vmatpush3.bf16.msra.mxu1 %v5691_v31  ;;  %5698 = vmatpush3.bf16.msra.mxu0 %v5697_v32 }
 0x945   : > { %5693 = vmatprep.subr.bf16.mxu1 %v6826_v0  ;;  %5699 = vmatprep.subr.bf16.mxu0 %v6826_v0 }
 0x946   : > { %5417 = vmatprep.mubr.msk.f32.mxu1 %vm6827_vm0, %v6828_v1  ;;  %5428 = vmatprep.mubr.msk.f32.mxu0 %vm6827_vm0, %v6828_v1 }
 0x948   : > { %5695 = vmatpush3.bf16.msra.mxu1 %v5694_v38  ;;  %5701 = vmatpush3.bf16.msra.mxu0 %v5700_v39 }
 0x949   : > { %5702 = vmatprep.subr.bf16.mxu1 %v6826_v0  ;;  %5708 = vmatprep.subr.bf16.mxu0 %v6826_v0 }
 0x94b   : > { %5418 = vmatmul.mubr.msk.f32.vlgmr.msra.gmra.mrb[24].mxu1 %vm1119_vm1, %v7795_v34  ;;  %5429 = vmatmul.mubr.msk.f32.vlgmr.msra.gmra.mrb[22].mxu0 %vm1119_vm1, %v7795_v34 }
 0x94c   : > { %5704 = vmatpush3.bf16.msra.mxu1 %v5703_v47  ;;  %5710 = vmatpush3.bf16.msra.mxu0 %v5709_v40 }
 0x94d   : > { %5705 = vmatprep.subr.bf16.mxu1 %v6826_v0  ;;  %5711 = vmatprep.subr.bf16.mxu0 %v6826_v0 }
 0x94e   : > { %5439 = vmatprep.mubr.msk.f32.mxu1 %vm6827_vm0, %v6828_v1  ;;  %5450 = vmatprep.mubr.msk.f32.mxu0 %vm6827_vm0, %v6828_v1 }
 0x950   : > { %5707 = vmatpush3.bf16.msra.mxu1 %v5706_v52  ;;  %5713 = vmatpush3.bf16.msra.mxu0 %v5712_v53 }
 0x951   : > { %5714 = vmatprep.subr.bf16.mxu1 %v6826_v0  ;;  %5720 = vmatprep.subr.bf16.mxu0 %v6826_v0 }
 0x953   : > { %5440 = vmatmul.mubr.msk.f32.vlgmr.msra.gmra.mrb[26].mxu1 %vm1119_vm1, %v7821_v58  ;;  %5451 = vmatmul.mubr.msk.f32.vlgmr.msra.gmra.mrb[24].mxu0 %vm1119_vm1, %v7821_v58 }
 0x954   : > { %5716 = vmatpush3.bf16.msra.mxu1 %v5715_v59  ;;  %5722 = vmatpush3.bf16.msra.mxu0 %v5721_v60  ;;  %v1064_v60 = vld [vmem:[%s900_s15] sm:$0x1] }
 0x955   : > { %5717 = vmatprep.subr.bf16.mxu1 %v6826_v0  ;;  %5723 = vmatprep.subr.bf16.mxu0 %v6826_v0  ;;  %vm1065_vm7 = vcmp.gt.f32.partialorder %v1064_v60, 0.5 }
 0x956   : > { %5461 = vmatprep.mubr.msk.f32.mxu1 %vm6827_vm0, %v6828_v1  ;;  %5472 = vmatprep.mubr.msk.f32.mxu0 %vm6827_vm0, %v6828_v1  ;;  %v1066_v61 = vsel %vm1065_vm7, -1e+09, %v6828_v1 }
 0x957   : > { %v3635_v62 = vrot.slane %v1066_v61, %v1060_v46 }
 0x958   : > { %5719 = vmatpush3.bf16.msra.mxu1 %v5718_v3  ;;  %5725 = vmatpush3.bf16.msra.mxu0 %v5724_v4 }
 0x959   : > { %5726 = vmatprep.subr.bf16.mxu1 %v6826_v0  ;;  %5732 = vmatprep.subr.bf16.mxu0 %v6826_v0 }
 0x95b   : > { %5462 = vmatmul.mubr.msk.f32.vlgmr.msra.gmra.mrb[28].mxu1 %vm1119_vm1, %v7821_v58  ;;  %5473 = vmatmul.mubr.msk.f32.vlgmr.msra.gmra.mrb[26].mxu0 %vm1119_vm1, %v7821_v58 }
 0x95c   : > { %5728 = vmatpush3.bf16.msra.mxu1 %v5727_v7  ;;  %5483 = vmatprep.mubr.msk.f32.mxu1 %vm6827_vm0, %v6828_v1 }
 0x95d   : > { %5729 = vmatprep.subr.bf16.mxu1 %v6826_v0  ;;  %5494 = vmatprep.mubr.msk.f32.mxu0 %vm6827_vm0, %v6828_v1 }
 0x95e   : > { %5734 = vmatpush3.bf16.msra.mxu0 %v5733_v18 }
 0x95f   : > { %5735 = vmatprep.subr.bf16.mxu0 %v6826_v0 }
 0x960   : > { %5731 = vmatpush3.bf16.msra.mxu1 %v5730_v10 }
 0x961   : > { %5738 = vmatprep.subr.bf16.mxu1 %v6826_v0 }
 0x962   : > { %5737 = vmatpush3.bf16.msra.mxu0 %v5736_v20 }
 0x963   : > { %5484 = vmatmul.mubr.msk.f32.vlgmr.msra.gmra.mrb[30].mxu1 %vm1119_vm1, %v7821_v58  ;;  %5744 = vmatprep.subr.bf16.mxu0 %v6826_v0 }
 0x964   : > { %5505 = vmatprep.mubr.msk.f32.mxu1 %vm6827_vm0, %v6828_v1  ;;  %5740 = vmatpush3.bf16.msra.mxu1 %v5739_v15 }
 0x965   : > { %5741 = vmatprep.subr.bf16.mxu1 %v6826_v0  ;;  %5495 = vmatmul.mubr.msk.f32.vlgmr.msra.gmra.mrb[28].mxu0 %vm1119_vm1, %v7821_v58 }
 0x966   : > { %5746 = vmatpush3.bf16.msra.mxu0 %v5745_v25  ;;  %5516 = vmatprep.mubr.msk.f32.mxu0 %vm6827_vm0, %v6828_v1 }
 0x967   : > { %5747 = vmatprep.subr.bf16.mxu0 %v6826_v0 }
 0x968   : > { %5743 = vmatpush3.bf16.msra.mxu1 %v5742_v22 }
 0x969   : > { %5519 = vmatprep.subr.mxu1 %v6828_v1 }
 0x96a   : > { %5749 = vmatpush3.bf16.msra.mxu0 %v5748_v28 }
 0x96b   : > { %5506 = vmatmul.mubr.msk.f32.vlgmr.msra.gmra.mrb[32].mxu1 %vm1119_vm1, %v7821_v58  ;;  %5529 = vmatprep.subr.mxu0 %v6828_v1 }
 0x96c   : > { %5521 = vmatprep.mubr.msk.f32.mxu1 %vm6827_vm0, %v6828_v1 }
 0x96d   : > { %5517 = vmatmul.mubr.msk.f32.vlgmr.msra.gmra.mrb[30].mxu0 %vm1119_vm1, %v7821_v58 }
 0x96e   : > { %5531 = vmatprep.mubr.msk.f32.mxu0 %vm6827_vm0, %v6828_v1 }
 0xa16   : > { %v2850_v29 = vpop.f32.mrb[22].mxu1  ;;  %v2920_v30 = vpop.f32.mrb[20].mxu0 }
 0xa17   : > { %v5397_v31 = vpop.f32.mrb[23].mxu1  ;;  %v5408_v32 = vpop.f32.mrb[21].mxu0  ;;  %v3064_v43 = vmul.f32 0.35355338, %v2850_v29  ;;  %v3065_v45 = vmul.f32 0.35355338, %v2920_v30 }
 0xa1e   : > { %v2990_v33 = vpop.f32.mrb[24].mxu1  ;;  %v3060_v35 = vpop.f32.mrb[22].mxu0 }
 0xa1f   : > { %v5419_v36 = vpop.f32.mrb[25].mxu1  ;;  %v5430_v37 = vpop.f32.mrb[23].mxu0  ;;  %v3066_v50 = vmul.f32 0.35355338, %v2990_v33  ;;  %v3067_v51 = vmul.f32 0.35355338, %v3060_v35 }
 0xa26   : > { %v3137_v38 = vpop.f32.mrb[26].mxu1  ;;  %v3207_v39 = vpop.f32.mrb[24].mxu0 }
 0xa27   : > { %v5441_v41 = vpop.f32.mrb[27].mxu1  ;;  %5520 = vmatpush3.xpose.msk.msra.mxu1 %vm1967_vm2, %v3137_v38  ;;  %v5452_v42 = vpop.f32.mrb[25].mxu0 }
 0xa28   : > { %5524 = vmatprep.subr.mxu1 %v6828_v1 }
 0xa2a   : > { %5522 = vmatmul.mubr.msk.f32.vlgmr.msra.gmra.mrb[34].mxu1 %vm1967_vm2, %v3064_v43 }
 0xa2b   : > { %5525 = vmatpush3.xpose.msk.msra.mxu1 %vm1967_vm2, %v3207_v39  ;;  %5526 = vmatprep.mubr.msk.f32.mxu1 %vm6827_vm0, %v6828_v1 }
 0xa2c   : > { %5534 = vmatprep.subr.mxu1 %v6828_v1 }
 0xa2e   : > { %v3277_v47 = vpop.f32.mrb[28].mxu1  ;;  %v3347_v40 = vpop.f32.mrb[26].mxu0  ;;  %5527 = vmatmul.mubr.msk.f32.vlgmr.msra.gmra.mrb[36].mxu1 %vm1967_vm2, %v3065_v45 }
 0xa2f   : > { %v5463_v48 = vpop.f32.mrb[29].mxu1  ;;  %v5474_v49 = vpop.f32.mrb[27].mxu0  ;;  %5530 = vmatpush3.xpose.msk.msra.mxu0 %vm1967_vm2, %v3277_v47  ;;  %5535 = vmatpush3.xpose.msk.msra.mxu1 %vm1967_vm2, %v3347_v40 }
 0xa30   : > { %5536 = vmatprep.mubr.msk.f32.mxu1 %vm6827_vm0, %v6828_v1  ;;  %5539 = vmatprep.subr.mxu0 %v6828_v1 }
 0xa31   : > { %5544 = vmatprep.subr.mxu1 %v6828_v1 }
 0xa32   : > { %5532 = vmatmul.mubr.msk.f32.vlgmr.msra.gmra.mrb[32].mxu0 %vm1967_vm2, %v3066_v50  ;;  %5537 = vmatmul.mubr.msk.f32.vlgmr.msra.gmra.mrb[38].mxu1 %vm1967_vm2, %v3067_v51  ;;  %v2777_v50 = vld [vmem:[#allocation20] sm:$0xff]  ;;  %v2778_v51 = vld [vmem:[#allocation20 + $0x8] sm:$0xff] }
 0xa33   : > { %5541 = vmatprep.mubr.msk.f32.mxu0 %vm6827_vm0, %v6828_v1  ;;  %5546 = vmatprep.mubr.msk.f32.mxu1 %vm6827_vm0, %v6828_v1 }
 0xa36   : > { %v3417_v52 = vpop.f32.mrb[30].mxu1 }
 0xa37   : > { %v5485_v53 = vpop.f32.mrb[31].mxu1  ;;  %5540 = vmatpush3.msra.mxu0 %v3417_v52  ;;  %v5751_v52 = vpack.c.bf16 %v2778_v51, %v2777_v50 }
 0xa38   : > { %5549 = vmatprep.subr.mxu0 %v6828_v1  ;;  %v3487_v54 = vpop.f32.mrb[28].mxu0  ;;  %v2779_v53 = vld [vmem:[#allocation20 + $0x10] sm:$0xff] }
 0xa39   : > { %v5496_v55 = vpop.f32.mrb[29].mxu0  ;;  %5545 = vmatpush3.msra.mxu1 %v3487_v54  ;;  %v2780_v54 = vld [vmem:[#allocation20 + $0x18] sm:$0xff] }
 0xa3a   : > { %5554 = vmatprep.subr.mxu1 %v6828_v1  ;;  %v5754_v55 = vpack.c.bf16 %v2780_v54, %v2779_v53 }
 0xa3e   : > { %v7890_v56 = vpop.f32.mrb[32].mxu1 }
 0xa3f   : > { %v5507_v57 = vpop.f32.mrb[33].mxu1 }
 0xa40   : > { %v7893_v58 = vpop.f32.mrb[30].mxu0 }
 0xa41   : > { %v5518_v59 = vpop.f32.mrb[31].mxu0 }
 0xafd   : > { %v3709_v63 = vpop.f32.mrb[34].mxu1 }
 0xafe   : > { %v3710_v2 = vadd.f32 %v3709_v63, %v3635_v62  ;;  %v5523_v3 = vpop.f32.mrb[35].mxu1 }
 0xb00   : > { %v3941_v4 = vsel %vm1967_vm2, %v3710_v2, -inf }
 0xb01   : > { %3942 = vmax.xlane.f32.xlu0 %v3941_v4  ;;  %v3785_v5 = vpop.f32.mrb[36].mxu1 }
 0xb02   : > { %v3786_v6 = vadd.f32 %v3785_v5, %v3635_v62  ;;  %v5528_v7 = vpop.f32.mrb[37].mxu1 }
 0xb04   : > { %v3944_v8 = vsel %vm1967_vm2, %v3786_v6, -inf }
 0xb05   : > { %v3861_v9 = vpop.f32.mrb[32].mxu0  ;;  %3945 = vmax.xlane.f32.xlu0 %v3944_v8  ;;  %v3937_v10 = vpop.f32.mrb[38].mxu1 }
 0xb06   : > { %v3862_v11 = vadd.f32 %v3861_v9, %v3635_v62  ;;  %v3938_v12 = vadd.f32 %v3937_v10, %v3635_v62  ;;  %v5533_v13 = vpop.f32.mrb[33].mxu0  ;;  %v5538_v18 = vpop.f32.mrb[39].mxu1 }
 0xb08   : > { %v3947_v44 = vsel %vm1967_vm2, %v3862_v11, -inf  ;;  %v3950_v46 = vsel %vm1967_vm2, %v3938_v12, -inf }
 0xb09   : > { %3948 = vmax.xlane.f32.xlu1 %v3947_v44  ;;  %3951 = vmax.xlane.f32.xlu0 %v3950_v46 }
 0xb8e   : > { %v3943_v14 = vpop.xlane.xlu0 %3942 }
 0xb8f   : > { %v3953_v15 = vsub.f32 %v3710_v2, %v3943_v14  ;;  %v4395_v14 = vld [vmem:[#allocation31] sm:$0xff] }
 0xb91   : > { %v3957_v16 = vmul.f32 1.442695, %v3953_v15  ;;  %v4396_v15 = vld [vmem:[#allocation31 + $0x8] sm:$0xff] }
 0xb92   : > { %v3946_v17 = vpop.xlane.xlu0 %3945 }
 0xb93   : > { %6042 = vpow2.f32 %v3957_v16  ;;  %v3954_v19 = vsub.f32 %v3786_v6, %v3946_v17  ;;  %v5757_v16 = vpack.c.bf16 %v4396_v15, %v4395_v14  ;;  %v4397_v17 = vld [vmem:[#allocation31 + $0x10] sm:$0xff] }
 0xb95   : > { %v3959_v20 = vmul.f32 1.442695, %v3954_v19  ;;  %v4480_v19 = vld [vmem:[#allocation34] sm:$0xff] }
 0xb96   : > { %v3949_v21 = vpop.xlane.xlu1 %3948  ;;  %v3952_v22 = vpop.xlane.xlu0 %3951 }
 0xb97   : > { %6044 = vpow2.f32 %v3959_v20  ;;  %v3955_v23 = vsub.f32 %v3862_v11, %v3949_v21  ;;  %v3956_v24 = vsub.f32 %v3938_v12, %v3952_v22  ;;  %v4481_v20 = vld [vmem:[#allocation34 + $0x8] sm:$0xff]  ;;  %v4482_v21 = vld [vmem:[#allocation34 + $0x10] sm:$0xff] }
 0xb98   : > { %v5763_v22 = vpack.c.bf16 %v4481_v20, %v4480_v19 }
 0xb99   : > { %v3961_v25 = vmul.f32 1.442695, %v3955_v23  ;;  %v3963_v26 = vmul.f32 1.442695, %v3956_v24  ;;  %v4483_v23 = vld [vmem:[#allocation34 + $0x18] sm:$0xff] }
 0xb9a   : > { %v5766_v24 = vpack.c.bf16 %v4483_v23, %v4482_v21 }
 0xb9b   : > { %6046 = vpow2.f32 %v3961_v25  ;;  %v4484_v25 = vld [vmem:[#allocation34 + $0x20] sm:$0xff] }
 0xb9c   : > { %6048 = vpow2.f32 %v3963_v26  ;;  %v4485_v26 = vld [vmem:[#allocation34 + $0x28] sm:$0xff] }
 0xb9d   : > { %v6043_v27 = vpop.eup %6042 }
 0xb9e   : > { %v3965_v28 = vsel %vm1967_vm2, %v6043_v27, 0.0 }
 0xb9f   : > { %3966 = vadd.xlane.f32.xlu1 %v3965_v28 }
 0xba1   : > { %v6045_v29 = vpop.eup %6044 }
 0xba2   : > { %v3968_v30 = vsel %vm1967_vm2, %v6045_v29, 0.0 }
 0xba3   : > { %3969 = vadd.xlane.f32.xlu0 %v3968_v30 }
 0xba5   : > { %v6047_v31 = vpop.eup %6046 }
 0xba6   : > { %v6049_v32 = vpop.eup %6048  ;;  %v3971_v33 = vsel %vm1967_vm2, %v6047_v31, 0.0 }
 0xba7   : > { %3972 = vadd.xlane.f32.xlu1 %v3971_v33  ;;  %v3974_v35 = vsel %vm1967_vm2, %v6049_v32, 0.0 }
 0xba8   : > { %3975 = vadd.xlane.f32.xlu0 %v3974_v35  ;;  %v5017_v35 = vld [vmem:[#allocation26] ss:$0 sm:$0xff] }
 0xc2c   : > { %v3967_v36 = vpop.xlane.xlu1 %3966 }
 0xc2d   : > { %6050 = vrcp.f32 %v3967_v36 }
 0xc30   : > { %v3970_v37 = vpop.xlane.xlu0 %3969 }
 0xc31   : > { %6052 = vrcp.f32 %v3970_v37 }
 0xc34   : > { %v3973_v38 = vpop.xlane.xlu1 %3972 }
 0xc35   : > { %6054 = vrcp.f32 %v3973_v38  ;;  %v3976_v39 = vpop.xlane.xlu0 %3975  ;;  %v4486_v38 = vld [vmem:[#allocation34 + $0x30] sm:$0xff] }
 0xc36   : > { %6056 = vrcp.f32 %v3976_v39  ;;  %v4487_v39 = vld [vmem:[#allocation34 + $0x38] sm:$0xff] }
 0xc37   : > { %v6051_v41 = vpop.eup %6050 }
 0xc38   : > { %v3981_v42 = vmul.f32 %v6051_v41, %v6043_v27  ;;  %v5769_v27 = vpack.c.bf16 %v4485_v26, %v4484_v25  ;;  %v5772_v41 = vpack.c.bf16 %v4487_v39, %v4486_v38 }
 0xc3a   : > { %5542 = vmatmul.mubr.msk.f32.vlgmr.msra.gmra.mrb[34].mxu0 %vm1967_vm2, %v3981_v42  ;;  %v5018_v42 = vld [vmem:[#allocation32] ss:$0 sm:$0xff] }
 0xc3b   : > { %v6053_v43 = vpop.eup %6052  ;;  %5550 = vmatpush3.msra.mxu0 %v7890_v56  ;;  %5551 = vmatprep.mubr.msk.f32.mxu0 %vm6827_vm0, %v6828_v1 }
 0xc3c   : > { %v3982_v45 = vmul.f32 %v6053_v43, %v6045_v29  ;;  %5750 = vmatprep.subr.bf16.mxu0 %v6826_v0 }
 0xc3e   : > { %5547 = vmatmul.mubr.msk.f32.vlgmr.msra.gmra.mrb[40].mxu1 %vm1967_vm2, %v3982_v45 }
 0xc3f   : > { %v6055_v47 = vpop.eup %6054  ;;  %5555 = vmatpush3.msra.mxu1 %v7893_v58  ;;  %5556 = vmatprep.mubr.msk.f32.mxu1 %vm6827_vm0, %v6828_v1 }
 0xc40   : > { %v6057_v40 = vpop.eup %6056  ;;  %v3983_v48 = vmul.f32 %v6055_v47, %v6047_v31  ;;  %5756 = vmatprep.subr.bf16.mxu1 %v6826_v0 }
 0xc41   : > { %v3984_v49 = vmul.f32 %v6057_v40, %v6049_v32  ;;  %v5016_v32 = vld [vmem:[#allocation25] ss:$0 sm:$0xff]  ;;  %v5020_v40 = vld [vmem:[#allocation35] ss:$0 sm:$0xff] }
 0xc42   : > { %5552 = vmatmul.mubr.msk.f32.vlgmr.msra.gmra.mrb[36].mxu0 %vm1967_vm2, %v3983_v48 }
 0xc43   : > { %5557 = vmatmul.mubr.msk.f32.vlgmr.msra.gmra.mrb[42].mxu1 %vm1967_vm2, %v3984_v49  ;;  %5567 = vmatprep.mubr.msk.f32.mxu0 %vm6827_vm0, %v6828_v1 }
 0xc44   : > { %5578 = vmatprep.mubr.msk.f32.mxu1 %vm6827_vm0, %v6828_v1  ;;  %5752 = vmatpush3.bf16.msra.mxu0 %v5751_v52 }
 0xc45   : > { %5753 = vmatprep.subr.bf16.mxu0 %v6826_v0  ;;  %5758 = vmatpush3.bf16.msra.mxu1 %v5757_v16 }
 0xc46   : > { %5759 = vmatprep.subr.bf16.mxu1 %v6826_v0 }
 0xc48   : > { %5755 = vmatpush3.bf16.msra.mxu0 %v5754_v55 }
 0xc49   : > { %5762 = vmatprep.subr.bf16.mxu0 %v6826_v0 }
 0xd0d   : > { %v4054_v56 = vpop.f32.mrb[34].mxu0 }
 0xd0e   : > { %v5543_v57 = vpop.f32.mrb[35].mxu0 }
 0xd11   : > { %v4127_v58 = vpop.f32.mrb[40].mxu1 }
 0xd12   : > { %4278 = vrot.lane.b32.xlu1 %v4127_v58, %s6830_s9  ;;  %v5548_v59 = vpop.f32.mrb[41].mxu1 }
 0xd15   : > { %v4200_v60 = vpop.f32.mrb[36].mxu0 }
 0xd16   : > { %v4273_v61 = vpop.f32.mrb[42].mxu1  ;;  %v5553_v62 = vpop.f32.mrb[37].mxu0  ;;  %4282 = vrot.lane.b32.xlu0 %v4200_v60, %s6829_s25 }
 0xd17   : > { %4286 = vrot.lane.b32.xlu1 %v4273_v61, %s6831_s6  ;;  %v5558_v63 = vpop.f32.mrb[43].mxu1  ;;  %v5022_v62 = vld [vmem:[#allocation28] ss:$0 sm:$0xff] }
 0xd84   : > { %v4279_v2 = vpop.permute.xlu1 %4278 }
 0xd85   : > { %v4289_v3 = vsel %vm1967_vm2, %v4054_v56, %v4279_v2  ;;  %v5023_v2 = vld [vmem:[#allocation29] ss:$0 sm:$0xff] }
 0xd88   : > { %v4283_v4 = vpop.permute.xlu0 %4282 }
 0xd89   : > { %v4290_v5 = vsel %vm2621_vm5, %v4289_v3, %v4283_v4  ;;  %v4287_v6 = vpop.permute.xlu1 %4286 }
 0xd8a   : > { %v4291_v7 = vsel %vm2623_vm6, %v4290_v5, %v4287_v6 }
 0xd8b   : > { %5568 = vmatmul.mubr.msk.f32.vlgmr.msra.gmra.mrb[38].mxu0 %vm1119_vm1, %v4291_v7 }
 0xd8c   : > { %5597 = vmatprep.mubr.msk.f32.mxu0 %vm6827_vm0, %v6828_v1  ;;  %v4398_v1 = vld [vmem:[#allocation31 + $0x18] sm:$0xff]  ;;  %5764 = vmatpush3.bf16.msra.mxu0 %v5763_v22 }
 0xd8d   : > { %5765 = vmatprep.subr.bf16.mxu0 %v6826_v0 }
 0xd90   : > { %5767 = vmatpush3.bf16.msra.mxu0 %v5766_v24 }
 0xd91   : > { %5768 = vmatprep.subr.bf16.mxu0 %v6826_v0 }
 0xd94   : > { %5770 = vmatpush3.bf16.msra.mxu0 %v5769_v27 }
 0xd95   : > { %5771 = vmatprep.subr.bf16.mxu0 %v6826_v0 }
 0xd98   : > { %5773 = vmatpush3.bf16.msra.mxu0 %v5772_v41 }
 0xe5e   : > { %v4361_v8 = vpop.f32.mrb[38].mxu0 }
 0xe5f   : > { %v4365_v9 = vadd.f32 %v4361_v8, %v7795_v34  ;;  %v5569_v10 = vpop.f32.mrb[39].mxu0  ;;  %v5760_v34 = vpack.c.bf16 %v4398_v1, %v4397_v17 }
 0xe61   : > { %v4368_v11 = vsel %vm1119_vm1, %v4365_v9, 0.0  ;;  %5761 = vmatpush3.bf16.msra.mxu1 %v5760_v34 }
 0xe62   : > { %4369 = vadd.xlane.f32.xlu1 %v4368_v11 }
 0xeef   : > { %v4370_v12 = vpop.xlane.xlu1 %4369 }
 0xef0   : > { %v4371_v13 = vmul.f32 0.03125, %v4370_v12 }
 0xef2   : > { %v4372_v18 = vsub.f32 %v4365_v9, %v4371_v13 }
 0xef4   : > { %v4373_v44 = vmul.f32 %v4372_v18, %v4372_v18 }
 0xef6   : > { %v4374_v46 = vsel %vm1119_vm1, %v4373_v44, 0.0 }
 0xef7   : > { %4375 = vadd.xlane.f32.xlu0 %v4374_v46 }
 0xf84   : > { %v4376_v28 = vpop.xlane.xlu0 %4375 }
 0xf85   : > { %v4377_v29 = vmul.f32 0.03125, %v4376_v28 }
 0xf87   : > { %v4378_v30 = vadd.f32 1e-05, %v4377_v29 }
 0xf89   : > { %6058 = vrsqrt.f32 %v4378_v30 }
 0xf93   : > { %v6059_v31 = vpop.eup %6058 }
 0xf94   : > { %v4380_v33 = vmul.f32 %v6059_v31, %v4372_v18 }
 0xf96   : > { %v4387_v36 = vmul.f32 %v5016_v32, %v4380_v33 }
 0xf98   : > { %v4394_v37 = vadd.f32 %v5017_v35, %v4387_v36 }
 0xf9a   : > { %5579 = vmatmul.mubr.msk.f32.vlgmr.msra.gmra.mrb[44].mxu1 %vm1119_vm1, %v4394_v37 }
0x106d   : > { %v4475_v43 = vpop.f32.mrb[44].mxu1 }
0x106e   : > { %v4476_v45 = vadd.f32 %v5018_v42, %v4475_v43  ;;  %v5580_v0 = vpop.f32.mrb[45].mxu1 }
0x1070   : > { %v4479_v47 = vmax.f32 %v4476_v45, 0.0 }
0x1072   : > { %5598 = vmatmul.mubr.msk.f32.vlgmr.msra.gmra.mrb[40].mxu0 %vm4495_vm8, %v4479_v47 }
0x1145   : > { %v4565_v48 = vpop.f32.mrb[40].mxu0 }
0x1146   : > { %v4566_v49 = vadd.f32 %v5020_v40, %v4565_v48  ;;  %v5599_v50 = vpop.f32.mrb[41].mxu0 }
0x1148   : > { %v4569_v51 = vadd.f32 %v4566_v49, %v4394_v37 }
0x114a   : > { %v4572_v52 = vsel %vm1119_vm1, %v4569_v51, 0.0 }
0x114b   : > { %4573 = vadd.xlane.f32.xlu0 %v4572_v52 }
0x11d8   : > { %v4574_v53 = vpop.xlane.xlu0 %4573 }
0x11d9   : > { %v4575_v54 = vmul.f32 0.03125, %v4574_v53 }
0x11db   : > { %v4576_v55 = vsub.f32 %v4569_v51, %v4575_v54 }
0x11dd   : > { %v4577_v56 = vmul.f32 %v4576_v55, %v4576_v55 }
0x11df   : > { %v4578_v57 = vsel %vm1119_vm1, %v4577_v56, 0.0 }
0x11e0   : > { %4579 = vadd.xlane.f32.xlu1 %v4578_v57 }
0x126d   : > { %v4580_v58 = vpop.xlane.xlu1 %4579 }
0x126e   : > { %v4581_v59 = vmul.f32 0.03125, %v4580_v58 }
0x1270   : > { %v4582_v60 = vadd.f32 1e-05, %v4581_v59 }
0x1272   : > { %6060 = vrsqrt.f32 %v4582_v60 }
0x127c   : > { %v6061_v61 = vpop.eup %6060 }
0x127d   : > { %v4584_v63 = vmul.f32 %v6061_v61, %v4576_v55 }
0x127f   : > { %v4591_v3 = vmul.f32 %v5022_v62, %v4584_v63 }
0x1281   : > { %v4598_v4 = vadd.f32 %v5023_v2, %v4591_v3 }
0x1283   : > { %4599 = vst.msk [vmem:[%s1045_s20] sm:$0xff] %vm1119_vm1, %v4598_v4 }
0x1284   : > { %6699 = shalt.err (!%p6696_p3)
}
0x1285   : > { %s6700_s13 = scalar_lea.hbm %s7950_s7, 128  ;;  %s6704_s2 = scalar_lea.hbm %s8161_s27, 256 }
0x1286   : > { %p6701_p11 = scmp.ne.s32.totalorder %s7950_s7, %s6700_s13  ;;  %p6705_p13 = scmp.lt.u32.totalorder %s7950_s7, %s8161_s27 }
0x1287   : > { %p6706_p6 = scmp.lt.u32.totalorder %s6704_s2, %s6700_s13  ;;  %p6708_p2 = scmp.lt.u32.totalorder %s6700_s13, %s7950_s7 }
0x1288   : > { %p6702_p9 = pnand %p6701_p11, %p8162_p1 }
0x1289   : > { %p6707_p12 = por %p6706_p6, %p6705_p13 }
0x128a   : > { %p6703_p8 = pneg %p6702_p9 }
0x128b   : > { %p6709_p4 = por %p6708_p2, %p6707_p12 }
0x128d   : > { %p6710_p10 = pnand %p6709_p4, %p6703_p8 }
0x128f   : > { %6713 = shalt.err (!%p6710_p10)
}
0x1290   : > { %5854 = dma.vmem_to_hbm [thread:$0]  (%p8162_p1), %s7952_s12, 128, %s7950_s7, %s4601_s21  }
0x1291 PF: > { %s8163_s15 = sld [smem:[#allocation56_spill]]  ;;  %s4626_s25 = sand.u32 1, %s6788_s3  }
0x1292   : > { %p8165_p7 = scmp.ge.s32.totalorder %s6800_s30, 2  ;;  %s4627_s9 = scalar_lea.sflag [#allocation4], %s4626_s25 }
0x1297   : > { %p8164_p5 = scmp.ne.s32.totalorder %s8163_s15, 0 }
0x1299   : > { %p5925_p0 = pnand %p8165_p7, %p8164_p5 }
0x129b   : > { %6783 = dma.done.wait (!%p5925_p0), %s4627_s9, 128  }
0x129c   : > { %6785 = vsyncadd (!%p5925_p0), %s4627_s9, 4294967168  ;;  %s8166_s30 = sld [smem:[#allocation54_spill]]  ;;  %s8167_s6 = sld [smem:[#allocation52_spill]] }
0x129d   : > { %s8168_s29 = sld [smem:[#allocation55_spill]]  ;;  %s8169_s3 = smov %s6792_s28 }
0x12a2   : > { %p50_p3 = scmp.ge.s32.totalorder %s8166_s30, 4   ;;  %s8170_s28 = smov %s8167_s6 }
0x12a4   :  { %52 = sbr.rel (!%p50_p3) target bundleno = 42 (0x2a), region = 262 }
0x12ab   :  { %4632 = vsyncpa [#allocation3], 1 }
0x12ac   :  { %4634 = vsyncpa [#allocation3 + $0x1], 1 }
0x12ad   :  { %4635 = vsyncpa [#allocation6], 1 }
0x12ae   :  { %4637 = vsyncpa [#allocation6 + $0x1], 1 }
0x12af   :  { %4638 = vsyncpa [#allocation9], 1 }
0x12b0   :  { %4640 = vsyncpa [#allocation9 + $0x1], 1 }
0x12b1   :  { %4641 = vsyncpa [#allocation12], 1 }
0x12b2   :  { %4642 = vsyncpa [#allocation15], 1 }
0x12b3   :  { %4643 = vsyncpa [#allocation18], 1 }
0x12b4   :  { %4644 = vsyncpa [#allocation21], 1 }
0x12b5   :  { %4645 = vsyncpa [#allocation24], 1 }
0x12b6   :  { %4646 = vsyncpa [#allocation27], 1 }
0x12b7   :  { %4647 = vsyncpa [#allocation30], 1 }
0x12b8   :  { %4648 = vsyncpa [#allocation33], 1 }
0x12b9   :  { %4649 = vsyncpa [#allocation36], 1 }
0x12ba   :  { %4650 = vsyncpa [#allocation4], 1 }
0x12bb   :  { %4652 = vsyncpa [#allocation4 + $0x1], 1 }

// kernel: tpu_custom_call.1
= control target key start
LH: loop header
LB: loop body
LE: loop exit
PB: predicated region body
PF: predicated region fallthrough
CT: control target
= control target key end

     0   :  { %s7995_s0 = inlined_call_operand.hbm [shape: f32[2,8,32], index: 0, kind: input, shape index: {}]   ;;  %s7996_s1 = inlined_call_operand.hbm [shape: f32[2,8,32], index: 1, kind: input, shape index: {}]   ;;  %s7997_s2 = inlined_call_operand.hbm [shape: f32[2,1,8], index: 2, kind: input, shape index: {}]   ;;  %s7998_s3 = inlined_call_operand.hbm [shape: f32[2,1,8], index: 3, kind: input, shape index: {}]   ;;  %s7999_s4 = inlined_call_operand.hbm [shape: f32[4,32,8], index: 4, kind: input, shape index: {}]   ;;  %s8000_s5 = inlined_call_operand.hbm [shape: f32[4,32,8], index: 5, kind: input, shape index: {}]   ;;  %s8001_s6 = inlined_call_operand.hbm [shape: f32[4,32,8], index: 6, kind: input, shape index: {}]   ;;  %s8002_s7 = inlined_call_operand.hbm [shape: f32[32,32], index: 7, kind: input, shape index: {}]   ;;  %s8003_s8 = inlined_call_operand.hbm [shape: f32[4,32,8], index: 8, kind: input, shape index: {}]   ;;  %s8004_s9 = inlined_call_operand.hbm [shape: f32[4,32,8], index: 9, kind: input, shape index: {}]   ;;  %s8005_s10 = inlined_call_operand.hbm [shape: f32[4,32,8], index: 10, kind: input, shape index: {}]   ;;  %s8006_s11 = inlined_call_operand.hbm [shape: f32[32,32], index: 11, kind: input, shape index: {}]   ;;  %s8007_s12 = inlined_call_operand.hbm [shape: f32[1,32], index: 12, kind: input, shape index: {}]   ;;  %s8008_s13 = inlined_call_operand.hbm [shape: f32[1,32], index: 13, kind: input, shape index: {}]   ;;  %s8009_s14 = inlined_call_operand.hbm [shape: f32[1,32], index: 14, kind: input, shape index: {}]   ;;  %s8010_s15 = inlined_call_operand.hbm [shape: f32[1,32], index: 15, kind: input, shape index: {}]   ;;  %s8011_s16 = inlined_call_operand.hbm [shape: f32[1,32], index: 16, kind: input, shape index: {}]   ;;  %s8012_s17 = inlined_call_operand.hbm [shape: f32[1,32], index: 17, kind: input, shape index: {}]   ;;  %s8013_s18 = inlined_call_operand.hbm [shape: f32[32,64], index: 18, kind: input, shape index: {}]   ;;  %s8014_s19 = inlined_call_operand.hbm [shape: f32[1,64], index: 19, kind: input, shape index: {}]   ;;  %s8015_s20 = inlined_call_operand.hbm [shape: f32[64,32], index: 20, kind: input, shape index: {}]   ;;  %s8016_s21 = inlined_call_operand.hbm [shape: f32[1,32], index: 21, kind: input, shape index: {}]   ;;  %s8017_s22 = inlined_call_operand.hbm [shape: f32[2,8,32], index: 22, kind: output, shape index: {}]  }
   0x1   :  { %8066 = sst [smem:[#allocation57_spill]] %s7995_s0 }
   0x2   :  { %8067 = sst [smem:[#allocation58_spill]] %s7996_s1 }
   0x3   :  { %8068 = sst [smem:[#allocation59_spill]] %s7997_s2 }
   0x4   :  { %8069 = sst [smem:[#allocation60_spill]] %s7998_s3 }
   0x5   :  { %8070 = sst [smem:[#allocation61_spill]] %s7999_s4 }
   0x6   :  { %8071 = sst [smem:[#allocation62_spill]] %s8000_s5 }
   0x7   :  { %8072 = sst [smem:[#allocation63_spill]] %s8001_s6 }
   0x8   :  { %8073 = sst [smem:[#allocation64_spill]] %s8002_s7 }
   0x9   :  { %8074 = sst [smem:[#allocation65_spill]] %s8003_s8 }
   0xa   :  { %8075 = sst [smem:[#allocation66_spill]] %s8004_s9 }
   0xb   :  { %8076 = sst [smem:[#allocation67_spill]] %s8005_s10 }
   0xc   :  { %8077 = sst [smem:[#allocation68_spill]] %s8006_s11 }
   0xd   :  { %8078 = sst [smem:[#allocation69_spill]] %s8007_s12 }
   0xe   :  { %8079 = sst [smem:[#allocation70_spill]] %s8008_s13 }
   0xf   :  { %8080 = sst [smem:[#allocation71_spill]] %s8009_s14 }
  0x10   :  { %8081 = sst [smem:[#allocation72_spill]] %s8010_s15 }
  0x11   :  { %8082 = sst [smem:[#allocation73_spill]] %s8011_s16 }
  0x12   :  { %8083 = sst [smem:[#allocation74_spill]] %s8012_s17 }
  0x13   :  { %8084 = sst [smem:[#allocation75_spill]] %s8013_s18 }
  0x14   :  { %8085 = sst [smem:[#allocation76_spill]] %s8014_s19 }
  0x15   :  { %8086 = sst [smem:[#allocation77_spill]] %s8015_s20 }
  0x16   :  { %8087 = sst [smem:[#allocation78_spill]] %s8016_s21 }
  0x17   :  { %8088 = sst [smem:[#allocation79_spill]] %s8017_s22 }
  0x18   :  { %27 = vsyncpa [#allocation3], 0 }
  0x19   :  { %29 = vsyncpa [#allocation3 + $0x1], 0 }
  0x1a   :  { %30 = vsyncpa [#allocation6], 0 }
  0x1b   :  { %32 = vsyncpa [#allocation6 + $0x1], 0 }
  0x1c   :  { %33 = vsyncpa [#allocation9], 0 }
  0x1d   :  { %35 = vsyncpa [#allocation9 + $0x1], 0 }
  0x1e   :  { %36 = vsyncpa [#allocation12], 0 }
  0x1f   :  { %37 = vsyncpa [#allocation15], 0 }
  0x20   :  { %38 = vsyncpa [#allocation18], 0 }
  0x21   :  { %39 = vsyncpa [#allocation21], 0 }
  0x22   :  { %40 = vsyncpa [#allocation24], 0 }
  0x23   :  { %41 = vsyncpa [#allocation27], 0 }
  0x24   :  { %42 = vsyncpa [#allocation30], 0 }
  0x25   :  { %43 = vsyncpa [#allocation33], 0 }
  0x26   :  { %44 = vsyncpa [#allocation36], 0 }
  0x27   :  { %45 = vsyncpa [#allocation4], 0 }
  0x28   :  { %47 = vsyncpa [#allocation4 + $0x1], 0  ;;  %s6948_s3 = smov 0   ;;  %s6950_s28 = smov 0  }
  0x29   :  { %s6952_s29 = smov 0   ;;  %s6954_s30 = smov 0  }
  0x2a LB: > { %8089 = sst [smem:[#allocation52_spill]] %s6796_s29  ;;  %s6802_s4 = smov [#allocation10]   ;;  %s6800_s30 = sphi %s6954_s30, %s8166_s30   ;;  %s6796_s29 = sphi %s6952_s29, %s8168_s29   ;;  %s6792_s28 = sphi %s6950_s28, %s8170_s28   ;;  %s6788_s3 = sphi %s6948_s3, %s8169_s3  }
  0x2b   : > { %s578_s0 = sshll.u32 %s6802_s4, 4  ;;  %s6969_s23 = sadd.s32 4294967295, %s6800_s30   ;;  %s6974_s0 = int_to_ptr.vmem [resolvable:$true] %s578_s0 }
  0x2c   : > { %p4916_p0 = scmp.ge.s32.totalorder %s6800_s30, 1  ;;  %p8035_p1 = scmp.eq.s32.totalorder %s6969_s23, 0 }
  0x2d   : > { %p566_p2 = scmp.lt.s32.totalorder %s6800_s30, 3  ;;  %s6803_s5 = smov [#allocation11]  }
  0x2e   : > { %s591_s24 = sshll.u32 %s6803_s5, 4  ;;  %s6804_s25 = smov [#allocation14]   ;;  %s6989_s24 = int_to_ptr.vmem [resolvable:$true] %s591_s24 }
  0x2f   : > { %p6976_p3 = pnand %p4916_p0, %p566_p2  ;;  %s617_s26 = sshll.u32 %s6804_s25, 4  ;;  %s6991_s26 = int_to_ptr.vmem [resolvable:$true] %s617_s26 }
  0x30   : > { %s8093_s4 = sld [smem:[#allocation61_spill]] }
  0x31   : > { %s8090_s1 = scalar_select %p6976_p3, 1, 0 }
  0x32   : > { %p5856_p5 = pneg %p6976_p3 }
  0x33   : > { %8091 = sst [smem:[#allocation53_spill]] %s8090_s1 }
  0x34   : > { %p6985_p6 = pnand %p5856_p5, %p8035_p1 }
  0x36   : > { %s8092_s6 = scalar_select %p6985_p6, 1, 0 }
  0x37   : > { %s6062_s22 = scalar_lea.hbm %s8093_s4, 2048  ;;  %p7001_p8 = pneg %p6985_p6 }
  0x38   : > { %p6063_p7 = scmp.ne.s32.totalorder %s8093_s4, %s6062_s22  ;;  %p6069_p11 = scmp.lt.u32.totalorder %s6062_s22, %s8093_s4 }
  0x39   : > { %s8094_s5 = scalar_select %p7001_p8, 1, 0 }
  0x3a   : > { %p6065_p9 = pnand %p7001_p8, %p6063_p7 }
  0x3c   : > { %p6066_p10 = pneg %p6065_p9 }
  0x3e   : > { %p6071_p12 = pnand %p6069_p11, %p6066_p10 }
  0x40   : > { %6074 = shalt.err (!%p6071_p12)
}
  0x41   : > { %s6075_s21 = scalar_lea.vmem %s6974_s0, 2048  ;;  %p6083_p5 = scmp.lt.s32.totalorder %s6974_s0, %s6974_s0 }
  0x42   : > { %p6076_p13 = scmp.ne.s32.totalorder %s6974_s0, %s6075_s21  ;;  %p6084_p4 = scmp.lt.s32.totalorder %s6075_s21, %s6075_s21 }
  0x44   : > { %p6078_p0 = pnand %p6076_p13, %p7001_p8  ;;  %p6085_p7 = por %p6084_p4, %p6083_p5 }
  0x46   : > { %p6079_p2 = pneg %p6078_p0 }
  0x48   : > { %p6086_p9 = pnand %p6085_p7, %p6079_p2 }
  0x4a   : > { %6089 = shalt.err (!%p6086_p9)
}
  0x4b   : > { %s8037_s1 = smov 128   ;;  %s8039_s20 = smov 8  }
  0x4c   : > { %5859 = dma.hbm_to_vmem [thread:$0]  (!%p6985_p6), %s8093_s4, 2048, %s6974_s0, [#allocation9], %s8037_s1, %s8037_s1, %s8039_s20  }
  0x4d   : > { %s8095_s18 = sld [smem:[#allocation62_spill]] }
  0x53   : > { %s6090_s21 = scalar_lea.hbm %s8095_s18, 2048 }
  0x54   : > { %p6091_p4 = scmp.ne.s32.totalorder %s8095_s18, %s6090_s21  ;;  %p6097_p12 = scmp.lt.u32.totalorder %s6090_s21, %s8095_s18 }
  0x56   : > { %p6093_p10 = pnand %p6091_p4, %p7001_p8 }
  0x58   : > { %p6094_p11 = pneg %p6093_p10 }
  0x5a   : > { %p6099_p13 = pnand %p6097_p12, %p6094_p11 }
  0x5c   : > { %6102 = shalt.err (!%p6099_p13)
}
  0x5d   : > { %s6103_s0 = scalar_lea.vmem %s6989_s24, 2048  ;;  %p6111_p7 = scmp.lt.s32.totalorder %s6989_s24, %s6989_s24 }
  0x5e   : > { %p6104_p0 = scmp.ne.s32.totalorder %s6989_s24, %s6103_s0  ;;  %p6112_p9 = scmp.lt.s32.totalorder %s6103_s0, %s6103_s0 }
  0x60   : > { %p6106_p2 = pnand %p6104_p0, %p7001_p8  ;;  %p6113_p4 = por %p6112_p9, %p6111_p7 }
  0x62   : > { %p6107_p5 = pneg %p6106_p2 }
  0x64   : > { %p6114_p10 = pnand %p6113_p4, %p6107_p5 }
  0x66   : > { %6117 = shalt.err (!%p6114_p10)
}
  0x67   : > { %5862 = dma.hbm_to_vmem [thread:$0]  (!%p6985_p6), %s8095_s18, 2048, %s6989_s24, [#allocation12], %s8037_s1, %s8037_s1, %s8039_s20  }
  0x68   : > { %s8096_s7 = sld [smem:[#allocation64_spill]] }
  0x6e   : > { %s6118_s22 = scalar_lea.hbm %s8096_s7, 512 }
  0x6f   : > { %p6119_p11 = scmp.ne.s32.totalorder %s8096_s7, %s6118_s22  ;;  %p6125_p0 = scmp.lt.u32.totalorder %s6118_s22, %s8096_s7 }
  0x71   : > { %p6121_p12 = pnand %p6119_p11, %p7001_p8 }
  0x73   : > { %p6122_p13 = pneg %p6121_p12 }
  0x75   : > { %p6127_p2 = pnand %p6125_p0, %p6122_p13 }
  0x77   : > { %6130 = shalt.err (!%p6127_p2)
}
  0x78   : > { %s6131_s24 = scalar_lea.vmem %s6991_s26, 512  ;;  %p6139_p4 = scmp.lt.s32.totalorder %s6991_s26, %s6991_s26 }
  0x79   : > { %p6132_p5 = scmp.ne.s32.totalorder %s6991_s26, %s6131_s24  ;;  %p6140_p10 = scmp.lt.s32.totalorder %s6131_s24, %s6131_s24 }
  0x7b   : > { %p6134_p7 = pnand %p6132_p5, %p7001_p8  ;;  %p6141_p11 = por %p6140_p10, %p6139_p4 }
  0x7d   : > { %p6135_p9 = pneg %p6134_p7 }
  0x7f   : > { %p6142_p12 = pnand %p6141_p11, %p6135_p9 }
  0x81   : > { %6145 = shalt.err (!%p6142_p12)
}
  0x82   : > { %5868 = dma.hbm_to_vmem [thread:$0]  (!%p6985_p6), %s8096_s7, 512, %s6991_s26, [#allocation15], %s8037_s1, %s8037_s1, %s8039_s20  }
  0x83   : > { %s6807_s12 = smov [#allocation17]   ;;  %s6808_s16 = smov [#allocation20]  }
  0x84   : > { %s643_s14 = sshll.u32 %s6807_s12, 4  ;;  %s669_s22 = sshll.u32 %s6808_s16, 4  ;;  %s644_s14 = int_to_ptr.vmem [resolvable:$true] %s643_s14  ;;  %s670_s22 = int_to_ptr.vmem [resolvable:$true] %s669_s22 }
  0x85   : > { %s8097_s9 = sld [smem:[#allocation66_spill]] }
  0x8b   : > { %s6146_s25 = scalar_lea.hbm %s8097_s9, 2048 }
  0x8c   : > { %p6147_p13 = scmp.ne.s32.totalorder %s8097_s9, %s6146_s25  ;;  %p6153_p5 = scmp.lt.u32.totalorder %s6146_s25, %s8097_s9 }
  0x8e   : > { %p6149_p0 = pnand %p6147_p13, %p7001_p8 }
  0x90   : > { %p6150_p2 = pneg %p6149_p0 }
  0x92   : > { %p6155_p7 = pnand %p6153_p5, %p6150_p2 }
  0x94   : > { %6158 = shalt.err (!%p6155_p7)
}
  0x95   : > { %s6159_s26 = scalar_lea.vmem %s644_s14, 2048  ;;  %p6167_p11 = scmp.lt.s32.totalorder %s644_s14, %s644_s14 }
  0x96   : > { %p6160_p9 = scmp.ne.s32.totalorder %s644_s14, %s6159_s26  ;;  %p6168_p12 = scmp.lt.s32.totalorder %s6159_s26, %s6159_s26 }
  0x98   : > { %p6162_p4 = pnand %p6160_p9, %p7001_p8  ;;  %p6169_p1 = por %p6168_p12, %p6167_p11 }
  0x9a   : > { %p6163_p10 = pneg %p6162_p4 }
  0x9c   : > { %p6170_p3 = pnand %p6169_p1, %p6163_p10 }
  0x9e   : > { %6173 = shalt.err (!%p6170_p3)
}
  0x9f   : > { %5874 = dma.hbm_to_vmem [thread:$0]  (!%p6985_p6), %s8097_s9, 2048, %s644_s14, [#allocation18], %s8037_s1, %s8037_s1, %s8039_s20  }
  0xa0   : > { %s8098_s11 = sld [smem:[#allocation68_spill]] }
  0xa6   : > { %s6174_s2 = scalar_lea.hbm %s8098_s11, 512 }
  0xa7   : > { %p6175_p1 = scmp.ne.s32.totalorder %s8098_s11, %s6174_s2  ;;  %p6181_p0 = scmp.lt.u32.totalorder %s6174_s2, %s8098_s11 }
  0xa9   : > { %p6177_p3 = pnand %p6175_p1, %p7001_p8 }
  0xab   : > { %p6178_p13 = pneg %p6177_p3 }
  0xad   : > { %p6183_p2 = pnand %p6181_p0, %p6178_p13 }
  0xaf   : > { %6186 = shalt.err (!%p6183_p2)
}
  0xb0   : > { %s6187_s0 = scalar_lea.vmem %s670_s22, 512  ;;  %p6195_p4 = scmp.lt.s32.totalorder %s670_s22, %s670_s22 }
  0xb1   : > { %p6188_p5 = scmp.ne.s32.totalorder %s670_s22, %s6187_s0  ;;  %p6196_p10 = scmp.lt.s32.totalorder %s6187_s0, %s6187_s0 }
  0xb3   : > { %p6190_p7 = pnand %p6188_p5, %p7001_p8  ;;  %p6197_p11 = por %p6196_p10, %p6195_p4 }
  0xb5   : > { %p6191_p9 = pneg %p6190_p7 }
  0xb7   : > { %p6198_p12 = pnand %p6197_p11, %p6191_p9 }
  0xb9   : > { %6201 = shalt.err (!%p6198_p12)
}
  0xba   : > { %5880 = dma.hbm_to_vmem [thread:$0]  (!%p6985_p6), %s8098_s11, 512, %s670_s22, [#allocation21], %s8037_s1, %s8037_s1, %s8039_s20  }
  0xbb   : > { %s6809_s4 = smov [#allocation23]   ;;  %s6810_s12 = smov [#allocation26]  }
  0xbc   : > { %s694_s10 = sshll.u32 %s6809_s4, 4  ;;  %s716_s16 = sshll.u32 %s6810_s12, 4  ;;  %s695_s10 = int_to_ptr.vmem [resolvable:$true] %s694_s10  ;;  %s717_s16 = int_to_ptr.vmem [resolvable:$true] %s716_s16 }
  0xbd   : > { %s8099_s13 = sld [smem:[#allocation70_spill]] }
  0xc3   : > { %s6202_s25 = scalar_lea.hbm %s8099_s13, 16 }
  0xc4   : > { %p6203_p1 = scmp.ne.s32.totalorder %s8099_s13, %s6202_s25  ;;  %p6209_p0 = scmp.lt.u32.totalorder %s6202_s25, %s8099_s13 }
  0xc6   : > { %p6205_p3 = pnand %p6203_p1, %p7001_p8 }
  0xc8   : > { %p6206_p13 = pneg %p6205_p3 }
  0xca   : > { %p6211_p2 = pnand %p6209_p0, %p6206_p13 }
  0xcc   : > { %6214 = shalt.err (!%p6211_p2)
}
  0xcd   : > { %s6215_s22 = scalar_lea.vmem %s695_s10, 16  ;;  %s6222_s26 = scalar_lea.vmem %s695_s10, 32 }
  0xce   : > { %p6216_p5 = scmp.ne.s32.totalorder %s695_s10, %s6215_s22  ;;  %p6223_p4 = scmp.lt.s32.totalorder %s695_s10, %s695_s10 }
  0xcf   : > { %p6224_p10 = scmp.lt.s32.totalorder %s6222_s26, %s6215_s22 }
  0xd0   : > { %p6218_p7 = pnand %p6216_p5, %p7001_p8 }
  0xd1   : > { %p6225_p11 = por %p6224_p10, %p6223_p4 }
  0xd2   : > { %p6219_p9 = pneg %p6218_p7 }
  0xd4   : > { %p6226_p12 = pnand %p6225_p11, %p6219_p9 }
  0xd6   : > { %6229 = shalt.err (!%p6226_p12)
}
  0xd7   : > { %5886 = dma.hbm_to_vmem [thread:$0]  (!%p6985_p6), %s8099_s13, 16, %s695_s10, [#allocation24]  }
  0xd8   : > { %s8100_s15 = sld [smem:[#allocation72_spill]] }
  0xde   : > { %s6230_s25 = scalar_lea.hbm %s8100_s15, 16 }
  0xdf   : > { %p6231_p1 = scmp.ne.s32.totalorder %s8100_s15, %s6230_s25  ;;  %p6237_p0 = scmp.lt.u32.totalorder %s6230_s25, %s8100_s15 }
  0xe1   : > { %p6233_p3 = pnand %p6231_p1, %p7001_p8 }
  0xe3   : > { %p6234_p13 = pneg %p6233_p3 }
  0xe5   : > { %p6239_p2 = pnand %p6237_p0, %p6234_p13 }
  0xe7   : > { %6242 = shalt.err (!%p6239_p2)
}
  0xe8   : > { %s6243_s22 = scalar_lea.vmem %s717_s16, 16  ;;  %s6250_s10 = scalar_lea.vmem %s717_s16, 32 }
  0xe9   : > { %p6244_p5 = scmp.ne.s32.totalorder %s717_s16, %s6243_s22  ;;  %p6251_p4 = scmp.lt.s32.totalorder %s717_s16, %s717_s16 }
  0xea   : > { %p6252_p10 = scmp.lt.s32.totalorder %s6250_s10, %s6243_s22 }
  0xeb   : > { %p6246_p7 = pnand %p6244_p5, %p7001_p8 }
  0xec   : > { %p6253_p11 = por %p6252_p10, %p6251_p4 }
  0xed   : > { %p6247_p9 = pneg %p6246_p7 }
  0xef   : > { %p6254_p12 = pnand %p6253_p11, %p6247_p9 }
  0xf1   : > { %6257 = shalt.err (!%p6254_p12)
}
  0xf2   : > { %5892 = dma.hbm_to_vmem [thread:$0]  (!%p6985_p6), %s8100_s15, 16, %s717_s16, [#allocation27]  }
  0xf3   : > { %s6811_s12 = smov [#allocation29]   ;;  %s6812_s27 = smov [#allocation32]  }
  0xf4   : > { %s738_s2 = sshll.u32 %s6811_s12, 4  ;;  %s762_s25 = sshll.u32 %s6812_s27, 4  ;;  %s739_s2 = int_to_ptr.vmem [resolvable:$true] %s738_s2  ;;  %s763_s25 = int_to_ptr.vmem [resolvable:$true] %s762_s25 }
  0xf5   : > { %s8101_s17 = sld [smem:[#allocation74_spill]] }
  0xfb   : > { %s6258_s0 = scalar_lea.hbm %s8101_s17, 16 }
  0xfc   : > { %p6259_p1 = scmp.ne.s32.totalorder %s8101_s17, %s6258_s0  ;;  %p6265_p0 = scmp.lt.u32.totalorder %s6258_s0, %s8101_s17 }
  0xfe   : > { %p6261_p3 = pnand %p6259_p1, %p7001_p8 }
 0x100   : > { %p6262_p13 = pneg %p6261_p3 }
 0x102   : > { %p6267_p2 = pnand %p6265_p0, %p6262_p13 }
 0x104   : > { %6270 = shalt.err (!%p6267_p2)
}
 0x105   : > { %s6271_s16 = scalar_lea.vmem %s739_s2, 16  ;;  %s6278_s4 = scalar_lea.vmem %s739_s2, 32 }
 0x106   : > { %p6272_p5 = scmp.ne.s32.totalorder %s739_s2, %s6271_s16  ;;  %p6279_p4 = scmp.lt.s32.totalorder %s739_s2, %s739_s2 }
 0x107   : > { %p6280_p10 = scmp.lt.s32.totalorder %s6278_s4, %s6271_s16 }
 0x108   : > { %p6274_p7 = pnand %p6272_p5, %p7001_p8 }
 0x109   : > { %p6281_p11 = por %p6280_p10, %p6279_p4 }
 0x10a   : > { %p6275_p9 = pneg %p6274_p7 }
 0x10c   : > { %p6282_p12 = pnand %p6281_p11, %p6275_p9 }
 0x10e   : > { %6285 = shalt.err (!%p6282_p12)
}
 0x10f   : > { %5898 = dma.hbm_to_vmem [thread:$0]  (!%p6985_p6), %s8101_s17, 16, %s739_s2, [#allocation30]  }
 0x110   : > { %s8102_s19 = sld [smem:[#allocation76_spill]] }
 0x116   : > { %s6286_s0 = scalar_lea.hbm %s8102_s19, 16 }
 0x117   : > { %p6287_p1 = scmp.ne.s32.totalorder %s8102_s19, %s6286_s0  ;;  %p6293_p0 = scmp.lt.u32.totalorder %s6286_s0, %s8102_s19 }
 0x119   : > { %p6289_p3 = pnand %p6287_p1, %p7001_p8 }
 0x11b   : > { %p6290_p13 = pneg %p6289_p3 }
 0x11d   : > { %p6295_p2 = pnand %p6293_p0, %p6290_p13 }
 0x11f   : > { %6298 = shalt.err (!%p6295_p2)
}
 0x120   : > { %s6299_s16 = scalar_lea.vmem %s763_s25, 16  ;;  %s6306_s2 = scalar_lea.vmem %s763_s25, 32 }
 0x121   : > { %p6300_p5 = scmp.ne.s32.totalorder %s763_s25, %s6299_s16  ;;  %p6307_p4 = scmp.lt.s32.totalorder %s763_s25, %s763_s25 }
 0x122   : > { %p6308_p10 = scmp.lt.s32.totalorder %s6306_s2, %s6299_s16 }
 0x123   : > { %p6302_p7 = pnand %p6300_p5, %p7001_p8 }
 0x124   : > { %p6309_p11 = por %p6308_p10, %p6307_p4 }
 0x125   : > { %p6303_p9 = pneg %p6302_p7 }
 0x127   : > { %p6310_p12 = pnand %p6309_p11, %p6303_p9 }
 0x129   : > { %6313 = shalt.err (!%p6310_p12)
}
 0x12a   : > { %5904 = dma.hbm_to_vmem [thread:$0]  (!%p6985_p6), %s8102_s19, 16, %s763_s25, [#allocation33]  }
 0x12b   : > { %s4915_s27 = sadd.s32 4294967294, %s6800_s30   ;;  %s7193_s21 = sadd.s32 1, %s6800_s30  }
 0x12c   : > { %8103 = sst [smem:[#allocation54_spill]] %s7193_s21  ;;  %s60_s24 = sadd.s32 1, %s6796_s29 }
 0x12d   : > { %s57_s0 = ssub.s32 %s6800_s30, %s7193_s21  ;;  %p67_p1 = scmp.ne.s32.totalorder %s6796_s29, %s6792_s28 }
 0x12e   : > { %p58_p3 = scmp.eq.s32.totalorder %s57_s0, 0  ;;  %p68_p13 = scmp.eq.s32.totalorder %s6800_s30, 0 }
 0x12f   : > { %p73_p0 = scmp.ne.s32.totalorder %s6792_s28, %s6788_s3  ;;  %p553_p2 = scmp.eq.s32.totalorder %s6969_s23, 1 }
 0x130   : > { %s7205_s14 = scalar_select %p58_p3, %s6796_s29, %s60_s24  }
 0x131   : > { %p69_p5 = por %p68_p13, %p67_p1  ;;  %p8105_p7 = scmp.eq.s32.totalorder %s6969_s23, 0 }
 0x132   : > { %8104 = sst [smem:[#allocation55_spill]] %s7205_s14  ;;  %p7213_p4 = por %p553_p2, %p67_p1 }
 0x133   : > { %p7209_p9 = por %p8105_p7, %p73_p0  ;;  %p559_p10 = scmp.eq.s32.totalorder %s4915_s27, 1 }
 0x134   : > { %s8107_s22 = scalar_select %p7213_p4, 1, 0 }
 0x135   : > { %s8106_s25 = scalar_select %p7209_p9, 1, 0 }
 0x136   : > { %p5946_p11 = scmp.lt.s32.totalorder %s6800_s30, 2  ;;  %s7219_s10 = sand.u32 1, %s6796_s29  }
 0x137   : > { %p7221_p12 = por %p559_p10, %p73_p0  ;;  %s8041_s16 = sshll.u32 %s7219_s10, 3 }
 0x138   : > { %s8042_s2 = sshll.u32 %s6800_s30, 7  ;;  %p7227_p3 = pnand %p5946_p11, %p69_p5 }
 0x139   : > { %s8108_s26 = scalar_select %p7221_p12, 1, 0 }
 0x13a   : > { %s8110_s4 = scalar_select %p7227_p3, 1, 0 }
 0x13b   : > { %8109 = sst [smem:[#allocation56_spill]] %s8108_s26  ;;  %s8044_s12 = sand.u32 1, %s6800_s30  }
 0x13c   : > { %s8111_s0 = sld [smem:[#allocation58_spill]]  ;;  %s819_s20 = scalar_lea.vmem [#allocation5], %s8041_s16 }
 0x13d   : > { %s826_s7 = sshll.u32 %s819_s20, 4  ;;  %s7245_s9 = scalar_lea.sflag [#allocation6], %s8044_s12  ;;  %s7241_s7 = int_to_ptr.vmem [resolvable:$true] %s826_s7 }
 0x13e   : > { %p7251_p13 = pneg %p7227_p3 }
 0x140   : > { %s8112_s13 = scalar_select %p7251_p13, 1, 0 }
 0x142   : > { %s7237_s1 = scalar_lea.hbm %s8111_s0, %s8042_s2  ;;  %s6319_s20 = scalar_lea.hbm %s8111_s0, 256 }
 0x143   : > { %s6314_s11 = scalar_lea.hbm %s7237_s1, 128  ;;  %p6320_p5 = scmp.lt.u32.totalorder %s7237_s1, %s8111_s0 }
 0x144   : > { %p6315_p1 = scmp.ne.s32.totalorder %s7237_s1, %s6314_s11  ;;  %p6321_p7 = scmp.lt.u32.totalorder %s6319_s20, %s6314_s11 }
 0x145   : > { %p6323_p11 = scmp.lt.u32.totalorder %s6314_s11, %s7237_s1 }
 0x146   : > { %p6317_p0 = pnand %p7251_p13, %p6315_p1  ;;  %p6322_p10 = por %p6321_p7, %p6320_p5 }
 0x148   : > { %p6318_p2 = pneg %p6317_p0  ;;  %p6324_p12 = por %p6323_p11, %p6322_p10 }
 0x14a   : > { %p6325_p4 = pnand %p6324_p12, %p6318_p2 }
 0x14c   : > { %6328 = shalt.err (!%p6325_p4)
}
 0x14d   : > { %s6329_s12 = scalar_lea.vmem %s7241_s7, 128  ;;  %s6813_s24 = smov [#allocation5]  }
 0x14e   : > { %p6330_p1 = scmp.ne.s32.totalorder %s7241_s7, %s6329_s12  ;;  %s6334_s27 = sshll.u32 %s6813_s24, 4  ;;  %s6335_s27 = int_to_ptr.vmem [resolvable:$false] %s6334_s27 }
 0x14f   : > { %s6336_s16 = scalar_lea.vmem %s6335_s27, 256  ;;  %p6337_p6 = scmp.lt.s32.totalorder %s7241_s7, %s6335_s27 }
 0x150   : > { %p6332_p0 = pnand %p6330_p1, %p7251_p13  ;;  %p6338_p8 = scmp.lt.s32.totalorder %s6336_s16, %s6329_s12 }
 0x152   : > { %p6333_p9 = pneg %p6332_p0  ;;  %p6339_p5 = por %p6338_p8, %p6337_p6 }
 0x154   : > { %p6340_p7 = pnand %p6339_p5, %p6333_p9 }
 0x156   : > { %6343 = shalt.err (!%p6340_p7)
}
 0x157   : > { %5917 = dma.hbm_to_vmem [thread:$0]  (!%p7227_p3), %s7237_s1, 128, %s7241_s7, %s7245_s9  }
 0x158   : > { %s6814_s11 = smov [#allocation13]   ;;  %s6815_s20 = smov [#allocation16]  }
 0x159   : > { %s604_s2 = sshll.u32 %s6814_s11, 4  ;;  %s630_s0 = sshll.u32 %s6815_s20, 4  ;;  %s605_s2 = int_to_ptr.vmem [resolvable:$true] %s604_s2  ;;  %s7275_s0 = int_to_ptr.vmem [resolvable:$true] %s630_s0 }
 0x15a   : > { %s8113_s12 = sld [smem:[#allocation63_spill]]  ;;  %p8114_p8 = scmp.ne.s32.totalorder %s8094_s5, 0 }
 0x160   : > { %s6344_s16 = scalar_lea.hbm %s8113_s12, 2048 }
 0x161   : > { %p6345_p6 = scmp.ne.s32.totalorder %s8113_s12, %s6344_s16  ;;  %p6351_p12 = scmp.lt.u32.totalorder %s6344_s16, %s8113_s12 }
 0x163   : > { %p6347_p9 = pnand %p6345_p6, %p8114_p8 }
 0x165   : > { %p6348_p4 = pneg %p6347_p9 }
 0x167   : > { %p6353_p2 = pnand %p6351_p12, %p6348_p4 }
 0x169   : > { %6356 = shalt.err (!%p6353_p2)
}
 0x16a   : > { %s6357_s1 = scalar_lea.vmem %s605_s2, 2048  ;;  %p6365_p0 = scmp.lt.s32.totalorder %s605_s2, %s605_s2 }
 0x16b   : > { %p6358_p10 = scmp.ne.s32.totalorder %s605_s2, %s6357_s1  ;;  %p6366_p5 = scmp.lt.s32.totalorder %s6357_s1, %s6357_s1 }
 0x16d   : > { %p6360_p11 = pnand %p6358_p10, %p8114_p8  ;;  %p6367_p7 = por %p6366_p5, %p6365_p0 }
 0x16f   : > { %p6361_p1 = pneg %p6360_p11 }
 0x171   : > { %p6368_p3 = pnand %p6367_p7, %p6361_p1 }
 0x173   : > { %6371 = shalt.err (!%p6368_p3)
}
 0x174   : > { %p8115_p6 = scmp.ne.s32.totalorder %s8092_s6, 0  ;;  %s8116_s15 = smov 8  }
 0x175   : > { %s8117_s17 = smov 128   ;;  %s8118_s8 = sld [smem:[#allocation65_spill]] }
 0x176   : > { %5865 = dma.hbm_to_vmem [thread:$0]  (!%p8115_p6), %s8113_s12, 2048, %s605_s2, [#allocation12], %s8117_s17, %s8117_s17, %s8116_s15  }
 0x17b   : > { %s6372_s27 = scalar_lea.hbm %s8118_s8, 2048 }
 0x17c   : > { %p6373_p9 = scmp.ne.s32.totalorder %s8118_s8, %s6372_s27  ;;  %p6379_p12 = scmp.lt.u32.totalorder %s6372_s27, %s8118_s8 }
 0x17e   : > { %p6375_p3 = pnand %p6373_p9, %p8114_p8 }
 0x180   : > { %p6376_p4 = pneg %p6375_p3 }
 0x182   : > { %p6381_p2 = pnand %p6379_p12, %p6376_p4 }
 0x184   : > { %6384 = shalt.err (!%p6381_p2)
}
 0x185   : > { %s6385_s2 = scalar_lea.vmem %s7275_s0, 2048  ;;  %p6393_p0 = scmp.lt.s32.totalorder %s7275_s0, %s7275_s0 }
 0x186   : > { %p6386_p10 = scmp.ne.s32.totalorder %s7275_s0, %s6385_s2  ;;  %p6394_p5 = scmp.lt.s32.totalorder %s6385_s2, %s6385_s2 }
 0x188   : > { %p6388_p11 = pnand %p6386_p10, %p8114_p8  ;;  %p6395_p7 = por %p6394_p5, %p6393_p0 }
 0x18a   : > { %p6389_p1 = pneg %p6388_p11 }
 0x18c   : > { %p6396_p9 = pnand %p6395_p7, %p6389_p1 }
 0x18e   : > { %6399 = shalt.err (!%p6396_p9)
}
 0x18f   : > { %5871 = dma.hbm_to_vmem [thread:$0]  (!%p8115_p6), %s8118_s8, 2048, %s7275_s0, [#allocation15], %s8117_s17, %s8117_s17, %s8116_s15  }
 0x190   : > { %s6816_s11 = smov [#allocation19]   ;;  %s6817_s24 = smov [#allocation22]  }
 0x191   : > { %s656_s20 = sshll.u32 %s6816_s11, 4  ;;  %s683_s27 = sshll.u32 %s6817_s24, 4  ;;  %s657_s20 = int_to_ptr.vmem [resolvable:$true] %s656_s20  ;;  %s7324_s27 = int_to_ptr.vmem [resolvable:$true] %s683_s27 }
 0x192   : > { %s8119_s1 = sld [smem:[#allocation67_spill]] }
 0x198   : > { %s6400_s2 = scalar_lea.hbm %s8119_s1, 2048 }
 0x199   : > { %p6401_p3 = scmp.ne.s32.totalorder %s8119_s1, %s6400_s2  ;;  %p6407_p2 = scmp.lt.u32.totalorder %s6400_s2, %s8119_s1 }
 0x19b   : > { %p6403_p4 = pnand %p6401_p3, %p8114_p8 }
 0x19d   : > { %p6404_p12 = pneg %p6403_p4 }
 0x19f   : > { %p6409_p10 = pnand %p6407_p2, %p6404_p12 }
 0x1a1   : > { %6412 = shalt.err (!%p6409_p10)
}
 0x1a2   : > { %s6413_s18 = scalar_lea.vmem %s657_s20, 2048  ;;  %p6421_p5 = scmp.lt.s32.totalorder %s657_s20, %s657_s20 }
 0x1a3   : > { %p6414_p11 = scmp.ne.s32.totalorder %s657_s20, %s6413_s18  ;;  %p6422_p7 = scmp.lt.s32.totalorder %s6413_s18, %s6413_s18 }
 0x1a5   : > { %p6416_p1 = pnand %p6414_p11, %p8114_p8  ;;  %p6423_p9 = por %p6422_p7, %p6421_p5 }
 0x1a7   : > { %p6417_p0 = pneg %p6416_p1 }
 0x1a9   : > { %p6424_p13 = pnand %p6423_p9, %p6417_p0 }
 0x1ab   : > { %6427 = shalt.err (!%p6424_p13)
}
 0x1ac   : > { %5877 = dma.hbm_to_vmem [thread:$0]  (!%p8115_p6), %s8119_s1, 2048, %s657_s20, [#allocation18], %s8117_s17, %s8117_s17, %s8116_s15  }
 0x1ad   : > { %s8120_s16 = sld [smem:[#allocation69_spill]] }
 0x1b3   : > { %s6428_s7 = scalar_lea.hbm %s8120_s16, 16 }
 0x1b4   : > { %p6429_p3 = scmp.ne.s32.totalorder %s8120_s16, %s6428_s7  ;;  %p6435_p12 = scmp.lt.u32.totalorder %s6428_s7, %s8120_s16 }
 0x1b6   : > { %p6431_p13 = pnand %p6429_p3, %p8114_p8 }
 0x1b8   : > { %p6432_p4 = pneg %p6431_p13 }
 0x1ba   : > { %p6437_p2 = pnand %p6435_p12, %p6432_p4 }
 0x1bc   : > { %6440 = shalt.err (!%p6437_p2)
}
 0x1bd   : > { %s6441_s20 = scalar_lea.vmem %s7324_s27, 16  ;;  %s6448_s14 = scalar_lea.vmem %s7324_s27, 32 }
 0x1be   : > { %p6442_p10 = scmp.ne.s32.totalorder %s7324_s27, %s6441_s20  ;;  %p6449_p0 = scmp.lt.s32.totalorder %s7324_s27, %s7324_s27 }
 0x1bf   : > { %p6450_p5 = scmp.lt.s32.totalorder %s6448_s14, %s6441_s20 }
 0x1c0   : > { %p6444_p11 = pnand %p6442_p10, %p8114_p8 }
 0x1c1   : > { %p6451_p7 = por %p6450_p5, %p6449_p0 }
 0x1c2   : > { %p6445_p1 = pneg %p6444_p11 }
 0x1c4   : > { %p6452_p9 = pnand %p6451_p7, %p6445_p1 }
 0x1c6   : > { %6455 = shalt.err (!%p6452_p9)
}
 0x1c7   : > { %5883 = dma.hbm_to_vmem [thread:$0]  (!%p8115_p6), %s8120_s16, 16, %s7324_s27, [#allocation21]  }
 0x1c8   : > { %s6818_s24 = smov [#allocation25]   ;;  %s6819_s2 = smov [#allocation28]  }
 0x1c9   : > { %s705_s7 = sshll.u32 %s6818_s24, 4  ;;  %s727_s19 = sshll.u32 %s6819_s2, 4  ;;  %s706_s7 = int_to_ptr.vmem [resolvable:$true] %s705_s7  ;;  %s7371_s19 = int_to_ptr.vmem [resolvable:$true] %s727_s19 }
 0x1ca   : > { %s8121_s20 = sld [smem:[#allocation71_spill]] }
 0x1d0   : > { %s6456_s14 = scalar_lea.hbm %s8121_s20, 16 }
 0x1d1   : > { %p6457_p3 = scmp.ne.s32.totalorder %s8121_s20, %s6456_s14  ;;  %p6463_p12 = scmp.lt.u32.totalorder %s6456_s14, %s8121_s20 }
 0x1d3   : > { %p6459_p13 = pnand %p6457_p3, %p8114_p8 }
 0x1d5   : > { %p6460_p4 = pneg %p6459_p13 }
 0x1d7   : > { %p6465_p2 = pnand %p6463_p12, %p6460_p4 }
 0x1d9   : > { %6468 = shalt.err (!%p6465_p2)
}
 0x1da   : > { %s6469_s11 = scalar_lea.vmem %s706_s7, 16  ;;  %s6476_s24 = scalar_lea.vmem %s706_s7, 32 }
 0x1db   : > { %p6470_p10 = scmp.ne.s32.totalorder %s706_s7, %s6469_s11  ;;  %p6477_p0 = scmp.lt.s32.totalorder %s706_s7, %s706_s7 }
 0x1dc   : > { %p6478_p5 = scmp.lt.s32.totalorder %s6476_s24, %s6469_s11 }
 0x1dd   : > { %p6472_p11 = pnand %p6470_p10, %p8114_p8 }
 0x1de   : > { %p6479_p7 = por %p6478_p5, %p6477_p0 }
 0x1df   : > { %p6473_p1 = pneg %p6472_p11 }
 0x1e1   : > { %p6480_p9 = pnand %p6479_p7, %p6473_p1 }
 0x1e3   : > { %6483 = shalt.err (!%p6480_p9)
}
 0x1e4   : > { %5889 = dma.hbm_to_vmem [thread:$0]  (!%p8115_p6), %s8121_s20, 16, %s706_s7, [#allocation24]  }
 0x1e5   : > { %s8122_s18 = sld [smem:[#allocation73_spill]] }
 0x1eb   : > { %s6484_s14 = scalar_lea.hbm %s8122_s18, 16 }
 0x1ec   : > { %p6485_p3 = scmp.ne.s32.totalorder %s8122_s18, %s6484_s14  ;;  %p6491_p12 = scmp.lt.u32.totalorder %s6484_s14, %s8122_s18 }
 0x1ee   : > { %p6487_p13 = pnand %p6485_p3, %p8114_p8 }
 0x1f0   : > { %p6488_p4 = pneg %p6487_p13 }
 0x1f2   : > { %p6493_p2 = pnand %p6491_p12, %p6488_p4 }
 0x1f4   : > { %6496 = shalt.err (!%p6493_p2)
}
 0x1f5   : > { %s6497_s7 = scalar_lea.vmem %s7371_s19, 16  ;;  %s6504_s8 = scalar_lea.vmem %s7371_s19, 32 }
 0x1f6   : > { %p6498_p10 = scmp.ne.s32.totalorder %s7371_s19, %s6497_s7  ;;  %p6505_p0 = scmp.lt.s32.totalorder %s7371_s19, %s7371_s19 }
 0x1f7   : > { %p6506_p5 = scmp.lt.s32.totalorder %s6504_s8, %s6497_s7 }
 0x1f8   : > { %p6500_p11 = pnand %p6498_p10, %p8114_p8 }
 0x1f9   : > { %p6507_p7 = por %p6506_p5, %p6505_p0 }
 0x1fa   : > { %p6501_p1 = pneg %p6500_p11 }
 0x1fc   : > { %p6508_p9 = pnand %p6507_p7, %p6501_p1 }
 0x1fe   : > { %6511 = shalt.err (!%p6508_p9)
}
 0x1ff   : > { %5895 = dma.hbm_to_vmem [thread:$0]  (!%p8115_p6), %s8122_s18, 16, %s7371_s19, [#allocation27]  }
 0x200   : > { %s6820_s0 = smov [#allocation31]   ;;  %s6821_s12 = smov [#allocation34]  }
 0x201   : > { %s748_s14 = sshll.u32 %s6820_s0, 4  ;;  %s772_s27 = sshll.u32 %s6821_s12, 4  ;;  %s749_s14 = int_to_ptr.vmem [resolvable:$true] %s748_s14  ;;  %s7415_s27 = int_to_ptr.vmem [resolvable:$true] %s772_s27 }
 0x202   : > { %s8123_s7 = sld [smem:[#allocation75_spill]] }
 0x208   : > { %s6512_s8 = scalar_lea.hbm %s8123_s7, 512 }
 0x209   : > { %p6513_p3 = scmp.ne.s32.totalorder %s8123_s7, %s6512_s8  ;;  %p6519_p12 = scmp.lt.u32.totalorder %s6512_s8, %s8123_s7 }
 0x20b   : > { %p6515_p13 = pnand %p6513_p3, %p8114_p8 }
 0x20d   : > { %p6516_p4 = pneg %p6515_p13 }
 0x20f   : > { %p6521_p2 = pnand %p6519_p12, %p6516_p4 }
 0x211   : > { %6524 = shalt.err (!%p6521_p2)
}
 0x212   : > { %s6525_s2 = scalar_lea.vmem %s749_s14, 512  ;;  %p6533_p0 = scmp.lt.s32.totalorder %s749_s14, %s749_s14 }
 0x213   : > { %p6526_p10 = scmp.ne.s32.totalorder %s749_s14, %s6525_s2  ;;  %p6534_p5 = scmp.lt.s32.totalorder %s6525_s2, %s6525_s2 }
 0x215   : > { %p6528_p11 = pnand %p6526_p10, %p8114_p8  ;;  %p6535_p7 = por %p6534_p5, %p6533_p0 }
 0x217   : > { %p6529_p1 = pneg %p6528_p11 }
 0x219   : > { %p6536_p9 = pnand %p6535_p7, %p6529_p1 }
 0x21b   : > { %6539 = shalt.err (!%p6536_p9)
}
 0x21c   : > { %5901 = dma.hbm_to_vmem [thread:$0]  (!%p8115_p6), %s8123_s7, 512, %s749_s14, [#allocation30], %s8117_s17, %s8117_s17, %s8116_s15  }
 0x21d   : > { %s8124_s11 = sld [smem:[#allocation77_spill]] }
 0x223   : > { %s6540_s24 = scalar_lea.hbm %s8124_s11, 1024 }
 0x224   : > { %p6541_p3 = scmp.ne.s32.totalorder %s8124_s11, %s6540_s24  ;;  %p6547_p12 = scmp.lt.u32.totalorder %s6540_s24, %s8124_s11 }
 0x226   : > { %p6543_p13 = pnand %p6541_p3, %p8114_p8 }
 0x228   : > { %p6544_p4 = pneg %p6543_p13 }
 0x22a   : > { %p6549_p2 = pnand %p6547_p12, %p6544_p4 }
 0x22c   : > { %6552 = shalt.err (!%p6549_p2)
}
 0x22d   : > { %s6553_s14 = scalar_lea.vmem %s7415_s27, 1024  ;;  %p6561_p0 = scmp.lt.s32.totalorder %s7415_s27, %s7415_s27 }
 0x22e   : > { %p6554_p10 = scmp.ne.s32.totalorder %s7415_s27, %s6553_s14  ;;  %p6562_p5 = scmp.lt.s32.totalorder %s6553_s14, %s6553_s14 }
 0x230   : > { %p6556_p11 = pnand %p6554_p10, %p8114_p8  ;;  %p6563_p7 = por %p6562_p5, %p6561_p0 }
 0x232   : > { %p6557_p1 = pneg %p6556_p11 }
 0x234   : > { %p6564_p9 = pnand %p6563_p7, %p6557_p1 }
 0x236   : > { %6567 = shalt.err (!%p6564_p9)
}
 0x237   : > { %5907 = dma.hbm_to_vmem [thread:$0]  (!%p8115_p6), %s8124_s11, 1024, %s7415_s27, [#allocation33], %s8117_s17, %s8117_s17, %s8116_s15  }
 0x238   : > { %s6822_s0 = smov [#allocation35]   ;;  %s8125_s24 = sshll.u32 %s6800_s30, 7 }
 0x239   : > { %s786_s12 = sshll.u32 %s6822_s0, 4  ;;  %s8126_s19 = sld [smem:[#allocation57_spill]]  ;;  %s787_s12 = int_to_ptr.vmem [resolvable:$true] %s786_s12 }
 0x23a   : > { %s8127_s18 = sld [smem:[#allocation78_spill]] }
 0x23f   : > { %s7469_s2 = scalar_lea.hbm %s8126_s19, %s8125_s24 }
 0x240   : > { %s6568_s29 = scalar_lea.hbm %s8127_s18, 16 }
 0x241   : > { %p6569_p3 = scmp.ne.s32.totalorder %s8127_s18, %s6568_s29  ;;  %p6575_p12 = scmp.lt.u32.totalorder %s6568_s29, %s8127_s18 }
 0x243   : > { %p6571_p13 = pnand %p6569_p3, %p8114_p8 }
 0x245   : > { %p6572_p4 = pneg %p6571_p13 }
 0x247   : > { %p6577_p2 = pnand %p6575_p12, %p6572_p4 }
 0x249   : > { %6580 = shalt.err (!%p6577_p2)
}
 0x24a   : > { %s6581_s27 = scalar_lea.vmem %s787_s12, 16  ;;  %s6588_s7 = scalar_lea.vmem %s787_s12, 32 }
 0x24b   : > { %p6582_p10 = scmp.ne.s32.totalorder %s787_s12, %s6581_s27  ;;  %p6589_p0 = scmp.lt.s32.totalorder %s787_s12, %s787_s12 }
 0x24c   : > { %p6590_p5 = scmp.lt.s32.totalorder %s6588_s7, %s6581_s27 }
 0x24d   : > { %p6584_p11 = pnand %p6582_p10, %p8114_p8 }
 0x24e   : > { %p6591_p7 = por %p6590_p5, %p6589_p0 }
 0x24f   : > { %p6585_p1 = pneg %p6584_p11 }
 0x251   : > { %p6592_p9 = pnand %p6591_p7, %p6585_p1 }
 0x253   : > { %6595 = shalt.err (!%p6592_p9)
}
 0x254   : > { %5910 = dma.hbm_to_vmem [thread:$0]  (!%p8115_p6), %s8127_s18, 16, %s787_s12, [#allocation36]  }
 0x255   : > { %s8128_s29 = sshll.u32 %s7219_s10, 3  ;;  %s4940_s20 = sshll.u32 %s6800_s30, 4 }
 0x256   : > { %s801_s5 = scalar_lea.vmem [#allocation2], %s8128_s29  ;;  %s798_s0 = scalar_lea.sflag [#allocation3], %s7219_s10 }
 0x257   : > { %s808_s16 = sshll.u32 %s801_s5, 4  ;;  %s6596_s6 = scalar_lea.hbm %s7469_s2, 128  ;;  %s7491_s16 = int_to_ptr.vmem [resolvable:$true] %s808_s16 }
 0x258   : > { %p6597_p8 = scmp.ne.s32.totalorder %s7469_s2, %s6596_s6  ;;  %p8129_p3 = scmp.ne.s32.totalorder %s8112_s13, 0 }
 0x259   : > { %s6601_s1 = scalar_lea.hbm %s8126_s19, 256  ;;  %p6602_p6 = scmp.lt.u32.totalorder %s7469_s2, %s8126_s19 }
 0x25a   : > { %p6599_p13 = pnand %p6597_p8, %p8129_p3  ;;  %p6603_p12 = scmp.lt.u32.totalorder %s6601_s1, %s6596_s6 }
 0x25b   : > { %p6605_p10 = scmp.lt.u32.totalorder %s6596_s6, %s7469_s2 }
 0x25c   : > { %p6600_p4 = pneg %p6599_p13  ;;  %p6604_p2 = por %p6603_p12, %p6602_p6 }
 0x25e   : > { %p6606_p11 = por %p6605_p10, %p6604_p2 }
 0x260   : > { %p6607_p1 = pnand %p6606_p11, %p6600_p4 }
 0x262   : > { %6610 = shalt.err (!%p6607_p1)
}
 0x263   : > { %s6611_s12 = scalar_lea.vmem %s7491_s16, 128  ;;  %s6823_s17 = smov [#allocation2]  }
 0x264   : > { %p6612_p0 = scmp.ne.s32.totalorder %s7491_s16, %s6611_s12  ;;  %s6616_s27 = sshll.u32 %s6823_s17, 4  ;;  %s6617_s27 = int_to_ptr.vmem [resolvable:$false] %s6616_s27 }
 0x265   : > { %s6618_s7 = scalar_lea.vmem %s6617_s27, 256  ;;  %p6619_p9 = scmp.lt.s32.totalorder %s7491_s16, %s6617_s27 }
 0x266   : > { %p6614_p5 = pnand %p6612_p0, %p8129_p3  ;;  %p6620_p8 = scmp.lt.s32.totalorder %s6618_s7, %s6611_s12 }
 0x268   : > { %p6615_p7 = pneg %p6614_p5  ;;  %p6621_p13 = por %p6620_p8, %p6619_p9 }
 0x26a   : > { %p6622_p6 = pnand %p6621_p13, %p6615_p7 }
 0x26c   : > { %6625 = shalt.err (!%p6622_p6)
}
 0x26d   : > { %p8130_p4 = scmp.ne.s32.totalorder %s8110_s4, 0  ;;  %s8131_s29 = sld [smem:[#allocation59_spill]] }
 0x26e   : > { %s836_s24 = scalar_lea.vmem [#allocation7], %s7219_s10 }
 0x26f   : > { %5914 = dma.hbm_to_vmem [thread:$0]  (!%p8130_p4), %s7469_s2, 128, %s7491_s16, %s798_s0  }
 0x270   : > { %s843_s8 = sshll.u32 %s836_s24, 4  ;;  %s844_s8 = int_to_ptr.vmem [resolvable:$true] %s843_s8 }
 0x273   : > { %s8132_s5 = smov %s8131_s29  ;;  %s7521_s6 = scalar_lea.hbm %s8131_s29, %s4940_s20 }
 0x274   : > { %s6626_s1 = scalar_lea.hbm %s7521_s6, 16  ;;  %s6631_s16 = scalar_lea.hbm %s8132_s5, 32 }
 0x275   : > { %p6627_p12 = scmp.ne.s32.totalorder %s7521_s6, %s6626_s1  ;;  %p6632_p11 = scmp.lt.u32.totalorder %s7521_s6, %s8132_s5 }
 0x276   : > { %p6633_p1 = scmp.lt.u32.totalorder %s6631_s16, %s6626_s1  ;;  %p6635_p5 = scmp.lt.u32.totalorder %s6626_s1, %s7521_s6 }
 0x277   : > { %p6629_p2 = pnand %p6627_p12, %p8129_p3 }
 0x278   : > { %p6634_p0 = por %p6633_p1, %p6632_p11 }
 0x279   : > { %p6630_p10 = pneg %p6629_p2 }
 0x27a   : > { %p6636_p7 = por %p6635_p5, %p6634_p0 }
 0x27c   : > { %p6637_p9 = pnand %p6636_p7, %p6630_p10 }
 0x27e   : > { %6640 = shalt.err (!%p6637_p9)
}
 0x27f   : > { %s6641_s12 = scalar_lea.vmem %s844_s8, 16  ;;  %s6824_s17 = smov [#allocation7]  }
 0x280   : > { %p6642_p8 = scmp.ne.s32.totalorder %s844_s8, %s6641_s12  ;;  %s6646_s27 = sshll.u32 %s6824_s17, 4  ;;  %s6647_s27 = int_to_ptr.vmem [resolvable:$false] %s6646_s27 }
 0x281   : > { %s6648_s7 = scalar_lea.vmem %s6647_s27, 32  ;;  %p6649_p12 = scmp.lt.s32.totalorder %s844_s8, %s6647_s27 }
 0x282   : > { %p6644_p13 = pnand %p6642_p8, %p8129_p3  ;;  %p6650_p2 = scmp.lt.s32.totalorder %s6648_s7, %s6641_s12 }
 0x284   : > { %p6645_p6 = pneg %p6644_p13  ;;  %p6651_p4 = por %p6650_p2, %p6649_p12 }
 0x286   : > { %p6652_p1 = pnand %p6651_p4, %p6645_p6 }
 0x288   : > { %6655 = shalt.err (!%p6652_p1)
}
 0x289   : > { %p8133_p11 = scmp.ne.s32.totalorder %s8110_s4, 0  ;;  %s8134_s29 = sld [smem:[#allocation60_spill]] }
 0x28a   : > { %s853_s14 = scalar_lea.vmem [#allocation8], %s7219_s10  ;;  %s8136_s16 = sand.u32 1, %s6800_s30  }
 0x28b   : > { %5920 = dma.hbm_to_vmem [thread:$0]  (!%p8133_p11), %s7521_s6, 16, %s844_s8, %s7245_s9  }
 0x28c   : > { %s860_s2 = sshll.u32 %s853_s14, 4  ;;  %s851_s0 = scalar_lea.sflag [#allocation9], %s8136_s16  ;;  %s861_s2 = int_to_ptr.vmem [resolvable:$true] %s860_s2 }
 0x28f   : > { %s8135_s24 = smov %s8134_s29  ;;  %s7547_s1 = scalar_lea.hbm %s8134_s29, %s4940_s20 }
 0x290   : > { %s6656_s15 = scalar_lea.hbm %s7547_s1, 16  ;;  %s6661_s8 = scalar_lea.hbm %s8135_s24, 32 }
 0x291   : > { %p6657_p4 = scmp.ne.s32.totalorder %s7547_s1, %s6656_s15  ;;  %p6662_p5 = scmp.lt.u32.totalorder %s7547_s1, %s8135_s24 }
 0x292   : > { %p6663_p7 = scmp.lt.u32.totalorder %s6661_s8, %s6656_s15  ;;  %p6665_p8 = scmp.lt.u32.totalorder %s6656_s15, %s7547_s1 }
 0x293   : > { %p6659_p10 = pnand %p6657_p4, %p8129_p3 }
 0x294   : > { %p6664_p9 = por %p6663_p7, %p6662_p5 }
 0x295   : > { %p6660_p0 = pneg %p6659_p10 }
 0x296   : > { %p6666_p13 = por %p6665_p8, %p6664_p9 }
 0x298   : > { %p6667_p6 = pnand %p6666_p13, %p6660_p0 }
 0x29a   : > { %6670 = shalt.err (!%p6667_p6)
}
 0x29b   : > { %s6671_s10 = scalar_lea.vmem %s861_s2, 16  ;;  %s6825_s17 = smov [#allocation8]  }
 0x29c   : > { %p6672_p12 = scmp.ne.s32.totalorder %s861_s2, %s6671_s10  ;;  %s6676_s27 = sshll.u32 %s6825_s17, 4  ;;  %s6677_s27 = int_to_ptr.vmem [resolvable:$false] %s6676_s27 }
 0x29d   : > { %s6678_s7 = scalar_lea.vmem %s6677_s27, 32  ;;  %p6679_p4 = scmp.lt.s32.totalorder %s861_s2, %s6677_s27 }
 0x29e   : > { %p6674_p2 = pnand %p6672_p12, %p8129_p3  ;;  %p6680_p10 = scmp.lt.s32.totalorder %s6678_s7, %s6671_s10 }
 0x2a0   : > { %p6675_p1 = pneg %p6674_p2  ;;  %p6681_p11 = por %p6680_p10, %p6679_p4 }
 0x2a2   : > { %p6682_p5 = pnand %p6681_p11, %p6675_p1 }
 0x2a4   : > { %6685 = shalt.err (!%p6682_p5)
}
 0x2a5   : > { %p8137_p7 = scmp.ne.s32.totalorder %s8110_s4, 0  ;;  %s8138_s21 = sld [smem:[#allocation53_spill]] }
 0x2a7   : > { %5923 = dma.hbm_to_vmem [thread:$0]  (!%p8137_p7), %s7547_s1, 16, %s861_s2, %s851_s0  }
 0x2ab   : > { %p8139_p0 = scmp.ne.s32.totalorder %s8138_s21, 0 }
 0x2ac   : > { %s7572_s13 = sand.u32 (!%p8139_p0), 1, %s6792_s28   ;;  %p8140_p3 = scmp.ne.s32.totalorder (!%p8139_p0), %s8106_s25, 0 }
 0x2ad   : > { %869 = sbr.rel (%p8139_p0) target bundleno = 4753 (0x1291), region = 108  ;;  %s7575_s26 = sshll.u32 (!%p8139_p0), %s7572_s13, 3 }
 0x2ae   : > { %s872_s29 = scalar_lea.sflag (!%p8139_p0), [#allocation3], %s7572_s13  ;;  %s875_s14 = scalar_lea.vmem (!%p8139_p0), [#allocation2], %s7575_s26 }
 0x2b4   : > { %6731 = dma.done.wait (%p8140_p3), %s872_s29, 128  }
 0x2b5   : > { %6733 = vsyncadd (%p8140_p3), %s872_s29, 4294967168  ;;  %s880_s4 = sand.u32 1, %s6969_s23   ;;  %s884_s2 = scalar_lea.vmem [#allocation5], %s7575_s26 }
 0x2b6   : > { %s881_s1 = scalar_lea.sflag [#allocation6], %s880_s4 }
 0x2b7   : > { %6735 = dma.done.wait (%p8140_p3), %s881_s1, 144  }
 0x2b8   : > { %6737 = vsyncadd (%p8140_p3), %s881_s1, 4294967152  ;;  %s892_s16 = scalar_lea.vmem [#allocation7], %s7572_s13  ;;  %s898_s0 = scalar_lea.sflag [#allocation9], %s880_s4 }
 0x2b9   : > { %s900_s15 = scalar_lea.vmem [#allocation8], %s7572_s13 }
 0x2ba   : > { %6739 = dma.done.wait (%p8140_p3), %s898_s0, 16  }
 0x2bb   : > { %6741 = vsyncadd (%p8140_p3), %s898_s0, 4294967280  ;;  %p8141_p11 = scmp.eq.s32.totalorder %s6969_s23, 0 }
 0x2bd   : > { %6743 = dma.done.wait (%p8141_p11), [#allocation9], 2048   ;;  %p8142_p9 = pmov %p8141_p11 }
 0x2bf   : > { %6745 = vsyncadd (%p8142_p9), [#allocation9], 4294965248  ;;  %p8143_p8 = pmov %p8142_p9 }
 0x2c1   : > { %6747 = dma.done.wait (%p8143_p8), [#allocation12], 4096   ;;  %p8144_p13 = pmov %p8143_p8 }
 0x2c2   : > { %p8145_p6 = pmov %p8143_p8 }
 0x2c3   : > { %6749 = vsyncadd (%p8144_p13), [#allocation12], 4294963200 }
 0x2c4   : > { %6751 = dma.done.wait (%p8145_p6), [#allocation15], 2560   ;;  %p8146_p12 = pmov %p8145_p6 }
 0x2c5   : > { %p8147_p2 = pmov %p8145_p6 }
 0x2c6   : > { %6753 = vsyncadd (%p8146_p12), [#allocation15], 4294964736 }
 0x2c7   : > { %6755 = dma.done.wait (%p8147_p2), [#allocation18], 4096   ;;  %p8148_p1 = pmov %p8147_p2 }
 0x2c9   : > { %6757 = vsyncadd (%p8148_p1), [#allocation18], 4294963200  ;;  %p8149_p4 = pmov %p8148_p1 }
 0x2ca   : > { %p8150_p10 = pmov %p8148_p1 }
 0x2cb   : > { %6759 = dma.done.wait (%p8149_p4), [#allocation21], 528  }
 0x2cc   : > { %6761 = vsyncadd (%p8150_p10), [#allocation21], 4294966768  ;;  %p8151_p5 = pmov %p8148_p1 }
 0x2cd   : > { %p8152_p7 = pmov %p8148_p1 }
 0x2ce   : > { %6763 = dma.done.wait (%p8151_p5), [#allocation24], 32  }
 0x2cf   : > { %6765 = vsyncadd (%p8152_p7), [#allocation24], 4294967264  ;;  %p8153_p0 = pmov %p8148_p1 }
 0x2d1   : > { %6767 = dma.done.wait (%p8153_p0), [#allocation27], 32   ;;  %p8154_p3 = pmov %p8153_p0 }
 0x2d2   : > { %p8155_p11 = pmov %p8153_p0 }
 0x2d3   : > { %6769 = vsyncadd (%p8154_p3), [#allocation27], 4294967264 }
 0x2d4   : > { %6771 = dma.done.wait (%p8155_p11), [#allocation30], 528   ;;  %p8156_p9 = pmov %p8153_p0 }
 0x2d5   : > { %p8157_p8 = pmov %p8153_p0 }
 0x2d6   : > { %6773 = vsyncadd (%p8156_p9), [#allocation30], 4294966768 }
 0x2d7   : > { %6775 = dma.done.wait (%p8157_p8), [#allocation33], 1040   ;;  %p8158_p13 = pmov %p8153_p0 }
 0x2d8   : > { %p8159_p6 = pmov %p8153_p0 }
 0x2d9   : > { %6777 = vsyncadd (%p8158_p13), [#allocation33], 4294966256 }
 0x2da   : > { %6779 = dma.done.wait (%p8159_p6), [#allocation36], 16   ;;  %p8160_p12 = pmov %p8153_p0 }
 0x2db   : > { %v6826_v0 = vmov 0.0|0.0   ;;  %vm6827_vm0 = vmmov 0   ;;  %v6828_v1 = vmov 0.0   ;;  %v1067_v2 = vld [vmem:[#allocation10] sm:$0xff]  ;;  %v1068_v3 = vld [vmem:[#allocation10 + $0x8] sm:$0xff]  ;;  %v1069_v7 = vld [vmem:[#allocation10 + $0x10] sm:$0xff] }
 0x2dc   : > { %6781 = vsyncadd (%p8160_p12), [#allocation36], 4294967280  ;;  %5600 = vmatprep.subr.bf16.mxu1 %v6826_v0  ;;  %5612 = vmatprep.subr.bf16.mxu0 %v6826_v0  ;;  %v1075_v4 = vld [vmem:[#allocation10 + $0x40] sm:$0xff]  ;;  %v5601_v5 = vpack.c.bf16 %v1068_v3, %v1067_v2  ;;  %v1076_v6 = vld [vmem:[#allocation10 + $0x48] sm:$0xff]  ;;  %vm1119_vm1 = vcmask 261120   ;;  %vm1967_vm2 = vcmask 64512  }
 0x2dd   : > { %5212 = vmatprep.mubr.msk.f32.mxu1 %vm6827_vm0, %v6828_v1  ;;  %5234 = vmatprep.mubr.msk.f32.mxu0 %vm6827_vm0, %v6828_v1  ;;  %v1070_v8 = vld [vmem:[#allocation10 + $0x18] sm:$0xff]  ;;  %v5613_v9 = vpack.c.bf16 %v1076_v6, %v1075_v4  ;;  %v1077_v10 = vld [vmem:[#allocation10 + $0x50] sm:$0xff]  ;;  %v1071_v14 = vld [vmem:[#allocation10 + $0x20] sm:$0xff]  ;;  %s6829_s25 = smov 16   ;;  %s6830_s9 = smov 8   ;;  %vm2621_vm5 = vcmask 130048  }
 0x2de   : > { %v1078_v11 = vld [vmem:[#allocation10 + $0x58] sm:$0xff]  ;;  %5602 = vmatpush3.bf16.msra.mxu1 %v5601_v5  ;;  %v5604_v12 = vpack.c.bf16 %v1070_v8, %v1069_v7  ;;  %v1072_v15 = vld [vmem:[#allocation10 + $0x28] sm:$0xff]  ;;  %v1083_v16 = vld [vmem:[#allocation11] sm:$0xff]  ;;  %s6831_s6 = smov 24   ;;  %vm2623_vm6 = vcmask 195584   ;;  %vm4495_vm8 = vcmask 523264  }
 0x2df   : > { %5614 = vmatpush3.bf16.msra.mxu0 %v5613_v9  ;;  %5603 = vmatprep.subr.bf16.mxu1 %v6826_v0  ;;  %v5616_v13 = vpack.c.bf16 %v1078_v11, %v1077_v10  ;;  %v1084_v17 = vld [vmem:[#allocation11 + $0x8] sm:$0xff]  ;;  %v5607_v19 = vpack.c.bf16 %v1072_v15, %v1071_v14  ;;  %v1073_v21 = vld [vmem:[#allocation10 + $0x30] sm:$0xff]  ;;  %v1074_v22 = vld [vmem:[#allocation10 + $0x38] sm:$0xff]  ;;  %s5025_s8 = sshll.u32 %s6969_s23, 7  ;;  %s1045_s20 = scalar_lea.vmem [#allocation37], %s7575_s26 }
 0x2e0   : > { %5615 = vmatprep.subr.bf16.mxu0 %v6826_v0  ;;  %v7645_v18 = vld [vmem:[%s875_s14] sm:$0xff]  ;;  %v5625_v20 = vpack.c.bf16 %v1084_v17, %v1083_v16  ;;  %v1085_v23 = vld [vmem:[#allocation11 + $0x10] sm:$0xff]  ;;  %v5610_v25 = vpack.c.bf16 %v1074_v22, %v1073_v21  ;;  %s4614_s12 = sshll.u32 %s1045_s20, 4  ;;  %s8161_s27 = sld [smem:[#allocation79_spill]]  ;;  %s7952_s12 = int_to_ptr.vmem [resolvable:$true] %s4614_s12 }
 0x2e1   : > { %v1086_v24 = vld [vmem:[#allocation11 + $0x18] sm:$0xff]  ;;  %v1079_v27 = vld [vmem:[#allocation10 + $0x60] sm:$0xff]  ;;  %v1080_v28 = vld [vmem:[#allocation10 + $0x68] sm:$0xff]  ;;  %s4601_s21 = scalar_lea.sflag [#allocation4], %s7572_s13  ;;  %s6686_s29 = scalar_lea.vmem %s7952_s12, 128 }
 0x2e2   : > { %5605 = vmatpush3.bf16.msra.mxu1 %v5604_v12  ;;  %v5628_v26 = vpack.c.bf16 %v1086_v24, %v1085_v23  ;;  %v1091_v29 = vld [vmem:[#allocation11 + $0x40] sm:$0xff]  ;;  %v1092_v30 = vld [vmem:[#allocation11 + $0x48] sm:$0xff]  ;;  %v5619_v31 = vpack.c.bf16 %v1080_v28, %v1079_v27  ;;  %v1081_v33 = vld [vmem:[#allocation10 + $0x70] sm:$0xff]  ;;  %p6687_p2 = scmp.ne.s32.totalorder %s7952_s12, %s6686_s29  ;;  %p8162_p1 = scmp.ne.s32.totalorder %s8107_s22, 0 }
 0x2e3   : > { %5617 = vmatpush3.bf16.msra.mxu0 %v5616_v13  ;;  %5606 = vmatprep.subr.bf16.mxu1 %v6826_v0  ;;  %v5637_v32 = vpack.c.bf16 %v1092_v30, %v1091_v29  ;;  %v1082_v34 = vld [vmem:[#allocation10 + $0x78] sm:$0xff]  ;;  %v1093_v35 = vld [vmem:[#allocation11 + $0x50] sm:$0xff]  ;;  %v1087_v39 = vld [vmem:[#allocation11 + $0x20] sm:$0xff]  ;;  %s6832_s23 = smov [#allocation37]  }
 0x2e4   : > { %5624 = vmatprep.subr.bf16.mxu0 %v6826_v0  ;;  %v1094_v36 = vld [vmem:[#allocation11 + $0x58] sm:$0xff]  ;;  %v5622_v37 = vpack.c.bf16 %v1082_v34, %v1081_v33  ;;  %v1088_v40 = vld [vmem:[#allocation11 + $0x28] sm:$0xff]  ;;  %v1099_v41 = vld [vmem:[#allocation13] sm:$0xff]  ;;  %p6688_p4 = pnand %p6687_p2, %p8162_p1  ;;  %s6690_s26 = sshll.u32 %s6832_s23, 4  ;;  %s6691_s26 = int_to_ptr.vmem [resolvable:$false] %s6690_s26 }
 0x2e5   : > { %5213 = vmatmul.mubr.msk.f32.vlgmr.msra.gmra.mrb[0].mxu1 %vm1119_vm1, %v7645_v18  ;;  %v5640_v38 = vpack.c.bf16 %v1094_v36, %v1093_v35  ;;  %v1100_v42 = vld [vmem:[#allocation13 + $0x8] sm:$0xff]  ;;  %v5631_v43 = vpack.c.bf16 %v1088_v40, %v1087_v39  ;;  %v1089_v44 = vld [vmem:[#allocation11 + $0x30] sm:$0xff]  ;;  %v1090_v45 = vld [vmem:[#allocation11 + $0x38] sm:$0xff]  ;;  %s6692_s14 = scalar_lea.vmem %s6691_s26, 256  ;;  %p6693_p5 = scmp.lt.s32.totalorder %s7952_s12, %s6691_s26 }
 0x2e6   : > { %5608 = vmatpush3.bf16.msra.mxu1 %v5607_v19  ;;  %5235 = vmatmul.mubr.msk.f32.vlgmr.msra.gmra.mrb[0].mxu0 %vm1119_vm1, %v7645_v18  ;;  %v5649_v46 = vpack.c.bf16 %v1100_v42, %v1099_v41  ;;  %v1101_v47 = vld [vmem:[#allocation13 + $0x10] sm:$0xff]  ;;  %v1102_v48 = vld [vmem:[#allocation13 + $0x18] sm:$0xff]  ;;  %v5634_v49 = vpack.c.bf16 %v1090_v45, %v1089_v44  ;;  %v1095_v50 = vld [vmem:[#allocation11 + $0x60] sm:$0xff]  ;;  %v1048_v42 = vlaneseq  ;;  %s7950_s7 = scalar_lea.hbm %s8161_s27, %s5025_s8  ;;  %p6689_p10 = pneg %p6688_p4 }
 0x2e7   : > { %5626 = vmatpush3.bf16.msra.mxu0 %v5625_v20  ;;  %5609 = vmatprep.subr.bf16.mxu1 %v6826_v0  ;;  %v1096_v51 = vld [vmem:[#allocation11 + $0x68] sm:$0xff]  ;;  %v5652_v52 = vpack.c.bf16 %v1102_v48, %v1101_v47  ;;  %v1107_v53 = vld [vmem:[#allocation13 + $0x40] sm:$0xff]  ;;  %v1097_v56 = vld [vmem:[#allocation11 + $0x70] sm:$0xff]  ;;  %p6694_p7 = scmp.lt.s32.totalorder %s6692_s14, %s6686_s29 }
 0x2e8   : > { %5627 = vmatprep.subr.bf16.mxu0 %v6826_v0  ;;  %5223 = vmatprep.mubr.msk.f32.mxu1 %vm6827_vm0, %v6828_v1  ;;  %v1108_v54 = vld [vmem:[#allocation13 + $0x48] sm:$0xff]  ;;  %v5643_v55 = vpack.c.bf16 %v1096_v51, %v1095_v50  ;;  %v1098_v57 = vld [vmem:[#allocation11 + $0x78] sm:$0xff]  ;;  %v1109_v60 = vld [vmem:[#allocation13 + $0x50] sm:$0xff]  ;;  %v7745_v44 = vshrl.u32 %v1048_v42, 7  ;;  %v1051_v45 = vand.u32 127, %v1048_v42 }
 0x2e9   : > { %5256 = vmatprep.mubr.msk.f32.mxu0 %vm6827_vm0, %v6828_v1  ;;  %v5661_v58 = vpack.c.bf16 %v1108_v54, %v1107_v53  ;;  %v5646_v59 = vpack.c.bf16 %v1098_v57, %v1097_v56  ;;  %v1110_v61 = vld [vmem:[#allocation13 + $0x58] sm:$0xff]  ;;  %v1103_v63 = vld [vmem:[#allocation13 + $0x20] sm:$0xff]  ;;  %v1104_v2 = vld [vmem:[#allocation13 + $0x28] sm:$0xff]  ;;  %p6695_p0 = por %p6694_p7, %p6693_p5 }
 0x2ea   : > { %5611 = vmatpush3.bf16.msra.mxu1 %v5610_v25  ;;  %v5664_v62 = vpack.c.bf16 %v1110_v61, %v1109_v60  ;;  %v5655_v3 = vpack.c.bf16 %v1104_v2, %v1103_v63  ;;  %v1105_v4 = vld [vmem:[#allocation13 + $0x30] sm:$0xff]  ;;  %v1106_v5 = vld [vmem:[#allocation13 + $0x38] sm:$0xff]  ;;  %v1111_v7 = vld [vmem:[#allocation13 + $0x60] sm:$0xff]  ;;  %vm1052_vm4 = vcmp.gt.s32.totalorder %v1051_v45, %v7745_v44 }
 0x2eb   : > { %5629 = vmatpush3.bf16.msra.mxu0 %v5628_v26  ;;  %5618 = vmatprep.subr.bf16.mxu1 %v6826_v0  ;;  %v5658_v6 = vpack.c.bf16 %v1106_v5, %v1105_v4  ;;  %v1112_v8 = vld [vmem:[#allocation13 + $0x68] sm:$0xff]  ;;  %v1113_v10 = vld [vmem:[#allocation13 + $0x70] sm:$0xff]  ;;  %v1114_v11 = vld [vmem:[#allocation13 + $0x78] sm:$0xff]  ;;  %p6696_p3 = pnand %p6695_p0, %p6689_p10 }
 0x2ec   : > { %5636 = vmatprep.subr.bf16.mxu0 %v6826_v0  ;;  %v5667_v9 = vpack.c.bf16 %v1112_v8, %v1111_v7  ;;  %v5670_v12 = vpack.c.bf16 %v1114_v11, %v1113_v10  ;;  %v1116_v42 = vld [vmem:[#allocation14 + $0x8] sm:$0xff] }
 0x2ed   : > { %5224 = vmatmul.mubr.msk.f32.vlgmr.msra.gmra.mrb[2].mxu1 %vm1119_vm1, %v7645_v18 }
 0x2ee   : > { %5257 = vmatmul.mubr.msk.f32.vlgmr.msra.gmra.mrb[2].mxu0 %vm1119_vm1, %v7645_v18  ;;  %5620 = vmatpush3.bf16.msra.mxu1 %v5619_v31 }
 0x2ef   : > { %5638 = vmatpush3.bf16.msra.mxu0 %v5637_v32  ;;  %5621 = vmatprep.subr.bf16.mxu1 %v6826_v0 }
 0x2f0   : > { %5639 = vmatprep.subr.bf16.mxu0 %v6826_v0  ;;  %5245 = vmatprep.mubr.msk.f32.mxu1 %vm6827_vm0, %v6828_v1 }
 0x2f1   : > { %5278 = vmatprep.mubr.msk.f32.mxu0 %vm6827_vm0, %v6828_v1 }
 0x2f2   : > { %5623 = vmatpush3.bf16.msra.mxu1 %v5622_v37 }
 0x2f3   : > { %5641 = vmatpush3.bf16.msra.mxu0 %v5640_v38  ;;  %5630 = vmatprep.subr.bf16.mxu1 %v6826_v0 }
 0x2f4   : > { %5648 = vmatprep.subr.bf16.mxu0 %v6826_v0 }
 0x2f5   : > { %5246 = vmatmul.mubr.msk.f32.vlgmr.msra.gmra.mrb[4].mxu1 %vm1119_vm1, %v7645_v18 }
 0x2f6   : > { %5279 = vmatmul.mubr.msk.f32.vlgmr.msra.gmra.mrb[4].mxu0 %vm1119_vm1, %v7645_v18  ;;  %5632 = vmatpush3.bf16.msra.mxu1 %v5631_v43  ;;  %v1054_v43 = vld [vmem:[%s892_s16] sm:$0x1] }
 0x2f7   : > { %5633 = vmatprep.subr.bf16.mxu1 %v6826_v0  ;;  %5267 = vmatprep.mubr.msk.f32.mxu1 %vm6827_vm0, %v6828_v1  ;;  %vm1055_vm3 = vcmp.gt.f32.partialorder %v1054_v43, 0.5  ;;  %v1117_v43 = vld [vmem:[#allocation14 + $0x10] sm:$0xff] }
 0x2f8   : > { %5650 = vmatpush3.bf16.msra.mxu0 %v5649_v46  ;;  %5300 = vmatprep.mubr.msk.f32.mxu0 %vm6827_vm0, %v6828_v1  ;;  %v1060_v46 = vsub.s32 0, %v7745_v44  ;;  %v1056_v47 = vsel %vm1055_vm3, -1e+09, %v6828_v1 }
 0x2f9   : > { %5651 = vmatprep.subr.bf16.mxu0 %v6826_v0 }
 0x2fa   : > { %5635 = vmatpush3.bf16.msra.mxu1 %v5634_v49  ;;  %v1061_v48 = vrot.slane %v1056_v47, %v1060_v46  ;;  %v1053_v49 = vsel %vm1052_vm4, -1e+09, %v6828_v1  ;;  %v1118_v47 = vld [vmem:[#allocation14 + $0x18] sm:$0xff] }
 0x2fb   : > { %5642 = vmatprep.subr.bf16.mxu1 %v6826_v0 }
 0x2fc   : > { %5653 = vmatpush3.bf16.msra.mxu0 %v5652_v52  ;;  %v1063_v50 = vadd.f32 %v1061_v48, %v1053_v49 }
 0x2fd   : > { %5268 = vmatmul.mubr.msk.f32.vlgmr.msra.gmra.mrb[6].mxu1 %vm1119_vm1, %v7645_v18  ;;  %5660 = vmatprep.subr.bf16.mxu0 %v6826_v0 }
 0x2fe   : > { %5644 = vmatpush3.bf16.msra.mxu1 %v5643_v55  ;;  %5289 = vmatprep.mubr.msk.f32.mxu1 %vm6827_vm0, %v6828_v1 }
 0x2ff   : > { %5645 = vmatprep.subr.bf16.mxu1 %v6826_v0  ;;  %5301 = vmatmul.mubr.msk.f32.vlgmr.msra.gmra.mrb[6].mxu0 %vm1119_vm1, %v7645_v18 }
 0x300   : > { %5662 = vmatpush3.bf16.msra.mxu0 %v5661_v58  ;;  %5322 = vmatprep.mubr.msk.f32.mxu0 %vm6827_vm0, %v6828_v1 }
 0x301   : > { %5663 = vmatprep.subr.bf16.mxu0 %v6826_v0 }
 0x302   : > { %5647 = vmatpush3.bf16.msra.mxu1 %v5646_v59 }
 0x303   : > { %5654 = vmatprep.subr.bf16.mxu1 %v6826_v0 }
 0x304   : > { %5665 = vmatpush3.bf16.msra.mxu0 %v5664_v62 }
 0x305   : > { %5290 = vmatmul.mubr.msk.f32.vlgmr.msra.gmra.mrb[8].mxu1 %vm1119_vm1, %v7645_v18  ;;  %5336 = vmatprep.subr.mxu0 %v6828_v1 }
 0x306   : > { %5311 = vmatprep.mubr.msk.f32.mxu1 %vm6827_vm0, %v6828_v1  ;;  %5656 = vmatpush3.bf16.msra.mxu1 %v5655_v3 }
 0x307   : > { %5323 = vmatmul.mubr.msk.f32.vlgmr.msra.gmra.mrb[8].mxu0 %vm1119_vm1, %v7645_v18  ;;  %5657 = vmatprep.subr.bf16.mxu1 %v6826_v0 }
 0x308   : > { %5338 = vmatprep.mubr.msk.f32.mxu0 %vm6827_vm0, %v6828_v1 }
 0x30a   : > { %5659 = vmatpush3.bf16.msra.mxu1 %v5658_v6 }
 0x30b   : > { %5666 = vmatprep.subr.bf16.mxu1 %v6826_v0 }
 0x30d   : > { %5312 = vmatmul.mubr.msk.f32.vlgmr.msra.gmra.mrb[10].mxu1 %vm1119_vm1, %v7645_v18 }
 0x30e   : > { %5668 = vmatpush3.bf16.msra.mxu1 %v5667_v9  ;;  %5333 = vmatprep.mubr.msk.f32.mxu1 %vm6827_vm0, %v6828_v1 }
 0x30f   : > { %5669 = vmatprep.subr.bf16.mxu1 %v6826_v0 }
 0x312   : > { %5671 = vmatpush3.bf16.msra.mxu1 %v5670_v12 }
 0x313   : > { %5341 = vmatprep.subr.mxu1 %v6828_v1 }
 0x315   : > { %5334 = vmatmul.mubr.msk.f32.vlgmr.msra.gmra.mrb[12].mxu1 %vm1119_vm1, %v7645_v18 }
 0x316   : > { %5343 = vmatprep.mubr.msk.f32.mxu1 %vm6827_vm0, %v6828_v1 }
 0x3b8   : > { %v1189_v13 = vpop.f32.mrb[0].mxu1 }
 0x3b9   : > { %v5214_v14 = vpop.f32.mrb[1].mxu1  ;;  %v1329_v15 = vpop.f32.mrb[0].mxu0  ;;  %v1403_v22 = vmul.f32 0.35355338, %v1189_v13 }
 0x3ba   : > { %v5236_v16 = vpop.f32.mrb[1].mxu0  ;;  %v1405_v27 = vmul.f32 0.35355338, %v1329_v15 }
 0x3c0   : > { %v1259_v17 = vpop.f32.mrb[2].mxu1 }
 0x3c1   : > { %v1473_v19 = vpop.f32.mrb[2].mxu0  ;;  %v5225_v20 = vpop.f32.mrb[3].mxu1  ;;  %v1404_v30 = vmul.f32 0.35355338, %v1259_v17 }
 0x3c2   : > { %5337 = vmatpush3.xpose.msk.msra.mxu0 %vm1967_vm2, %v1473_v19  ;;  %v5258_v21 = vpop.f32.mrb[3].mxu0 }
 0x3c3   : > { %5346 = vmatprep.subr.mxu0 %v6828_v1 }
 0x3c5   : > { %5339 = vmatmul.mubr.msk.f32.vlgmr.msra.gmra.mrb[10].mxu0 %vm1967_vm2, %v1403_v22 }
 0x3c6   : > { %5348 = vmatprep.mubr.msk.f32.mxu0 %vm6827_vm0, %v6828_v1 }
 0x3c8   : > { %v1399_v23 = vpop.f32.mrb[4].mxu1 }
 0x3c9   : > { %v1613_v24 = vpop.f32.mrb[4].mxu0  ;;  %v5247_v25 = vpop.f32.mrb[5].mxu1  ;;  %v1406_v35 = vmul.f32 0.35355338, %v1399_v23 }
 0x3ca   : > { %5347 = vmatpush3.xpose.msk.msra.mxu0 %vm1967_vm2, %v1613_v24  ;;  %v5280_v26 = vpop.f32.mrb[5].mxu0 }
 0x3cb   : > { %5356 = vmatprep.subr.mxu0 %v6828_v1 }
 0x3cd   : > { %5349 = vmatmul.mubr.msk.f32.vlgmr.msra.gmra.mrb[12].mxu0 %vm1967_vm2, %v1405_v27 }
 0x3ce   : > { %5358 = vmatprep.mubr.msk.f32.mxu0 %vm6827_vm0, %v6828_v1 }
 0x3d0   : > { %v1543_v28 = vpop.f32.mrb[6].mxu1 }
 0x3d1   : > { %v5269_v29 = vpop.f32.mrb[7].mxu1  ;;  %5342 = vmatpush3.xpose.msk.msra.mxu1 %vm1967_vm2, %v1543_v28 }
 0x3d2   : > { %5351 = vmatprep.subr.mxu1 %v6828_v1  ;;  %v1753_v31 = vpop.f32.mrb[6].mxu0 }
 0x3d3   : > { %v5302_v32 = vpop.f32.mrb[7].mxu0  ;;  %5357 = vmatpush3.msra.mxu0 %v1753_v31 }
 0x3d4   : > { %5344 = vmatmul.mubr.msk.f32.vlgmr.msra.gmra.mrb[14].mxu1 %vm1967_vm2, %v1404_v30  ;;  %5366 = vmatprep.subr.mxu0 %v6828_v1 }
 0x3d5   : > { %5353 = vmatprep.mubr.msk.f32.mxu1 %vm6827_vm0, %v6828_v1 }
 0x3d8   : > { %v1683_v33 = vpop.f32.mrb[8].mxu1 }
 0x3d9   : > { %v5291_v34 = vpop.f32.mrb[9].mxu1  ;;  %5352 = vmatpush3.xpose.msk.msra.mxu1 %vm1967_vm2, %v1683_v33 }
 0x3da   : > { %5361 = vmatprep.subr.mxu1 %v6828_v1  ;;  %v7738_v36 = vpop.f32.mrb[8].mxu0 }
 0x3db   : > { %v5324_v37 = vpop.f32.mrb[9].mxu0 }
 0x3dc   : > { %5354 = vmatmul.mubr.msk.f32.vlgmr.msra.gmra.mrb[16].mxu1 %vm1967_vm2, %v1406_v35 }
 0x3dd   : > { %5363 = vmatprep.mubr.msk.f32.mxu1 %vm6827_vm0, %v6828_v1 }
 0x3e0   : > { %v1823_v38 = vpop.f32.mrb[10].mxu1 }
 0x3e1   : > { %v5313_v39 = vpop.f32.mrb[11].mxu1  ;;  %5362 = vmatpush3.msra.mxu1 %v1823_v38 }
 0x3e2   : > { %5371 = vmatprep.subr.mxu1 %v6828_v1 }
 0x3e8   : > { %v7741_v40 = vpop.f32.mrb[12].mxu1 }
 0x3e9   : > { %v5335_v41 = vpop.f32.mrb[13].mxu1 }
 0x3ea   : > { %v1115_v41 = vld [vmem:[#allocation14] sm:$0xff] }
 0x3eb   : > { %v5673_v45 = vpack.c.bf16 %v1116_v42, %v1115_v41  ;;  %v2745_v41 = vld [vmem:[#allocation17] sm:$0xff]  ;;  %v2746_v42 = vld [vmem:[#allocation17 + $0x8] sm:$0xff] }
 0x498   : > { %v2040_v51 = vpop.f32.mrb[10].mxu0 }
 0x499   : > { %v2041_v52 = vadd.f32 %v2040_v51, %v1063_v50  ;;  %v5340_v53 = vpop.f32.mrb[11].mxu0 }
 0x49b   : > { %v2272_v54 = vsel %vm1967_vm2, %v2041_v52, -inf }
 0x49c   : > { %2273 = vmax.xlane.f32.xlu0 %v2272_v54 }
 0x4a0   : > { %v2192_v55 = vpop.f32.mrb[12].mxu0 }
 0x4a1   : > { %v2193_v56 = vadd.f32 %v2192_v55, %v1063_v50  ;;  %v5350_v57 = vpop.f32.mrb[13].mxu0 }
 0x4a3   : > { %v2278_v58 = vsel %vm1967_vm2, %v2193_v56, -inf }
 0x4a4   : > { %2279 = vmax.xlane.f32.xlu1 %v2278_v58 }
 0x4a7   : > { %v2116_v59 = vpop.f32.mrb[14].mxu1 }
 0x4a8   : > { %v2117_v60 = vadd.f32 %v2116_v59, %v1063_v50  ;;  %v5345_v61 = vpop.f32.mrb[15].mxu1 }
 0x4aa   : > { %v2275_v62 = vsel %vm1967_vm2, %v2117_v60, -inf }
 0x4ab   : > { %2276 = vmax.xlane.f32.xlu0 %v2275_v62 }
 0x4af   : > { %v2268_v63 = vpop.f32.mrb[16].mxu1 }
 0x4b0   : > { %v2269_v2 = vadd.f32 %v2268_v63, %v1063_v50  ;;  %v5355_v3 = vpop.f32.mrb[17].mxu1 }
 0x4b2   : > { %v2281_v4 = vsel %vm1967_vm2, %v2269_v2, -inf }
 0x4b3   : > { %2282 = vmax.xlane.f32.xlu1 %v2281_v4 }
 0x529   : > { %v2274_v5 = vpop.xlane.xlu0 %2273 }
 0x52a   : > { %v2284_v6 = vsub.f32 %v2041_v52, %v2274_v5 }
 0x52c   : > { %v2288_v7 = vmul.f32 1.442695, %v2284_v6 }
 0x52e   : > { %6024 = vpow2.f32 %v2288_v7  ;;  %v2729_v7 = vld [vmem:[#allocation16] sm:$0xff] }
 0x531   : > { %v2280_v8 = vpop.xlane.xlu1 %2279 }
 0x532   : > { %v2286_v9 = vsub.f32 %v2193_v56, %v2280_v8  ;;  %v2730_v8 = vld [vmem:[#allocation16 + $0x8] sm:$0xff] }
 0x534   : > { %v2292_v10 = vmul.f32 1.442695, %v2286_v9  ;;  %v2733_v9 = vld [vmem:[#allocation16 + $0x20] sm:$0xff] }
 0x536   : > { %6026 = vpow2.f32 %v2292_v10  ;;  %v5679_v10 = vpack.c.bf16 %v2730_v8, %v2729_v7  ;;  %v2763_v8 = vld [vmem:[#allocation19 + $0x10] sm:$0xff] }
 0x538   : > { %v6025_v11 = vpop.eup %6024  ;;  %v2277_v12 = vpop.xlane.xlu0 %2276 }
 0x539   : > { %v2285_v13 = vsub.f32 %v2117_v60, %v2277_v12  ;;  %v2296_v14 = vsel %vm1967_vm2, %v6025_v11, 0.0 }
 0x53a   : > { %2297 = vadd.xlane.f32.xlu0 %v2296_v14  ;;  %v2735_v14 = vld [vmem:[#allocation16 + $0x30] sm:$0xff] }
 0x53b   : > { %v2290_v15 = vmul.f32 1.442695, %v2285_v13  ;;  %v2731_v13 = vld [vmem:[#allocation16 + $0x10] sm:$0xff] }
 0x53d   : > { %6028 = vpow2.f32 %v2290_v15 }
 0x540   : > { %v6027_v16 = vpop.eup %6026  ;;  %v2283_v17 = vpop.xlane.xlu1 %2282 }
 0x541   : > { %v2287_v19 = vsub.f32 %v2269_v2, %v2283_v17  ;;  %v2302_v20 = vsel %vm1967_vm2, %v6027_v16, 0.0 }
 0x542   : > { %2303 = vadd.xlane.f32.xlu0 %v2302_v20 }
 0x543   : > { %v2294_v21 = vmul.f32 1.442695, %v2287_v19 }
 0x545   : > { %6030 = vpow2.f32 %v2294_v21 }
 0x547   : > { %v6029_v22 = vpop.eup %6028 }
 0x548   : > { %v2299_v23 = vsel %vm1967_vm2, %v6029_v22, 0.0 }
 0x549   : > { %2300 = vadd.xlane.f32.xlu1 %v2299_v23  ;;  %v4989_v23 = vld [vmem:[#allocation22] ss:$0 sm:$0xff] }
 0x54f   : > { %v6031_v24 = vpop.eup %6030 }
 0x550   : > { %v2305_v25 = vsel %vm1967_vm2, %v6031_v24, 0.0 }
 0x551   : > { %2306 = vadd.xlane.f32.xlu1 %v2305_v25 }
 0x5c7   : > { %v2298_v26 = vpop.xlane.xlu0 %2297 }
 0x5c8   : > { %6032 = vrcp.f32 %v2298_v26  ;;  %v2738_v26 = vld [vmem:[#allocation16 + $0x48] sm:$0xff] }
 0x5cf   : > { %v2304_v27 = vpop.xlane.xlu0 %2303 }
 0x5d0   : > { %6034 = vrcp.f32 %v2304_v27  ;;  %v2741_v27 = vld [vmem:[#allocation16 + $0x60] sm:$0xff] }
 0x5d2   : > { %v6033_v28 = vpop.eup %6032 }
 0x5d3   : > { %v2312_v29 = vmul.f32 %v6033_v28, %v6025_v11  ;;  %v2734_v11 = vld [vmem:[#allocation16 + $0x28] sm:$0xff] }
 0x5d4   : > { %v5685_v12 = vpack.c.bf16 %v2734_v11, %v2733_v9  ;;  %v2742_v28 = vld [vmem:[#allocation16 + $0x68] sm:$0xff]  ;;  %v2764_v9 = vld [vmem:[#allocation19 + $0x18] sm:$0xff]  ;;  %v2765_v11 = vld [vmem:[#allocation19 + $0x20] sm:$0xff] }
 0x5d5   : > { %5359 = vmatmul.mubr.msk.f32.vlgmr.msra.gmra.mrb[14].mxu0 %vm1967_vm2, %v2312_v29  ;;  %v4990_v29 = vld [vmem:[#allocation23] ss:$0 sm:$0xff] }
 0x5d6   : > { %5367 = vmatpush3.msra.mxu0 %v7738_v36  ;;  %v2301_v30 = vpop.xlane.xlu1 %2300  ;;  %5368 = vmatprep.mubr.msk.f32.mxu0 %vm6827_vm0, %v6828_v1 }
 0x5d7   : > { %6036 = vrcp.f32 %v2301_v30  ;;  %5672 = vmatprep.subr.bf16.mxu0 %v6826_v0 }
 0x5da   : > { %v6035_v31 = vpop.eup %6034 }
 0x5db   : > { %v2314_v32 = vmul.f32 %v6035_v31, %v6027_v16  ;;  %v2736_v16 = vld [vmem:[#allocation16 + $0x38] sm:$0xff] }
 0x5dc   : > { %v5688_v17 = vpack.c.bf16 %v2736_v16, %v2735_v14  ;;  %v2770_v14 = vld [vmem:[#allocation19 + $0x48] sm:$0xff]  ;;  %v2767_v16 = vld [vmem:[#allocation19 + $0x30] sm:$0xff] }
 0x5dd   : > { %5369 = vmatmul.mubr.msk.f32.vlgmr.msra.gmra.mrb[16].mxu0 %vm1967_vm2, %v2314_v32  ;;  %v5697_v32 = vpack.c.bf16 %v2742_v28, %v2741_v27  ;;  %v2776_v27 = vld [vmem:[#allocation19 + $0x78] sm:$0xff] }
 0x5de   : > { %v2307_v33 = vpop.xlane.xlu1 %2306  ;;  %5384 = vmatprep.mubr.msk.f32.mxu0 %vm6827_vm0, %v6828_v1  ;;  %5674 = vmatpush3.bf16.msra.mxu0 %v5673_v45  ;;  %v2750_v45 = vld [vmem:[#allocation17 + $0x28] sm:$0xff] }
 0x5df   : > { %6038 = vrcp.f32 %v2307_v33  ;;  %5675 = vmatprep.subr.bf16.mxu0 %v6826_v0  ;;  %v2739_v33 = vld [vmem:[#allocation16 + $0x50] sm:$0xff] }
 0x5e1   : > { %v6037_v34 = vpop.eup %6036 }
 0x5e2   : > { %v2313_v35 = vmul.f32 %v6037_v34, %v6029_v22 }
 0x5e4   : > { %5364 = vmatmul.mubr.msk.f32.vlgmr.msra.gmra.mrb[18].mxu1 %vm1967_vm2, %v2313_v35  ;;  %v2740_v35 = vld [vmem:[#allocation16 + $0x58] sm:$0xff] }
 0x5e5   : > { %5372 = vmatpush3.msra.mxu1 %v7741_v40  ;;  %5373 = vmatprep.mubr.msk.f32.mxu1 %vm6827_vm0, %v6828_v1  ;;  %v5676_v40 = vpack.c.bf16 %v1118_v47, %v1117_v43  ;;  %v2749_v43 = vld [vmem:[#allocation17 + $0x20] sm:$0xff]  ;;  %v5703_v47 = vpack.c.bf16 %v2746_v42, %v2745_v41 }
 0x5e6   : > { %5678 = vmatprep.subr.bf16.mxu1 %v6826_v0 }
 0x5e7   : > { %5677 = vmatpush3.bf16.msra.mxu0 %v5676_v40  ;;  %v5709_v40 = vpack.c.bf16 %v2750_v45, %v2749_v43 }
 0x5e8   : > { %5684 = vmatprep.subr.bf16.mxu0 %v6826_v0 }
 0x5e9   : > { %v6039_v36 = vpop.eup %6038 }
 0x5ea   : > { %v2315_v37 = vmul.f32 %v6039_v36, %v6031_v24  ;;  %v2737_v24 = vld [vmem:[#allocation16 + $0x40] sm:$0xff]  ;;  %v2743_v36 = vld [vmem:[#allocation16 + $0x70] sm:$0xff] }
 0x5eb   : > { %v5691_v31 = vpack.c.bf16 %v2738_v26, %v2737_v24  ;;  %v2774_v24 = vld [vmem:[#allocation19 + $0x68] sm:$0xff]  ;;  %v2775_v26 = vld [vmem:[#allocation19 + $0x70] sm:$0xff] }
 0x5ec   : > { %5374 = vmatmul.mubr.msk.f32.vlgmr.msra.gmra.mrb[20].mxu1 %vm1967_vm2, %v2315_v37  ;;  %v2744_v37 = vld [vmem:[#allocation16 + $0x78] sm:$0xff]  ;;  %v5748_v28 = vpack.c.bf16 %v2776_v27, %v2775_v26 }
 0x5ed   : > { %5395 = vmatprep.mubr.msk.f32.mxu1 %vm6827_vm0, %v6828_v1  ;;  %5680 = vmatpush3.bf16.msra.mxu1 %v5679_v10  ;;  %v5730_v10 = vpack.c.bf16 %v2764_v9, %v2763_v8 }
 0x5ee   : > { %5681 = vmatprep.subr.bf16.mxu1 %v6826_v0 }
 0x6a8   : > { %v2385_v38 = vpop.f32.mrb[14].mxu0 }
 0x6a9   : > { %v5360_v39 = vpop.f32.mrb[15].mxu0 }
 0x6aa   : > { %v5700_v39 = vpack.c.bf16 %v2744_v37, %v2743_v36 }
 0x6b0   : > { %v2531_v48 = vpop.f32.mrb[16].mxu0 }
 0x6b1   : > { %v5370_v49 = vpop.f32.mrb[17].mxu0  ;;  %2613 = vrot.lane.b32.xlu1 %v2531_v48, %s6829_s25  ;;  %v2747_v48 = vld [vmem:[#allocation17 + $0x10] sm:$0xff] }
 0x6b2   : > { %v2748_v49 = vld [vmem:[#allocation17 + $0x18] sm:$0xff] }
 0x6b7   : > { %v2458_v50 = vpop.f32.mrb[18].mxu1 }
 0x6b8   : > { %2609 = vrot.lane.b32.xlu0 %v2458_v50, %s6830_s9  ;;  %v5365_v51 = vpop.f32.mrb[19].mxu1  ;;  %v2751_v50 = vld [vmem:[#allocation17 + $0x30] sm:$0xff] }
 0x6b9   : > { %v2752_v51 = vld [vmem:[#allocation17 + $0x38] sm:$0xff] }
 0x6bf   : > { %v2604_v52 = vpop.f32.mrb[20].mxu1 }
 0x6c0   : > { %2617 = vrot.lane.b32.xlu1 %v2604_v52, %s6831_s6  ;;  %v5375_v53 = vpop.f32.mrb[21].mxu1  ;;  %v5706_v52 = vpack.c.bf16 %v2748_v49, %v2747_v48 }
 0x6c1   : > { %v5712_v53 = vpack.c.bf16 %v2752_v51, %v2751_v50 }
 0x723   : > { %v2614_v55 = vpop.permute.xlu1 %2613 }
 0x72a   : > { %v2610_v54 = vpop.permute.xlu0 %2609 }
 0x72b   : > { %v2620_v56 = vsel %vm1967_vm2, %v2385_v38, %v2610_v54  ;;  %v5694_v38 = vpack.c.bf16 %v2740_v35, %v2739_v33  ;;  %v2753_v54 = vld [vmem:[#allocation17 + $0x40] sm:$0xff] }
 0x72c   : > { %v2622_v57 = vsel %vm2621_vm5, %v2620_v56, %v2614_v55  ;;  %v2754_v55 = vld [vmem:[#allocation17 + $0x48] sm:$0xff]  ;;  %v2757_v56 = vld [vmem:[#allocation17 + $0x60] sm:$0xff] }
 0x732   : > { %v2618_v58 = vpop.permute.xlu1 %2617 }
 0x733   : > { %v2624_v59 = vsel %vm2623_vm6, %v2622_v57, %v2618_v58  ;;  %v2758_v57 = vld [vmem:[#allocation17 + $0x68] sm:$0xff] }
 0x734   : > { %5385 = vmatmul.mubr.msk.f32.vlgmr.msra.gmra.mrb[18].mxu0 %vm1119_vm1, %v2624_v59  ;;  %v7821_v58 = vld [vmem:[%s884_s2] sm:$0xff]  ;;  %v5715_v59 = vpack.c.bf16 %v2754_v55, %v2753_v54 }
 0x735   : > { %5406 = vmatprep.mubr.msk.f32.mxu0 %vm6827_vm0, %v6828_v1  ;;  %5686 = vmatpush3.bf16.msra.mxu0 %v5685_v12  ;;  %v2766_v12 = vld [vmem:[#allocation19 + $0x28] sm:$0xff] }
 0x736   : > { %5687 = vmatprep.subr.bf16.mxu0 %v6826_v0 }
 0x739   : > { %5689 = vmatpush3.bf16.msra.mxu0 %v5688_v17  ;;  %v2768_v17 = vld [vmem:[#allocation19 + $0x38] sm:$0xff] }
 0x73a   : > { %5696 = vmatprep.subr.bf16.mxu0 %v6826_v0 }
 0x807   : > { %v2694_v60 = vpop.f32.mrb[18].mxu0 }
 0x808   : > { %v2698_v61 = vadd.f32 %v2694_v60, %v7645_v18  ;;  %v5386_v62 = vpop.f32.mrb[19].mxu0  ;;  %v2732_v18 = vld [vmem:[#allocation16 + $0x18] sm:$0xff]  ;;  %v5721_v60 = vpack.c.bf16 %v2758_v57, %v2757_v56 }
 0x809   : > { %v5682_v15 = vpack.c.bf16 %v2732_v18, %v2731_v13  ;;  %v2756_v62 = vld [vmem:[#allocation17 + $0x58] sm:$0xff]  ;;  %v2769_v13 = vld [vmem:[#allocation19 + $0x40] sm:$0xff]  ;;  %v5733_v18 = vpack.c.bf16 %v2766_v12, %v2765_v11 }
 0x80a   : > { %v2701_v63 = vsel %vm1119_vm1, %v2698_v61, 0.0 }
 0x80b   : > { %2702 = vadd.xlane.f32.xlu1 %v2701_v63  ;;  %5683 = vmatpush3.bf16.msra.mxu1 %v5682_v15  ;;  %v2759_v63 = vld [vmem:[#allocation17 + $0x70] sm:$0xff]  ;;  %v5739_v15 = vpack.c.bf16 %v2770_v14, %v2769_v13 }
 0x80c   : > { %5690 = vmatprep.subr.bf16.mxu1 %v6826_v0 }
 0x898   : > { %v2703_v2 = vpop.xlane.xlu1 %2702 }
 0x899   : > { %v2705_v3 = vmul.f32 0.03125, %v2703_v2  ;;  %v2760_v2 = vld [vmem:[#allocation17 + $0x78] sm:$0xff] }
 0x89b   : > { %v2706_v4 = vsub.f32 %v2698_v61, %v2705_v3  ;;  %v2755_v61 = vld [vmem:[#allocation17 + $0x50] sm:$0xff] }
 0x89c   : > { %v5718_v3 = vpack.c.bf16 %v2756_v62, %v2755_v61 }
 0x89d   : > { %v2707_v5 = vmul.f32 %v2706_v4, %v2706_v4 }
 0x89f   : > { %v2708_v6 = vsel %vm1119_vm1, %v2707_v5, 0.0  ;;  %v2761_v5 = vld [vmem:[#allocation19] sm:$0xff] }
 0x8a0   : > { %2709 = vadd.xlane.f32.xlu0 %v2708_v6  ;;  %v2762_v6 = vld [vmem:[#allocation19 + $0x8] sm:$0xff] }
 0x8a1   : > { %v5727_v7 = vpack.c.bf16 %v2762_v6, %v2761_v5 }
 0x92d   : > { %v2710_v19 = vpop.xlane.xlu0 %2709 }
 0x92e   : > { %v2711_v20 = vmul.f32 0.03125, %v2710_v19  ;;  %v2771_v19 = vld [vmem:[#allocation19 + $0x50] sm:$0xff] }
 0x930   : > { %v2712_v21 = vadd.f32 1e-05, %v2711_v20  ;;  %v5736_v20 = vpack.c.bf16 %v2768_v17, %v2767_v16 }
 0x932   : > { %6040 = vrsqrt.f32 %v2712_v21  ;;  %v2772_v21 = vld [vmem:[#allocation19 + $0x58] sm:$0xff] }
 0x93c   : > { %v6041_v22 = vpop.eup %6040 }
 0x93d   : > { %v2714_v25 = vmul.f32 %v6041_v22, %v2706_v4  ;;  %v5724_v4 = vpack.c.bf16 %v2760_v2, %v2759_v63  ;;  %v5742_v22 = vpack.c.bf16 %v2772_v21, %v2771_v19 }
 0x93f   : > { %v2721_v30 = vmul.f32 %v4989_v23, %v2714_v25  ;;  %v2773_v23 = vld [vmem:[#allocation19 + $0x60] sm:$0xff] }
 0x940   : > { %v5745_v25 = vpack.c.bf16 %v2774_v24, %v2773_v23 }
 0x941   : > { %v7795_v34 = vadd.f32 %v4990_v29, %v2721_v30 }
 0x943   : > { %5396 = vmatmul.mubr.msk.f32.vlgmr.msra.gmra.mrb[22].mxu1 %vm1119_vm1, %v7795_v34  ;;  %5407 = vmatmul.mubr.msk.f32.vlgmr.msra.gmra.mrb[20].mxu0 %vm1119_vm1, %v7795_v34 }
 0x944   : > { %5692 = vmatpush3.bf16.msra.mxu1 %v5691_v31  ;;  %5698 = vmatpush3.bf16.msra.mxu0 %v5697_v32 }
 0x945   : > { %5693 = vmatprep.subr.bf16.mxu1 %v6826_v0  ;;  %5699 = vmatprep.subr.bf16.mxu0 %v6826_v0 }
 0x946   : > { %5417 = vmatprep.mubr.msk.f32.mxu1 %vm6827_vm0, %v6828_v1  ;;  %5428 = vmatprep.mubr.msk.f32.mxu0 %vm6827_vm0, %v6828_v1 }
 0x948   : > { %5695 = vmatpush3.bf16.msra.mxu1 %v5694_v38  ;;  %5701 = vmatpush3.bf16.msra.mxu0 %v5700_v39 }
 0x949   : > { %5702 = vmatprep.subr.bf16.mxu1 %v6826_v0  ;;  %5708 = vmatprep.subr.bf16.mxu0 %v6826_v0 }
 0x94b   : > { %5418 = vmatmul.mubr.msk.f32.vlgmr.msra.gmra.mrb[24].mxu1 %vm1119_vm1, %v7795_v34  ;;  %5429 = vmatmul.mubr.msk.f32.vlgmr.msra.gmra.mrb[22].mxu0 %vm1119_vm1, %v7795_v34 }
 0x94c   : > { %5704 = vmatpush3.bf16.msra.mxu1 %v5703_v47  ;;  %5710 = vmatpush3.bf16.msra.mxu0 %v5709_v40 }
 0x94d   : > { %5705 = vmatprep.subr.bf16.mxu1 %v6826_v0  ;;  %5711 = vmatprep.subr.bf16.mxu0 %v6826_v0 }
 0x94e   : > { %5439 = vmatprep.mubr.msk.f32.mxu1 %vm6827_vm0, %v6828_v1  ;;  %5450 = vmatprep.mubr.msk.f32.mxu0 %vm6827_vm0, %v6828_v1 }
 0x950   : > { %5707 = vmatpush3.bf16.msra.mxu1 %v5706_v52  ;;  %5713 = vmatpush3.bf16.msra.mxu0 %v5712_v53 }
 0x951   : > { %5714 = vmatprep.subr.bf16.mxu1 %v6826_v0  ;;  %5720 = vmatprep.subr.bf16.mxu0 %v6826_v0 }
 0x953   : > { %5440 = vmatmul.mubr.msk.f32.vlgmr.msra.gmra.mrb[26].mxu1 %vm1119_vm1, %v7821_v58  ;;  %5451 = vmatmul.mubr.msk.f32.vlgmr.msra.gmra.mrb[24].mxu0 %vm1119_vm1, %v7821_v58 }
 0x954   : > { %5716 = vmatpush3.bf16.msra.mxu1 %v5715_v59  ;;  %5722 = vmatpush3.bf16.msra.mxu0 %v5721_v60  ;;  %v1064_v60 = vld [vmem:[%s900_s15] sm:$0x1] }
 0x955   : > { %5717 = vmatprep.subr.bf16.mxu1 %v6826_v0  ;;  %5723 = vmatprep.subr.bf16.mxu0 %v6826_v0  ;;  %vm1065_vm7 = vcmp.gt.f32.partialorder %v1064_v60, 0.5 }
 0x956   : > { %5461 = vmatprep.mubr.msk.f32.mxu1 %vm6827_vm0, %v6828_v1  ;;  %5472 = vmatprep.mubr.msk.f32.mxu0 %vm6827_vm0, %v6828_v1  ;;  %v1066_v61 = vsel %vm1065_vm7, -1e+09, %v6828_v1 }
 0x957   : > { %v3635_v62 = vrot.slane %v1066_v61, %v1060_v46 }
 0x958   : > { %5719 = vmatpush3.bf16.msra.mxu1 %v5718_v3  ;;  %5725 = vmatpush3.bf16.msra.mxu0 %v5724_v4 }
 0x959   : > { %5726 = vmatprep.subr.bf16.mxu1 %v6826_v0  ;;  %5732 = vmatprep.subr.bf16.mxu0 %v6826_v0 }
 0x95b   : > { %5462 = vmatmul.mubr.msk.f32.vlgmr.msra.gmra.mrb[28].mxu1 %vm1119_vm1, %v7821_v58  ;;  %5473 = vmatmul.mubr.msk.f32.vlgmr.msra.gmra.mrb[26].mxu0 %vm1119_vm1, %v7821_v58 }
 0x95c   : > { %5728 = vmatpush3.bf16.msra.mxu1 %v5727_v7  ;;  %5483 = vmatprep.mubr.msk.f32.mxu1 %vm6827_vm0, %v6828_v1 }
 0x95d   : > { %5729 = vmatprep.subr.bf16.mxu1 %v6826_v0  ;;  %5494 = vmatprep.mubr.msk.f32.mxu0 %vm6827_vm0, %v6828_v1 }
 0x95e   : > { %5734 = vmatpush3.bf16.msra.mxu0 %v5733_v18 }
 0x95f   : > { %5735 = vmatprep.subr.bf16.mxu0 %v6826_v0 }
 0x960   : > { %5731 = vmatpush3.bf16.msra.mxu1 %v5730_v10 }
 0x961   : > { %5738 = vmatprep.subr.bf16.mxu1 %v6826_v0 }
 0x962   : > { %5737 = vmatpush3.bf16.msra.mxu0 %v5736_v20 }
 0x963   : > { %5484 = vmatmul.mubr.msk.f32.vlgmr.msra.gmra.mrb[30].mxu1 %vm1119_vm1, %v7821_v58  ;;  %5744 = vmatprep.subr.bf16.mxu0 %v6826_v0 }
 0x964   : > { %5505 = vmatprep.mubr.msk.f32.mxu1 %vm6827_vm0, %v6828_v1  ;;  %5740 = vmatpush3.bf16.msra.mxu1 %v5739_v15 }
 0x965   : > { %5741 = vmatprep.subr.bf16.mxu1 %v6826_v0  ;;  %5495 = vmatmul.mubr.msk.f32.vlgmr.msra.gmra.mrb[28].mxu0 %vm1119_vm1, %v7821_v58 }
 0x966   : > { %5746 = vmatpush3.bf16.msra.mxu0 %v5745_v25  ;;  %5516 = vmatprep.mubr.msk.f32.mxu0 %vm6827_vm0, %v6828_v1 }
 0x967   : > { %5747 = vmatprep.subr.bf16.mxu0 %v6826_v0 }
 0x968   : > { %5743 = vmatpush3.bf16.msra.mxu1 %v5742_v22 }
 0x969   : > { %5519 = vmatprep.subr.mxu1 %v6828_v1 }
 0x96a   : > { %5749 = vmatpush3.bf16.msra.mxu0 %v5748_v28 }
 0x96b   : > { %5506 = vmatmul.mubr.msk.f32.vlgmr.msra.gmra.mrb[32].mxu1 %vm1119_vm1, %v7821_v58  ;;  %5529 = vmatprep.subr.mxu0 %v6828_v1 }
 0x96c   : > { %5521 = vmatprep.mubr.msk.f32.mxu1 %vm6827_vm0, %v6828_v1 }
 0x96d   : > { %5517 = vmatmul.mubr.msk.f32.vlgmr.msra.gmra.mrb[30].mxu0 %vm1119_vm1, %v7821_v58 }
 0x96e   : > { %5531 = vmatprep.mubr.msk.f32.mxu0 %vm6827_vm0, %v6828_v1 }
 0xa16   : > { %v2850_v29 = vpop.f32.mrb[22].mxu1  ;;  %v2920_v30 = vpop.f32.mrb[20].mxu0 }
 0xa17   : > { %v5397_v31 = vpop.f32.mrb[23].mxu1  ;;  %v5408_v32 = vpop.f32.mrb[21].mxu0  ;;  %v3064_v43 = vmul.f32 0.35355338, %v2850_v29  ;;  %v3065_v45 = vmul.f32 0.35355338, %v2920_v30 }
 0xa1e   : > { %v2990_v33 = vpop.f32.mrb[24].mxu1  ;;  %v3060_v35 = vpop.f32.mrb[22].mxu0 }
 0xa1f   : > { %v5419_v36 = vpop.f32.mrb[25].mxu1  ;;  %v5430_v37 = vpop.f32.mrb[23].mxu0  ;;  %v3066_v50 = vmul.f32 0.35355338, %v2990_v33  ;;  %v3067_v51 = vmul.f32 0.35355338, %v3060_v35 }
 0xa26   : > { %v3137_v38 = vpop.f32.mrb[26].mxu1  ;;  %v3207_v39 = vpop.f32.mrb[24].mxu0 }
 0xa27   : > { %v5441_v41 = vpop.f32.mrb[27].mxu1  ;;  %5520 = vmatpush3.xpose.msk.msra.mxu1 %vm1967_vm2, %v3137_v38  ;;  %v5452_v42 = vpop.f32.mrb[25].mxu0 }
 0xa28   : > { %5524 = vmatprep.subr.mxu1 %v6828_v1 }
 0xa2a   : > { %5522 = vmatmul.mubr.msk.f32.vlgmr.msra.gmra.mrb[34].mxu1 %vm1967_vm2, %v3064_v43 }
 0xa2b   : > { %5525 = vmatpush3.xpose.msk.msra.mxu1 %vm1967_vm2, %v3207_v39  ;;  %5526 = vmatprep.mubr.msk.f32.mxu1 %vm6827_vm0, %v6828_v1 }
 0xa2c   : > { %5534 = vmatprep.subr.mxu1 %v6828_v1 }
 0xa2e   : > { %v3277_v47 = vpop.f32.mrb[28].mxu1  ;;  %v3347_v40 = vpop.f32.mrb[26].mxu0  ;;  %5527 = vmatmul.mubr.msk.f32.vlgmr.msra.gmra.mrb[36].mxu1 %vm1967_vm2, %v3065_v45 }
 0xa2f   : > { %v5463_v48 = vpop.f32.mrb[29].mxu1  ;;  %v5474_v49 = vpop.f32.mrb[27].mxu0  ;;  %5530 = vmatpush3.xpose.msk.msra.mxu0 %vm1967_vm2, %v3277_v47  ;;  %5535 = vmatpush3.xpose.msk.msra.mxu1 %vm1967_vm2, %v3347_v40 }
 0xa30   : > { %5536 = vmatprep.mubr.msk.f32.mxu1 %vm6827_vm0, %v6828_v1  ;;  %5539 = vmatprep.subr.mxu0 %v6828_v1 }
 0xa31   : > { %5544 = vmatprep.subr.mxu1 %v6828_v1 }
 0xa32   : > { %5532 = vmatmul.mubr.msk.f32.vlgmr.msra.gmra.mrb[32].mxu0 %vm1967_vm2, %v3066_v50  ;;  %5537 = vmatmul.mubr.msk.f32.vlgmr.msra.gmra.mrb[38].mxu1 %vm1967_vm2, %v3067_v51  ;;  %v2777_v50 = vld [vmem:[#allocation20] sm:$0xff]  ;;  %v2778_v51 = vld [vmem:[#allocation20 + $0x8] sm:$0xff] }
 0xa33   : > { %5541 = vmatprep.mubr.msk.f32.mxu0 %vm6827_vm0, %v6828_v1  ;;  %5546 = vmatprep.mubr.msk.f32.mxu1 %vm6827_vm0, %v6828_v1 }
 0xa36   : > { %v3417_v52 = vpop.f32.mrb[30].mxu1 }
 0xa37   : > { %v5485_v53 = vpop.f32.mrb[31].mxu1  ;;  %5540 = vmatpush3.msra.mxu0 %v3417_v52  ;;  %v5751_v52 = vpack.c.bf16 %v2778_v51, %v2777_v50 }
 0xa38   : > { %5549 = vmatprep.subr.mxu0 %v6828_v1  ;;  %v3487_v54 = vpop.f32.mrb[28].mxu0  ;;  %v2779_v53 = vld [vmem:[#allocation20 + $0x10] sm:$0xff] }
 0xa39   : > { %v5496_v55 = vpop.f32.mrb[29].mxu0  ;;  %5545 = vmatpush3.msra.mxu1 %v3487_v54  ;;  %v2780_v54 = vld [vmem:[#allocation20 + $0x18] sm:$0xff] }
 0xa3a   : > { %5554 = vmatprep.subr.mxu1 %v6828_v1  ;;  %v5754_v55 = vpack.c.bf16 %v2780_v54, %v2779_v53 }
 0xa3e   : > { %v7890_v56 = vpop.f32.mrb[32].mxu1 }
 0xa3f   : > { %v5507_v57 = vpop.f32.mrb[33].mxu1 }
 0xa40   : > { %v7893_v58 = vpop.f32.mrb[30].mxu0 }
 0xa41   : > { %v5518_v59 = vpop.f32.mrb[31].mxu0 }
 0xafd   : > { %v3709_v63 = vpop.f32.mrb[34].mxu1 }
 0xafe   : > { %v3710_v2 = vadd.f32 %v3709_v63, %v3635_v62  ;;  %v5523_v3 = vpop.f32.mrb[35].mxu1 }
 0xb00   : > { %v3941_v4 = vsel %vm1967_vm2, %v3710_v2, -inf }
 0xb01   : > { %3942 = vmax.xlane.f32.xlu0 %v3941_v4  ;;  %v3785_v5 = vpop.f32.mrb[36].mxu1 }
 0xb02   : > { %v3786_v6 = vadd.f32 %v3785_v5, %v3635_v62  ;;  %v5528_v7 = vpop.f32.mrb[37].mxu1 }
 0xb04   : > { %v3944_v8 = vsel %vm1967_vm2, %v3786_v6, -inf }
 0xb05   : > { %v3861_v9 = vpop.f32.mrb[32].mxu0  ;;  %3945 = vmax.xlane.f32.xlu0 %v3944_v8  ;;  %v3937_v10 = vpop.f32.mrb[38].mxu1 }
 0xb06   : > { %v3862_v11 = vadd.f32 %v3861_v9, %v3635_v62  ;;  %v3938_v12 = vadd.f32 %v3937_v10, %v3635_v62  ;;  %v5533_v13 = vpop.f32.mrb[33].mxu0  ;;  %v5538_v18 = vpop.f32.mrb[39].mxu1 }
 0xb08   : > { %v3947_v44 = vsel %vm1967_vm2, %v3862_v11, -inf  ;;  %v3950_v46 = vsel %vm1967_vm2, %v3938_v12, -inf }
 0xb09   : > { %3948 = vmax.xlane.f32.xlu1 %v3947_v44  ;;  %3951 = vmax.xlane.f32.xlu0 %v3950_v46 }
 0xb8e   : > { %v3943_v14 = vpop.xlane.xlu0 %3942 }
 0xb8f   : > { %v3953_v15 = vsub.f32 %v3710_v2, %v3943_v14  ;;  %v4395_v14 = vld [vmem:[#allocation31] sm:$0xff] }
 0xb91   : > { %v3957_v16 = vmul.f32 1.442695, %v3953_v15  ;;  %v4396_v15 = vld [vmem:[#allocation31 + $0x8] sm:$0xff] }
 0xb92   : > { %v3946_v17 = vpop.xlane.xlu0 %3945 }
 0xb93   : > { %6042 = vpow2.f32 %v3957_v16  ;;  %v3954_v19 = vsub.f32 %v3786_v6, %v3946_v17  ;;  %v5757_v16 = vpack.c.bf16 %v4396_v15, %v4395_v14  ;;  %v4397_v17 = vld [vmem:[#allocation31 + $0x10] sm:$0xff] }
 0xb95   : > { %v3959_v20 = vmul.f32 1.442695, %v3954_v19  ;;  %v4480_v19 = vld [vmem:[#allocation34] sm:$0xff] }
 0xb96   : > { %v3949_v21 = vpop.xlane.xlu1 %3948  ;;  %v3952_v22 = vpop.xlane.xlu0 %3951 }
 0xb97   : > { %6044 = vpow2.f32 %v3959_v20  ;;  %v3955_v23 = vsub.f32 %v3862_v11, %v3949_v21  ;;  %v3956_v24 = vsub.f32 %v3938_v12, %v3952_v22  ;;  %v4481_v20 = vld [vmem:[#allocation34 + $0x8] sm:$0xff]  ;;  %v4482_v21 = vld [vmem:[#allocation34 + $0x10] sm:$0xff] }
 0xb98   : > { %v5763_v22 = vpack.c.bf16 %v4481_v20, %v4480_v19 }
 0xb99   : > { %v3961_v25 = vmul.f32 1.442695, %v3955_v23  ;;  %v3963_v26 = vmul.f32 1.442695, %v3956_v24  ;;  %v4483_v23 = vld [vmem:[#allocation34 + $0x18] sm:$0xff] }
 0xb9a   : > { %v5766_v24 = vpack.c.bf16 %v4483_v23, %v4482_v21 }
 0xb9b   : > { %6046 = vpow2.f32 %v3961_v25  ;;  %v4484_v25 = vld [vmem:[#allocation34 + $0x20] sm:$0xff] }
 0xb9c   : > { %6048 = vpow2.f32 %v3963_v26  ;;  %v4485_v26 = vld [vmem:[#allocation34 + $0x28] sm:$0xff] }
 0xb9d   : > { %v6043_v27 = vpop.eup %6042 }
 0xb9e   : > { %v3965_v28 = vsel %vm1967_vm2, %v6043_v27, 0.0 }
 0xb9f   : > { %3966 = vadd.xlane.f32.xlu1 %v3965_v28 }
 0xba1   : > { %v6045_v29 = vpop.eup %6044 }
 0xba2   : > { %v3968_v30 = vsel %vm1967_vm2, %v6045_v29, 0.0 }
 0xba3   : > { %3969 = vadd.xlane.f32.xlu0 %v3968_v30 }
 0xba5   : > { %v6047_v31 = vpop.eup %6046 }
 0xba6   : > { %v6049_v32 = vpop.eup %6048  ;;  %v3971_v33 = vsel %vm1967_vm2, %v6047_v31, 0.0 }
 0xba7   : > { %3972 = vadd.xlane.f32.xlu1 %v3971_v33  ;;  %v3974_v35 = vsel %vm1967_vm2, %v6049_v32, 0.0 }
 0xba8   : > { %3975 = vadd.xlane.f32.xlu0 %v3974_v35  ;;  %v5017_v35 = vld [vmem:[#allocation26] ss:$0 sm:$0xff] }
 0xc2c   : > { %v3967_v36 = vpop.xlane.xlu1 %3966 }
 0xc2d   : > { %6050 = vrcp.f32 %v3967_v36 }
 0xc30   : > { %v3970_v37 = vpop.xlane.xlu0 %3969 }
 0xc31   : > { %6052 = vrcp.f32 %v3970_v37 }
 0xc34   : > { %v3973_v38 = vpop.xlane.xlu1 %3972 }
 0xc35   : > { %6054 = vrcp.f32 %v3973_v38  ;;  %v3976_v39 = vpop.xlane.xlu0 %3975  ;;  %v4486_v38 = vld [vmem:[#allocation34 + $0x30] sm:$0xff] }
 0xc36   : > { %6056 = vrcp.f32 %v3976_v39  ;;  %v4487_v39 = vld [vmem:[#allocation34 + $0x38] sm:$0xff] }
 0xc37   : > { %v6051_v41 = vpop.eup %6050 }
 0xc38   : > { %v3981_v42 = vmul.f32 %v6051_v41, %v6043_v27  ;;  %v5769_v27 = vpack.c.bf16 %v4485_v26, %v4484_v25  ;;  %v5772_v41 = vpack.c.bf16 %v4487_v39, %v4486_v38 }
 0xc3a   : > { %5542 = vmatmul.mubr.msk.f32.vlgmr.msra.gmra.mrb[34].mxu0 %vm1967_vm2, %v3981_v42  ;;  %v5018_v42 = vld [vmem:[#allocation32] ss:$0 sm:$0xff] }
 0xc3b   : > { %v6053_v43 = vpop.eup %6052  ;;  %5550 = vmatpush3.msra.mxu0 %v7890_v56  ;;  %5551 = vmatprep.mubr.msk.f32.mxu0 %vm6827_vm0, %v6828_v1 }
 0xc3c   : > { %v3982_v45 = vmul.f32 %v6053_v43, %v6045_v29  ;;  %5750 = vmatprep.subr.bf16.mxu0 %v6826_v0 }
 0xc3e   : > { %5547 = vmatmul.mubr.msk.f32.vlgmr.msra.gmra.mrb[40].mxu1 %vm1967_vm2, %v3982_v45 }
 0xc3f   : > { %v6055_v47 = vpop.eup %6054  ;;  %5555 = vmatpush3.msra.mxu1 %v7893_v58  ;;  %5556 = vmatprep.mubr.msk.f32.mxu1 %vm6827_vm0, %v6828_v1 }
 0xc40   : > { %v6057_v40 = vpop.eup %6056  ;;  %v3983_v48 = vmul.f32 %v6055_v47, %v6047_v31  ;;  %5756 = vmatprep.subr.bf16.mxu1 %v6826_v0 }
 0xc41   : > { %v3984_v49 = vmul.f32 %v6057_v40, %v6049_v32  ;;  %v5016_v32 = vld [vmem:[#allocation25] ss:$0 sm:$0xff]  ;;  %v5020_v40 = vld [vmem:[#allocation35] ss:$0 sm:$0xff] }
 0xc42   : > { %5552 = vmatmul.mubr.msk.f32.vlgmr.msra.gmra.mrb[36].mxu0 %vm1967_vm2, %v3983_v48 }
 0xc43   : > { %5557 = vmatmul.mubr.msk.f32.vlgmr.msra.gmra.mrb[42].mxu1 %vm1967_vm2, %v3984_v49  ;;  %5567 = vmatprep.mubr.msk.f32.mxu0 %vm6827_vm0, %v6828_v1 }
 0xc44   : > { %5578 = vmatprep.mubr.msk.f32.mxu1 %vm6827_vm0, %v6828_v1  ;;  %5752 = vmatpush3.bf16.msra.mxu0 %v5751_v52 }
 0xc45   : > { %5753 = vmatprep.subr.bf16.mxu0 %v6826_v0  ;;  %5758 = vmatpush3.bf16.msra.mxu1 %v5757_v16 }
 0xc46   : > { %5759 = vmatprep.subr.bf16.mxu1 %v6826_v0 }
 0xc48   : > { %5755 = vmatpush3.bf16.msra.mxu0 %v5754_v55 }
 0xc49   : > { %5762 = vmatprep.subr.bf16.mxu0 %v6826_v0 }
 0xd0d   : > { %v4054_v56 = vpop.f32.mrb[34].mxu0 }
 0xd0e   : > { %v5543_v57 = vpop.f32.mrb[35].mxu0 }
 0xd11   : > { %v4127_v58 = vpop.f32.mrb[40].mxu1 }
 0xd12   : > { %4278 = vrot.lane.b32.xlu1 %v4127_v58, %s6830_s9  ;;  %v5548_v59 = vpop.f32.mrb[41].mxu1 }
 0xd15   : > { %v4200_v60 = vpop.f32.mrb[36].mxu0 }
 0xd16   : > { %v4273_v61 = vpop.f32.mrb[42].mxu1  ;;  %v5553_v62 = vpop.f32.mrb[37].mxu0  ;;  %4282 = vrot.lane.b32.xlu0 %v4200_v60, %s6829_s25 }
 0xd17   : > { %4286 = vrot.lane.b32.xlu1 %v4273_v61, %s6831_s6  ;;  %v5558_v63 = vpop.f32.mrb[43].mxu1  ;;  %v5022_v62 = vld [vmem:[#allocation28] ss:$0 sm:$0xff] }
 0xd84   : > { %v4279_v2 = vpop.permute.xlu1 %4278 }
 0xd85   : > { %v4289_v3 = vsel %vm1967_vm2, %v4054_v56, %v4279_v2  ;;  %v5023_v2 = vld [vmem:[#allocation29] ss:$0 sm:$0xff] }
 0xd88   : > { %v4283_v4 = vpop.permute.xlu0 %4282 }
 0xd89   : > { %v4290_v5 = vsel %vm2621_vm5, %v4289_v3, %v4283_v4  ;;  %v4287_v6 = vpop.permute.xlu1 %4286 }
 0xd8a   : > { %v4291_v7 = vsel %vm2623_vm6, %v4290_v5, %v4287_v6 }
 0xd8b   : > { %5568 = vmatmul.mubr.msk.f32.vlgmr.msra.gmra.mrb[38].mxu0 %vm1119_vm1, %v4291_v7 }
 0xd8c   : > { %5597 = vmatprep.mubr.msk.f32.mxu0 %vm6827_vm0, %v6828_v1  ;;  %v4398_v1 = vld [vmem:[#allocation31 + $0x18] sm:$0xff]  ;;  %5764 = vmatpush3.bf16.msra.mxu0 %v5763_v22 }
 0xd8d   : > { %5765 = vmatprep.subr.bf16.mxu0 %v6826_v0 }
 0xd90   : > { %5767 = vmatpush3.bf16.msra.mxu0 %v5766_v24 }
 0xd91   : > { %5768 = vmatprep.subr.bf16.mxu0 %v6826_v0 }
 0xd94   : > { %5770 = vmatpush3.bf16.msra.mxu0 %v5769_v27 }
 0xd95   : > { %5771 = vmatprep.subr.bf16.mxu0 %v6826_v0 }
 0xd98   : > { %5773 = vmatpush3.bf16.msra.mxu0 %v5772_v41 }
 0xe5e   : > { %v4361_v8 = vpop.f32.mrb[38].mxu0 }
 0xe5f   : > { %v4365_v9 = vadd.f32 %v4361_v8, %v7795_v34  ;;  %v5569_v10 = vpop.f32.mrb[39].mxu0  ;;  %v5760_v34 = vpack.c.bf16 %v4398_v1, %v4397_v17 }
 0xe61   : > { %v4368_v11 = vsel %vm1119_vm1, %v4365_v9, 0.0  ;;  %5761 = vmatpush3.bf16.msra.mxu1 %v5760_v34 }
 0xe62   : > { %4369 = vadd.xlane.f32.xlu1 %v4368_v11 }
 0xeef   : > { %v4370_v12 = vpop.xlane.xlu1 %4369 }
 0xef0   : > { %v4371_v13 = vmul.f32 0.03125, %v4370_v12 }
 0xef2   : > { %v4372_v18 = vsub.f32 %v4365_v9, %v4371_v13 }
 0xef4   : > { %v4373_v44 = vmul.f32 %v4372_v18, %v4372_v18 }
 0xef6   : > { %v4374_v46 = vsel %vm1119_vm1, %v4373_v44, 0.0 }
 0xef7   : > { %4375 = vadd.xlane.f32.xlu0 %v4374_v46 }
 0xf84   : > { %v4376_v28 = vpop.xlane.xlu0 %4375 }
 0xf85   : > { %v4377_v29 = vmul.f32 0.03125, %v4376_v28 }
 0xf87   : > { %v4378_v30 = vadd.f32 1e-05, %v4377_v29 }
 0xf89   : > { %6058 = vrsqrt.f32 %v4378_v30 }
 0xf93   : > { %v6059_v31 = vpop.eup %6058 }
 0xf94   : > { %v4380_v33 = vmul.f32 %v6059_v31, %v4372_v18 }
 0xf96   : > { %v4387_v36 = vmul.f32 %v5016_v32, %v4380_v33 }
 0xf98   : > { %v4394_v37 = vadd.f32 %v5017_v35, %v4387_v36 }
 0xf9a   : > { %5579 = vmatmul.mubr.msk.f32.vlgmr.msra.gmra.mrb[44].mxu1 %vm1119_vm1, %v4394_v37 }
0x106d   : > { %v4475_v43 = vpop.f32.mrb[44].mxu1 }
0x106e   : > { %v4476_v45 = vadd.f32 %v5018_v42, %v4475_v43  ;;  %v5580_v0 = vpop.f32.mrb[45].mxu1 }
0x1070   : > { %v4479_v47 = vmax.f32 %v4476_v45, 0.0 }
0x1072   : > { %5598 = vmatmul.mubr.msk.f32.vlgmr.msra.gmra.mrb[40].mxu0 %vm4495_vm8, %v4479_v47 }
0x1145   : > { %v4565_v48 = vpop.f32.mrb[40].mxu0 }
0x1146   : > { %v4566_v49 = vadd.f32 %v5020_v40, %v4565_v48  ;;  %v5599_v50 = vpop.f32.mrb[41].mxu0 }
0x1148   : > { %v4569_v51 = vadd.f32 %v4566_v49, %v4394_v37 }
0x114a   : > { %v4572_v52 = vsel %vm1119_vm1, %v4569_v51, 0.0 }
0x114b   : > { %4573 = vadd.xlane.f32.xlu0 %v4572_v52 }
0x11d8   : > { %v4574_v53 = vpop.xlane.xlu0 %4573 }
0x11d9   : > { %v4575_v54 = vmul.f32 0.03125, %v4574_v53 }
0x11db   : > { %v4576_v55 = vsub.f32 %v4569_v51, %v4575_v54 }
0x11dd   : > { %v4577_v56 = vmul.f32 %v4576_v55, %v4576_v55 }
0x11df   : > { %v4578_v57 = vsel %vm1119_vm1, %v4577_v56, 0.0 }
0x11e0   : > { %4579 = vadd.xlane.f32.xlu1 %v4578_v57 }
0x126d   : > { %v4580_v58 = vpop.xlane.xlu1 %4579 }
0x126e   : > { %v4581_v59 = vmul.f32 0.03125, %v4580_v58 }
0x1270   : > { %v4582_v60 = vadd.f32 1e-05, %v4581_v59 }
0x1272   : > { %6060 = vrsqrt.f32 %v4582_v60 }
0x127c   : > { %v6061_v61 = vpop.eup %6060 }
0x127d   : > { %v4584_v63 = vmul.f32 %v6061_v61, %v4576_v55 }
0x127f   : > { %v4591_v3 = vmul.f32 %v5022_v62, %v4584_v63 }
0x1281   : > { %v4598_v4 = vadd.f32 %v5023_v2, %v4591_v3 }
0x1283   : > { %4599 = vst.msk [vmem:[%s1045_s20] sm:$0xff] %vm1119_vm1, %v4598_v4 }
0x1284   : > { %6699 = shalt.err (!%p6696_p3)
}
0x1285   : > { %s6700_s13 = scalar_lea.hbm %s7950_s7, 128  ;;  %s6704_s2 = scalar_lea.hbm %s8161_s27, 256 }
0x1286   : > { %p6701_p11 = scmp.ne.s32.totalorder %s7950_s7, %s6700_s13  ;;  %p6705_p13 = scmp.lt.u32.totalorder %s7950_s7, %s8161_s27 }
0x1287   : > { %p6706_p6 = scmp.lt.u32.totalorder %s6704_s2, %s6700_s13  ;;  %p6708_p2 = scmp.lt.u32.totalorder %s6700_s13, %s7950_s7 }
0x1288   : > { %p6702_p9 = pnand %p6701_p11, %p8162_p1 }
0x1289   : > { %p6707_p12 = por %p6706_p6, %p6705_p13 }
0x128a   : > { %p6703_p8 = pneg %p6702_p9 }
0x128b   : > { %p6709_p4 = por %p6708_p2, %p6707_p12 }
0x128d   : > { %p6710_p10 = pnand %p6709_p4, %p6703_p8 }
0x128f   : > { %6713 = shalt.err (!%p6710_p10)
}
0x1290   : > { %5854 = dma.vmem_to_hbm [thread:$0]  (%p8162_p1), %s7952_s12, 128, %s7950_s7, %s4601_s21  }
0x1291 PF: > { %s8163_s15 = sld [smem:[#allocation56_spill]]  ;;  %s4626_s25 = sand.u32 1, %s6788_s3  }
0x1292   : > { %p8165_p7 = scmp.ge.s32.totalorder %s6800_s30, 2  ;;  %s4627_s9 = scalar_lea.sflag [#allocation4], %s4626_s25 }
0x1297   : > { %p8164_p5 = scmp.ne.s32.totalorder %s8163_s15, 0 }
0x1299   : > { %p5925_p0 = pnand %p8165_p7, %p8164_p5 }
0x129b   : > { %6783 = dma.done.wait (!%p5925_p0), %s4627_s9, 128  }
0x129c   : > { %6785 = vsyncadd (!%p5925_p0), %s4627_s9, 4294967168  ;;  %s8166_s30 = sld [smem:[#allocation54_spill]]  ;;  %s8167_s6 = sld [smem:[#allocation52_spill]] }
0x129d   : > { %s8168_s29 = sld [smem:[#allocation55_spill]]  ;;  %s8169_s3 = smov %s6792_s28 }
0x12a2   : > { %p50_p3 = scmp.ge.s32.totalorder %s8166_s30, 4   ;;  %s8170_s28 = smov %s8167_s6 }
0x12a4   :  { %52 = sbr.rel (!%p50_p3) target bundleno = 42 (0x2a), region = 262 }
0x12ab   :  { %4632 = vsyncpa [#allocation3], 1 }
0x12ac   :  { %4634 = vsyncpa [#allocation3 + $0x1], 1 }
0x12ad   :  { %4635 = vsyncpa [#allocation6], 1 }
0x12ae   :  { %4637 = vsyncpa [#allocation6 + $0x1], 1 }
0x12af   :  { %4638 = vsyncpa [#allocation9], 1 }
0x12b0   :  { %4640 = vsyncpa [#allocation9 + $0x1], 1 }
0x12b1   :  { %4641 = vsyncpa [#allocation12], 1 }
0x12b2   :  { %4642 = vsyncpa [#allocation15], 1 }
0x12b3   :  { %4643 = vsyncpa [#allocation18], 1 }
0x12b4   :  { %4644 = vsyncpa [#allocation21], 1 }
0x12b5   :  { %4645 = vsyncpa [#allocation24], 1 }
0x12b6   :  { %4646 = vsyncpa [#allocation27], 1 }
0x12b7   :  { %4647 = vsyncpa [#allocation30], 1 }
0x12b8   :  { %4648 = vsyncpa [#allocation33], 1 }
0x12b9   :  { %4649 = vsyncpa [#allocation36], 1 }
0x12ba   :  { %4650 = vsyncpa [#allocation4], 1 }
0x12bb   :  { %4652 = vsyncpa [#allocation4 + $0x1], 1 }

</bundles_post_ra>
